<compile_context>
chip_gen: v7x
topology: tpu7x:2x2x1
jax: 0.10.0
libtpu: 0.0.40
codegen_flags: <defaults>
</compile_context>

<pallas_src>
import functools

import numpy as np
import jax
import jax.numpy as jnp
from jax.experimental import pallas as pl
from jax.experimental.pallas import tpu as pltpu

LEAKY_SLOPE = 0.01            # nn.LeakyReLU() default negative_slope
LANE = 128
SUBLANE = 8
TM = 256                      # M (row) chunk inside the head conv kernel
TAIL_SPATIAL = 8              # conv layers with input spatial <= this fuse
# 48 MiB: above the 16/32 MiB scoped defaults, below v7x's 64 MiB physical
# per TensorCore.  Re-derive per generation if tiles / buffering are enlarged.
VMEM_LIMIT = 48 * 1024 * 1024


def _round_up(x, m):
    return (x + m - 1) // m * m


def _pick_tn(batch, cout_p):
    """Cout tile: keep >= 4 parallel grid steps where possible (v7x shards
    parallel axes across 2 TensorCores and the pipeline wants depth); else
    fall back to the smallest lane-multiple tile."""
    for tn in (512, 256, 128):
        if cout_p % tn == 0 and batch * (cout_p // tn) >= 4:
            return tn
    return 128 if cout_p % 128 == 0 else cout_p


# ---------------------------------------------------------------------------
# Head conv kernel: 3x3 stride-2 conv = 3 K-concatenated MXU dots + bias +
# LeakyReLU, with in-kernel M tiling.
# ---------------------------------------------------------------------------
def _conv3x3s2_kernel(xe_ref, xo_ref, w_ref, b_ref, o_ref, *, M, Wo, slope, tm):
    """One (batch, Cout-tile) block.

    xe_ref/xo_ref: (1, Le/Lo, 3*Cin_p) even/odd-row slabs with the three kw
    column phases concatenated on the channel (contraction) axis, so each kh
    tap is one contiguous 2-D matmul:
        kh=0 -> xe rows [s, s+rows)         kh=1 -> xo rows [s, s+rows)
        kh=2 -> xe rows [s+Wo, s+Wo+rows)
    w_ref: (3, 3*Cin_p, tn) bf16; b_ref: (1, tn) f32.
    """
    bias = b_ref[...]
    for s in range(0, M, tm):                           # static M tiling
        rows = min(tm, M - s)
        acc = jnp.dot(xe_ref[0, s:s + rows, :], w_ref[0],
                      preferred_element_type=jnp.float32)
        acc = acc + jnp.dot(xo_ref[0, s:s + rows, :], w_ref[1],
                            preferred_element_type=jnp.float32)
        acc = acc + jnp.dot(xe_ref[0, s + Wo:s + Wo + rows, :], w_ref[2],
                            preferred_element_type=jnp.float32)
        acc = acc + bias
        acc = jnp.where(acc >= 0.0, acc, acc * slope)   # LeakyReLU in f32
        o_ref[0, s:s + rows, :] = acc.astype(o_ref.dtype)


def _phase_split(x):
    """(B, H, W, Cp) -> even/odd-row K-concat slabs (B, *, 3*Cp) + (Ho, Wo)."""
    B, H, W, Cp = x.shape
    Ho, Wo = (H + 1) // 2, (W + 1) // 2
    xp = jnp.pad(x, ((0, 0), (1, 1), (1, 1), (0, 0)))
    cols = [xp[:, :, kw:kw + 2 * Wo - 1:2, :] for kw in range(3)]
    xcat = jnp.concatenate(cols, axis=-1)               # (B, H+2, Wo, 3*Cp)
    xe = xcat[:, 0::2].reshape(B, -1, 3 * Cp)           # rows for kh = 0, 2
    xo = xcat[:, 1::2].reshape(B, -1, 3 * Cp)           # rows for kh = 1
    return xe, xo, Ho, Wo


def conv3x3_s2_leaky(xe, xo, w3, b_row, *, Ho, Wo, tn):
    """xe/xo: (B, Le/Lo, 3*Cin_p) bf16; w3: (3, 3*Cin_p, Cout_p) bf16;
    b_row: (1, Cout_p) f32.  Returns (B, Ho*Wo, Cout_p) bf16."""
    B, Le, K3 = xe.shape
    Lo = xo.shape[1]
    Cout = w3.shape[-1]
    M = Ho * Wo
    n_blocks = Cout // tn

    flops = 2 * B * M * 3 * K3 * Cout
    bytes_accessed = (B * (Le + Lo) * K3 * 2        # bf16 slabs (once per b)
                      + B * 3 * K3 * Cout * 2       # bf16 weights, refetched per b
                      + B * Cout * 4                # f32 bias
                      + B * M * Cout * 2)           # bf16 output

    kernel = functools.partial(_conv3x3s2_kernel, M=M, Wo=Wo,
                               slope=LEAKY_SLOPE, tm=TM)
    out = pl.pallas_call(
        kernel,
        out_shape=jax.ShapeDtypeStruct((B, M, Cout), jnp.bfloat16),
        grid=(B, n_blocks),
        in_specs=[
            pl.BlockSpec((1, Le, K3), lambda b, n: (b, 0, 0)),
            pl.BlockSpec((1, Lo, K3), lambda b, n: (b, 0, 0)),
            # NOTE(v6e): tn in {256, 512} / pl.Buffered(3) on this spec is a
            # free few-% win given the 128 MiB VMEM; kept at 2 buffers for v7x.
            pl.BlockSpec((3, K3, tn), lambda b, n: (0, 0, n)),
            pl.BlockSpec((1, tn), lambda b, n: (0, n)),
        ],
        out_specs=pl.BlockSpec((1, M, tn), lambda b, n: (b, 0, n)),
        compiler_params=pltpu.CompilerParams(
            dimension_semantics=("parallel", "parallel"),
            vmem_limit_bytes=VMEM_LIMIT),
        cost_estimate=pl.CostEstimate(flops=flops, transcendentals=0,
                                      bytes_accessed=bytes_accessed),
    )(xe, xo, w3, b_row)
    return out


# ---------------------------------------------------------------------------
# Fused tail kernel: all spatial<=8 convs + EqualLinear in one pallas_call.
# Activation stays resident in VMEM; taps are picked with constant 0/1
# gather matmuls (exact in bf16).
# ---------------------------------------------------------------------------
def _tail_kernel(*refs, n_layers, slope):
    """refs = (x, [gather_i, w_i, b_i] * n_layers, w_lin, b_lin, out)."""
    x_ref = refs[0]
    o_ref = refs[-1]
    wlin_ref = refs[1 + 3 * n_layers]
    blin_ref = refs[2 + 3 * n_layers]

    h = x_ref[0]                                        # (HW0_p, Cin_p) bf16
    for i in range(n_layers):
        g_ref = refs[1 + 3 * i]                         # (9*Mp, HWp) bf16 0/1
        w_ref = refs[2 + 3 * i]                         # (9, Cin_p, Cout_p) bf16
        b_ref = refs[3 + 3 * i]                         # (1, Cout_p) f32
        mp = g_ref.shape[0] // 9
        cout = w_ref.shape[-1]
        # One gather matmul builds all 9 tap slabs (tap-major rows), exactly:
        # each G row has a single 1.0 (or is all-zero on the zero padding).
        taps = jnp.dot(g_ref[...], h,
                       preferred_element_type=jnp.float32).astype(jnp.bfloat16)
        acc = jnp.zeros((mp, cout), jnp.float32)
        for t in range(9):
            acc = acc + jnp.dot(taps[t * mp:(t + 1) * mp, :], w_ref[t],
                                preferred_element_type=jnp.float32)
        acc = acc + b_ref[...]
        acc = jnp.where(acc >= 0.0, acc, acc * slope)
        # Rows >= the true M are junk but are never selected by the next G.
        h = acc.astype(jnp.bfloat16)
    # After the last conv the spatial extent is 1x1: row 0 == x.view(-1, C).
    y = jnp.dot(h[0:1, :], wlin_ref[...], preferred_element_type=jnp.float32)
    o_ref[0] = y + blin_ref[...]


def tail_convs_linear(h, tail_layers, w_lin, b_lin):
    """h: (B, HW0_p, Cin_p) bf16.  Returns (B, Cout_p) f32."""
    B, HW0p, Cin0 = h.shape
    Cp = w_lin.shape[-1]
    n_layers = len(tail_layers)

    args = [h]
    in_specs = [pl.BlockSpec((1, HW0p, Cin0), lambda b: (b, 0, 0))]
    flops = 2 * B * Cp * Cp
    for (g, w, bb) in tail_layers:
        args += [g, w, bb]
        in_specs += [pl.BlockSpec(g.shape, lambda b: (0, 0)),
                     pl.BlockSpec(w.shape, lambda b: (0, 0, 0)),
                     pl.BlockSpec(bb.shape, lambda b: (0, 0))]
        flops += 2 * B * g.shape[0] * (g.shape[1] + w.shape[2]) * w.shape[1]
    args += [w_lin, b_lin]
    in_specs += [pl.BlockSpec(w_lin.shape, lambda b: (0, 0)),
                 pl.BlockSpec(b_lin.shape, lambda b: (0, 0))]
    bytes_accessed = int(sum(int(np.prod(a.shape)) * a.dtype.itemsize
                             for a in args) + B * Cp * 4)

    kernel = functools.partial(_tail_kernel, n_layers=n_layers,
                               slope=LEAKY_SLOPE)
    out = pl.pallas_call(
        kernel,
        out_shape=jax.ShapeDtypeStruct((B, 1, Cp), jnp.float32),
        grid=(B,),
        in_specs=in_specs,
        out_specs=pl.BlockSpec((1, 1, Cp), lambda b: (b, 0, 0)),
        compiler_params=pltpu.CompilerParams(
            dimension_semantics=("parallel",),
            vmem_limit_bytes=VMEM_LIMIT),
        cost_estimate=pl.CostEstimate(flops=int(flops), transcendentals=0,
                                      bytes_accessed=bytes_accessed),
    )(*args)
    return out.reshape(B, Cp)


def _gather_matrix(S, hw_in_p):
    """0/1 matrix selecting, for every (tap, output position) of a
    Conv2d(k=3, s=2, p=1) with input spatial S, the input row of the
    flattened (hw_in_p, C) activation (all-zero row where the tap lands on
    the zero padding).  Rows are tap-major; output positions are padded to a
    sublane multiple (padded rows are never used downstream)."""
    So = (S + 1) // 2
    M = So * So
    Mp = _round_up(M, SUBLANE)
    G = np.zeros((9, Mp, hw_in_p), np.float32)
    for kh in range(3):
        for kw in range(3):
            t = kh * 3 + kw
            for oh in range(So):
                for ow in range(So):
                    ih, iw = 2 * oh + kh - 1, 2 * ow + kw - 1
                    if 0 <= ih < S and 0 <= iw < S:
                        G[t, oh * So + ow, ih * S + iw] = 1.0
    return jnp.asarray(G.reshape(9 * Mp, hw_in_p), jnp.bfloat16), Mp


# ---------------------------------------------------------------------------
# Parameters (PyTorch layout) + one-time repack into kernel-friendly layouts
# ---------------------------------------------------------------------------
def init_gradual_style_block_params(key, in_c, out_c, spatial):
    num_pools = int(np.log2(spatial))
    params = {"convs": []}
    cin = in_c
    for _ in range(num_pools):
        key, k_w, k_b = jax.random.split(key, 3)
        w = jax.random.normal(k_w, (out_c, cin, 3, 3), jnp.float32) * 0.1
        b = jax.random.normal(k_b, (out_c,), jnp.float32) * 0.1
        params["convs"].append((w, b))
        cin = out_c
    # EqualLinear(out_c, out_c, lr_mul=1): weight randn(out, in), bias zeros.
    key, k_l = jax.random.split(key)
    params["linear_w"] = jax.random.normal(k_l, (out_c, out_c), jnp.float32)
    params["linear_b"] = jnp.zeros((out_c,), jnp.float32)
    return params


def prepare_params(params, in_c, out_c, spatial):
    """One-time repack (outside the jitted forward): pad channels to lane
    multiples, build the K-concat head weights (3, 3*Cin_p, Cout_p), the
    9-tap tail weights + constant gather matrices, and fold the EqualLinear
    scale/transpose into a bf16 weight."""
    cin_p = _round_up(in_c, LANE)
    cout_p = _round_up(out_c, LANE)
    prep = {"head": [], "tail": []}

    cin, cinp, S = in_c, cin_p, spatial
    tail_raw = []
    for (w, b) in params["convs"]:
        # (Cout, Cin, 3, 3) -> (kh, kw, Cin_p, Cout_p), zero-padded channels.
        w_t = jnp.transpose(w, (2, 3, 1, 0))
        w_t = jnp.pad(w_t, ((0, 0), (0, 0), (0, cinp - cin),
                            (0, cout_p - out_c)))
        b_p = jnp.pad(b, (0, cout_p - out_c)).reshape(1, cout_p)
        b_p = b_p.astype(jnp.float32)
        if S > TAIL_SPATIAL:
            # Head layer: one (3*Cin_p, Cout_p) slab per kh (kw-major rows).
            prep["head"].append(
                (w_t.reshape(3, 3 * cinp, cout_p).astype(jnp.bfloat16), b_p))
        else:
            # Tail layer: 9-tap layout for the fused kernel.
            tail_raw.append(
                (S, w_t.reshape(9, cinp, cout_p).astype(jnp.bfloat16), b_p))
        cin, cinp, S = out_c, cout_p, (S + 1) // 2

    # Constant gather matrices for the fused tail (valid rows first, zero
    # row/column padding after; padded slots are never selected downstream).
    hw_in_p = _round_up(tail_raw[0][0] ** 2, SUBLANE) if tail_raw else SUBLANE
    for (s_i, w9, b_p) in tail_raw:
        g, mp = _gather_matrix(s_i, hw_in_p)
        prep["tail"].append((g, w9, b_p))
        hw_in_p = mp

    # EqualLinear: out = x @ (W / sqrt(in_dim)).T + bias  (lr_mul = 1).
    scale = 1.0 / np.sqrt(out_c)
    w_eff = (params["linear_w"] * scale).T                       # (in, out)
    w_eff = jnp.pad(w_eff, ((0, cout_p - out_c), (0, cout_p - out_c)))
    b_eff = jnp.pad(params["linear_b"], (0, cout_p - out_c)).reshape(1, cout_p)
    prep["linear_w"] = w_eff.astype(jnp.bfloat16)
    prep["linear_b"] = b_eff.astype(jnp.float32)
    return prep


# ---------------------------------------------------------------------------
# Forward pass
# ---------------------------------------------------------------------------
def gradual_style_block_forward(prep, x_nchw, *, out_c):
    B, in_c, H, W = x_nchw.shape
    cin_p = _round_up(in_c, LANE)
    cout_p = prep["linear_w"].shape[-1]
    tn = _pick_tn(B, cout_p)

    # NCHW -> NHWC (channels on lanes), pad channels, bf16 for MXU traffic.
    x = jnp.transpose(x_nchw, (0, 2, 3, 1)).astype(jnp.bfloat16)
    x = jnp.pad(x, ((0, 0), (0, 0), (0, 0), (0, cin_p - in_c)))

    # Head: one Pallas conv kernel per large-spatial layer.
    for (w3, b_row) in prep["head"]:
        xe, xo, Ho, Wo = _phase_split(x)
        y = conv3x3_s2_leaky(xe, xo, w3, b_row, Ho=Ho, Wo=Wo, tn=tn)
        x = y.reshape(B, Ho, Wo, w3.shape[-1])

    # Fused tail: all spatial<=8 convs + EqualLinear in a single kernel.
    _, Ht, Wt, Ct = x.shape
    h = x.reshape(B, Ht * Wt, Ct)
    hw0_p = prep["tail"][0][0].shape[1] if prep["tail"] else Ht * Wt
    if hw0_p > Ht * Wt:
        h = jnp.pad(h, ((0, 0), (0, hw0_p - Ht * Wt), (0, 0)))
    y = tail_convs_linear(h, prep["tail"], prep["linear_w"], prep["linear_b"])
    return y[:, :out_c]


if __name__ == "__main__":
    B, in_c, out_c, spatial = 2, 4, 32, 16

    key = jax.random.PRNGKey(0)
    key, k_x = jax.random.split(key)
    x = jax.random.normal(k_x, (B, in_c, spatial, spatial), jnp.float32)

    params = init_gradual_style_block_params(key, in_c, out_c, spatial)
    prep = prepare_params(params, in_c, out_c, spatial)   # one-time repack

    fwd = jax.jit(functools.partial(gradual_style_block_forward, out_c=out_c))
    y = fwd(prep, x)
    jax.block_until_ready(y)

    # Plain-JAX f32 reference of the PyTorch module for a sanity check.
    def reference(params, x):
        h = x
        for (w, b) in params["convs"]:
            h = jax.lax.conv_general_dilated(
                h, w, window_strides=(2, 2), padding=((1, 1), (1, 1)),
                dimension_numbers=("NCHW", "OIHW", "NCHW"))
            h = h + b.reshape(1, -1, 1, 1)
            h = jnp.where(h >= 0, h, h * LEAKY_SLOPE)
        h = h.reshape(-1, out_c)
        scale = 1.0 / np.sqrt(out_c)
        return h @ (params["linear_w"] * scale).T + params["linear_b"]

    y_ref = reference(params, x)

    assert y.shape == (B, out_c), y.shape
    assert bool(jnp.all(jnp.isfinite(y)))
    max_err = float(jnp.max(jnp.abs(y - y_ref)))
    tol = 0.08 * float(jnp.max(jnp.abs(y_ref))) + 1e-3   # loose: bf16 matmuls
    assert max_err < tol, (max_err, tol)
    print("KERNEL_OK")
</pallas_src>

<mosaic_0001>
module attributes {stable_mosaic.version = 11 : i64} {
  func.func @_conv3x3s2_kernel(%arg0: i32, %arg1: i32, %arg2: memref<1x72x384xbf16, #tpu.memory_space<vmem>>, %arg3: memref<1x72x384xbf16, #tpu.memory_space<vmem>>, %arg4: memref<3x384x128xbf16, #tpu.memory_space<vmem>>, %arg5: memref<1x128xf32, #tpu.memory_space<vmem>>, %arg6: memref<1x64x128xbf16, #tpu.memory_space<vmem>>) attributes {dimension_semantics = [#tpu.dimension_semantics<parallel>, #tpu.dimension_semantics<parallel>], iteration_bounds = array<i64: 2, 1>, scalar_prefetch = 0 : i64, scratch_operands = 0 : i64, tpu.core_type = #tpu.core_type<tc>, window_params = [{transform_indices = @transform_0, window_bounds = array<i64: 1, 72, 384>}, {transform_indices = @transform_1, window_bounds = array<i64: 1, 72, 384>}, {transform_indices = @transform_2, window_bounds = array<i64: 3, 384, 128>}, {transform_indices = @transform_3, window_bounds = array<i64: 1, 128>}, {transform_indices = @transform_4, window_bounds = array<i64: 1, 64, 128>}]} {
    %c0 = arith.constant 0 : index
    %c0_0 = arith.constant 0 : index
    %0 = vector.load %arg5[%c0, %c0_0] : memref<1x128xf32, #tpu.memory_space<vmem>>, vector<1x128xf32>
    %c0_1 = arith.constant 0 : index
    %c0_2 = arith.constant 0 : index
    %c0_3 = arith.constant 0 : index
    %1 = vector.load %arg2[%c0_1, %c0_2, %c0_3] : memref<1x72x384xbf16, #tpu.memory_space<vmem>>, vector<1x64x384xbf16>
    %2 = vector.shape_cast %1 : vector<1x64x384xbf16> to vector<64x384xbf16>
    %c0_4 = arith.constant 0 : index
    %c0_5 = arith.constant 0 : index
    %c0_6 = arith.constant 0 : index
    %3 = vector.load %arg4[%c0_4, %c0_5, %c0_6] : memref<3x384x128xbf16, #tpu.memory_space<vmem>>, vector<1x384x128xbf16>
    %4 = vector.shape_cast %3 : vector<1x384x128xbf16> to vector<384x128xbf16>
    %cst = arith.constant dense<0.000000e+00> : vector<64x128xf32>
    %5 = tpu.matmul %2, %4, %cst {dimension_numbers = #tpu.dot_dimension_numbers<[1], [0], [0], [1], [0, 0, 1, 1], [], []>} : vector<64x384xbf16>, vector<384x128xbf16>, vector<64x128xf32> -> vector<64x128xf32>
    %c0_7 = arith.constant 0 : index
    %c0_8 = arith.constant 0 : index
    %c0_9 = arith.constant 0 : index
    %6 = vector.load %arg3[%c0_7, %c0_8, %c0_9] : memref<1x72x384xbf16, #tpu.memory_space<vmem>>, vector<1x64x384xbf16>
    %7 = vector.shape_cast %6 : vector<1x64x384xbf16> to vector<64x384xbf16>
    %c1 = arith.constant 1 : index
    %c0_10 = arith.constant 0 : index
    %c0_11 = arith.constant 0 : index
    %8 = vector.load %arg4[%c1, %c0_10, %c0_11] : memref<3x384x128xbf16, #tpu.memory_space<vmem>>, vector<1x384x128xbf16>
    %9 = vector.shape_cast %8 : vector<1x384x128xbf16> to vector<384x128xbf16>
    %cst_12 = arith.constant dense<0.000000e+00> : vector<64x128xf32>
    %10 = tpu.matmul %7, %9, %cst_12 {dimension_numbers = #tpu.dot_dimension_numbers<[1], [0], [0], [1], [0, 0, 1, 1], [], []>} : vector<64x384xbf16>, vector<384x128xbf16>, vector<64x128xf32> -> vector<64x128xf32>
    %11 = arith.addf %5, %10 : vector<64x128xf32>
    %c0_13 = arith.constant 0 : index
    %c8 = arith.constant 8 : index
    %c0_14 = arith.constant 0 : index
    %12 = vector.load %arg2[%c0_13, %c8, %c0_14] : memref<1x72x384xbf16, #tpu.memory_space<vmem>>, vector<1x64x384xbf16>
    %13 = vector.shape_cast %12 : vector<1x64x384xbf16> to vector<64x384xbf16>
    %c2 = arith.constant 2 : index
    %c0_15 = arith.constant 0 : index
    %c0_16 = arith.constant 0 : index
    %14 = vector.load %arg4[%c2, %c0_15, %c0_16] : memref<3x384x128xbf16, #tpu.memory_space<vmem>>, vector<1x384x128xbf16>
    %15 = vector.shape_cast %14 : vector<1x384x128xbf16> to vector<384x128xbf16>
    %cst_17 = arith.constant dense<0.000000e+00> : vector<64x128xf32>
    %16 = tpu.matmul %13, %15, %cst_17 {dimension_numbers = #tpu.dot_dimension_numbers<[1], [0], [0], [1], [0, 0, 1, 1], [], []>} : vector<64x384xbf16>, vector<384x128xbf16>, vector<64x128xf32> -> vector<64x128xf32>
    %17 = arith.addf %11, %16 : vector<64x128xf32>
    %18 = vector.broadcast %0 : vector<1x128xf32> to vector<64x128xf32>
    %19 = arith.addf %17, %18 : vector<64x128xf32>
    %cst_18 = arith.constant 0.000000e+00 : f32
    %20 = vector.broadcast %cst_18 : f32 to vector<64x128xf32>
    %21 = arith.cmpf oge, %19, %20 : vector<64x128xf32>
    %cst_19 = arith.constant 0.00999999977 : f32
    %22 = vector.broadcast %cst_19 : f32 to vector<64x128xf32>
    %23 = arith.mulf %19, %22 : vector<64x128xf32>
    %24 = arith.select %21, %19, %23 : vector<64x128xi1>, vector<64x128xf32>
    %25 = arith.truncf %24 : vector<64x128xf32> to vector<64x128xbf16>
    %c0_20 = arith.constant 0 : index
    %c0_21 = arith.constant 0 : index
    %c0_22 = arith.constant 0 : index
    %26 = vector.load %arg6[%c0_20, %c0_21, %c0_22] : memref<1x64x128xbf16, #tpu.memory_space<vmem>>, vector<1x64x128xbf16>
    %27 = vector.shape_cast %26 : vector<1x64x128xbf16> to vector<64x128xbf16>
    %28 = vector.shape_cast %25 : vector<64x128xbf16> to vector<1x64x128xbf16>
    tpu.vector_store %arg6[%c0_20, %c0_21, %c0_22], %28 {strides = array<i32>} : memref<1x64x128xbf16, #tpu.memory_space<vmem>>, vector<1x64x128xbf16>,
    return
  }
  func.func @transform_0(%arg0: i32, %arg1: i32) -> (i32, i32, i32) {
    %c0_i32 = arith.constant 0 : i32
    %c0_i32_0 = arith.constant 0 : i32
    %c0_i32_1 = arith.constant 0 : i32
    return %arg0, %c0_i32, %c0_i32_0 : i32, i32, i32
  }
  func.func @transform_1(%arg0: i32, %arg1: i32) -> (i32, i32, i32) {
    %c0_i32 = arith.constant 0 : i32
    %c0_i32_0 = arith.constant 0 : i32
    %c0_i32_1 = arith.constant 0 : i32
    return %arg0, %c0_i32, %c0_i32_0 : i32, i32, i32
  }
  func.func @transform_2(%arg0: i32, %arg1: i32) -> (i32, i32, i32) {
    %c0_i32 = arith.constant 0 : i32
    %c0_i32_0 = arith.constant 0 : i32
    %c0_i32_1 = arith.constant 0 : i32
    return %c0_i32, %c0_i32_0, %arg1 : i32, i32, i32
  }
  func.func @transform_3(%arg0: i32, %arg1: i32) -> (i32, i32) {
    %c0_i32 = arith.constant 0 : i32
    %c0_i32_0 = arith.constant 0 : i32
    return %c0_i32, %arg1 : i32, i32
  }
  func.func @transform_4(%arg0: i32, %arg1: i32) -> (i32, i32, i32) {
    %c0_i32 = arith.constant 0 : i32
    %c0_i32_0 = arith.constant 0 : i32
    return %arg0, %c0_i32, %arg1 : i32, i32, i32
  }
}

module attributes {stable_mosaic.version = 11 : i64} {
  func.func @_tail_kernel(%arg0: i32, %arg1: memref<1x64x128xbf16, #tpu.memory_space<vmem>>, %arg2: memref<144x64xbf16, #tpu.memory_space<vmem>>, %arg3: memref<9x128x128xbf16, #tpu.memory_space<vmem>>, %arg4: memref<1x128xf32, #tpu.memory_space<vmem>>, %arg5: memref<72x16xbf16, #tpu.memory_space<vmem>>, %arg6: memref<9x128x128xbf16, #tpu.memory_space<vmem>>, %arg7: memref<1x128xf32, #tpu.memory_space<vmem>>, %arg8: memref<72x8xbf16, #tpu.memory_space<vmem>>, %arg9: memref<9x128x128xbf16, #tpu.memory_space<vmem>>, %arg10: memref<1x128xf32, #tpu.memory_space<vmem>>, %arg11: memref<128x128xbf16, #tpu.memory_space<vmem>>, %arg12: memref<1x128xf32, #tpu.memory_space<vmem>>, %arg13: memref<1x1x128xf32, #tpu.memory_space<vmem>>) attributes {dimension_semantics = [#tpu.dimension_semantics<parallel>], iteration_bounds = array<i64: 2>, scalar_prefetch = 0 : i64, scratch_operands = 0 : i64, tpu.core_type = #tpu.core_type<tc>, window_params = [{transform_indices = @transform_0, window_bounds = array<i64: 1, 64, 128>}, {pipeline_mode = #tpu.pipeline_mode<synchronous>, transform_indices = @transform_1, window_bounds = array<i64: 144, 64>}, {pipeline_mode = #tpu.pipeline_mode<synchronous>, transform_indices = @transform_2, window_bounds = array<i64: 9, 128, 128>}, {pipeline_mode = #tpu.pipeline_mode<synchronous>, transform_indices = @transform_3, window_bounds = array<i64: 1, 128>}, {pipeline_mode = #tpu.pipeline_mode<synchronous>, transform_indices = @transform_4, window_bounds = array<i64: 72, 16>}, {pipeline_mode = #tpu.pipeline_mode<synchronous>, transform_indices = @transform_5, window_bounds = array<i64: 9, 128, 128>}, {pipeline_mode = #tpu.pipeline_mode<synchronous>, transform_indices = @transform_6, window_bounds = array<i64: 1, 128>}, {pipeline_mode = #tpu.pipeline_mode<synchronous>, transform_indices = @transform_7, window_bounds = array<i64: 72, 8>}, {pipeline_mode = #tpu.pipeline_mode<synchronous>, transform_indices = @transform_8, window_bounds = array<i64: 9, 128, 128>}, {pipeline_mode = #tpu.pipeline_mode<synchronous>, transform_indices = @transform_9, window_bounds = array<i64: 1, 128>}, {pipeline_mode = #tpu.pipeline_mode<synchronous>, transform_indices = @transform_10, window_bounds = array<i64: 128, 128>}, {pipeline_mode = #tpu.pipeline_mode<synchronous>, transform_indices = @transform_11, window_bounds = array<i64: 1, 128>}, {transform_indices = @transform_12, window_bounds = array<i64: 1, 1, 128>}]} {
    %c0 = arith.constant 0 : index
    %c0_0 = arith.constant 0 : index
    %c0_1 = arith.constant 0 : index
    %0 = vector.load %arg1[%c0, %c0_0, %c0_1] : memref<1x64x128xbf16, #tpu.memory_space<vmem>>, vector<1x64x128xbf16>
    %1 = vector.shape_cast %0 : vector<1x64x128xbf16> to vector<64x128xbf16>
    %c0_2 = arith.constant 0 : index
    %c0_3 = arith.constant 0 : index
    %2 = vector.load %arg2[%c0_2, %c0_3] : memref<144x64xbf16, #tpu.memory_space<vmem>>, vector<144x64xbf16>
    %cst = arith.constant dense<0.000000e+00> : vector<144x128xf32>
    %3 = tpu.matmul %2, %1, %cst {dimension_numbers = #tpu.dot_dimension_numbers<[1], [0], [0], [1], [0, 0, 1, 1], [], []>} : vector<144x64xbf16>, vector<64x128xbf16>, vector<144x128xf32> -> vector<144x128xf32>
    %4 = arith.truncf %3 : vector<144x128xf32> to vector<144x128xbf16>
    %cst_4 = arith.constant 0.000000e+00 : f32
    %5 = vector.broadcast %cst_4 : f32 to vector<16x128xf32>
    %6 = vector.extract_strided_slice %4 {offsets = [0, 0], sizes = [16, 128], strides = [1, 1]} : vector<144x128xbf16> to vector<16x128xbf16>
    %c0_5 = arith.constant 0 : index
    %c0_6 = arith.constant 0 : index
    %c0_7 = arith.constant 0 : index
    %7 = vector.load %arg3[%c0_5, %c0_6, %c0_7] : memref<9x128x128xbf16, #tpu.memory_space<vmem>>, vector<1x128x128xbf16>
    %8 = vector.shape_cast %7 : vector<1x128x128xbf16> to vector<128x128xbf16>
    %cst_8 = arith.constant dense<0.000000e+00> : vector<16x128xf32>
    %9 = tpu.matmul %6, %8, %cst_8 {dimension_numbers = #tpu.dot_dimension_numbers<[1], [0], [0], [1], [0, 0, 1, 1], [], []>} : vector<16x128xbf16>, vector<128x128xbf16>, vector<16x128xf32> -> vector<16x128xf32>
    %10 = arith.addf %5, %9 : vector<16x128xf32>
    %11 = vector.extract_strided_slice %4 {offsets = [16, 0], sizes = [16, 128], strides = [1, 1]} : vector<144x128xbf16> to vector<16x128xbf16>
    %c1 = arith.constant 1 : index
    %c0_9 = arith.constant 0 : index
    %c0_10 = arith.constant 0 : index
    %12 = vector.load %arg3[%c1, %c0_9, %c0_10] : memref<9x128x128xbf16, #tpu.memory_space<vmem>>, vector<1x128x128xbf16>
    %13 = vector.shape_cast %12 : vector<1x128x128xbf16> to vector<128x128xbf16>
    %cst_11 = arith.constant dense<0.000000e+00> : vector<16x128xf32>
    %14 = tpu.matmul %11, %13, %cst_11 {dimension_numbers = #tpu.dot_dimension_numbers<[1], [0], [0], [1], [0, 0, 1, 1], [], []>} : vector<16x128xbf16>, vector<128x128xbf16>, vector<16x128xf32> -> vector<16x128xf32>
    %15 = arith.addf %10, %14 : vector<16x128xf32>
    %16 = vector.extract_strided_slice %4 {offsets = [32, 0], sizes = [16, 128], strides = [1, 1]} : vector<144x128xbf16> to vector<16x128xbf16>
    %c2 = arith.constant 2 : index
    %c0_12 = arith.constant 0 : index
    %c0_13 = arith.constant 0 : index
    %17 = vector.load %arg3[%c2, %c0_12, %c0_13] : memref<9x128x128xbf16, #tpu.memory_space<vmem>>, vector<1x128x128xbf16>
    %18 = vector.shape_cast %17 : vector<1x128x128xbf16> to vector<128x128xbf16>
    %cst_14 = arith.constant dense<0.000000e+00> : vector<16x128xf32>
    %19 = tpu.matmul %16, %18, %cst_14 {dimension_numbers = #tpu.dot_dimension_numbers<[1], [0], [0], [1], [0, 0, 1, 1], [], []>} : vector<16x128xbf16>, vector<128x128xbf16>, vector<16x128xf32> -> vector<16x128xf32>
    %20 = arith.addf %15, %19 : vector<16x128xf32>
    %21 = vector.extract_strided_slice %4 {offsets = [48, 0], sizes = [16, 128], strides = [1, 1]} : vector<144x128xbf16> to vector<16x128xbf16>
    %c3 = arith.constant 3 : index
    %c0_15 = arith.constant 0 : index
    %c0_16 = arith.constant 0 : index
    %22 = vector.load %arg3[%c3, %c0_15, %c0_16] : memref<9x128x128xbf16, #tpu.memory_space<vmem>>, vector<1x128x128xbf16>
    %23 = vector.shape_cast %22 : vector<1x128x128xbf16> to vector<128x128xbf16>
    %cst_17 = arith.constant dense<0.000000e+00> : vector<16x128xf32>
    %24 = tpu.matmul %21, %23, %cst_17 {dimension_numbers = #tpu.dot_dimension_numbers<[1], [0], [0], [1], [0, 0, 1, 1], [], []>} : vector<16x128xbf16>, vector<128x128xbf16>, vector<16x128xf32> -> vector<16x128xf32>
    %25 = arith.addf %20, %24 : vector<16x128xf32>
    %26 = vector.extract_strided_slice %4 {offsets = [64, 0], sizes = [16, 128], strides = [1, 1]} : vector<144x128xbf16> to vector<16x128xbf16>
    %c4 = arith.constant 4 : index
    %c0_18 = arith.constant 0 : index
    %c0_19 = arith.constant 0 : index
    %27 = vector.load %arg3[%c4, %c0_18, %c0_19] : memref<9x128x128xbf16, #tpu.memory_space<vmem>>, vector<1x128x128xbf16>
    %28 = vector.shape_cast %27 : vector<1x128x128xbf16> to vector<128x128xbf16>
    %cst_20 = arith.constant dense<0.000000e+00> : vector<16x128xf32>
    %29 = tpu.matmul %26, %28, %cst_20 {dimension_numbers = #tpu.dot_dimension_numbers<[1], [0], [0], [1], [0, 0, 1, 1], [], []>} : vector<16x128xbf16>, vector<128x128xbf16>, vector<16x128xf32> -> vector<16x128xf32>
    %30 = arith.addf %25, %29 : vector<16x128xf32>
    %31 = vector.extract_strided_slice %4 {offsets = [80, 0], sizes = [16, 128], strides = [1, 1]} : vector<144x128xbf16> to vector<16x128xbf16>
    %c5 = arith.constant 5 : index
    %c0_21 = arith.constant 0 : index
    %c0_22 = arith.constant 0 : index
    %32 = vector.load %arg3[%c5, %c0_21, %c0_22] : memref<9x128x128xbf16, #tpu.memory_space<vmem>>, vector<1x128x128xbf16>
    %33 = vector.shape_cast %32 : vector<1x128x128xbf16> to vector<128x128xbf16>
    %cst_23 = arith.constant dense<0.000000e+00> : vector<16x128xf32>
    %34 = tpu.matmul %31, %33, %cst_23 {dimension_numbers = #tpu.dot_dimension_numbers<[1], [0], [0], [1], [0, 0, 1, 1], [], []>} : vector<16x128xbf16>, vector<128x128xbf16>, vector<16x128xf32> -> vector<16x128xf32>
    %35 = arith.addf %30, %34 : vector<16x128xf32>
    %36 = vector.extract_strided_slice %4 {offsets = [96, 0], sizes = [16, 128], strides = [1, 1]} : vector<144x128xbf16> to vector<16x128xbf16>
    %c6 = arith.constant 6 : index
    %c0_24 = arith.constant 0 : index
    %c0_25 = arith.constant 0 : index
    %37 = vector.load %arg3[%c6, %c0_24, %c0_25] : memref<9x128x128xbf16, #tpu.memory_space<vmem>>, vector<1x128x128xbf16>
    %38 = vector.shape_cast %37 : vector<1x128x128xbf16> to vector<128x128xbf16>
    %cst_26 = arith.constant dense<0.000000e+00> : vector<16x128xf32>
    %39 = tpu.matmul %36, %38, %cst_26 {dimension_numbers = #tpu.dot_dimension_numbers<[1], [0], [0], [1], [0, 0, 1, 1], [], []>} : vector<16x128xbf16>, vector<128x128xbf16>, vector<16x128xf32> -> vector<16x128xf32>
    %40 = arith.addf %35, %39 : vector<16x128xf32>
    %41 = vector.extract_strided_slice %4 {offsets = [112, 0], sizes = [16, 128], strides = [1, 1]} : vector<144x128xbf16> to vector<16x128xbf16>
    %c7 = arith.constant 7 : index
    %c0_27 = arith.constant 0 : index
    %c0_28 = arith.constant 0 : index
    %42 = vector.load %arg3[%c7, %c0_27, %c0_28] : memref<9x128x128xbf16, #tpu.memory_space<vmem>>, vector<1x128x128xbf16>
    %43 = vector.shape_cast %42 : vector<1x128x128xbf16> to vector<128x128xbf16>
    %cst_29 = arith.constant dense<0.000000e+00> : vector<16x128xf32>
    %44 = tpu.matmul %41, %43, %cst_29 {dimension_numbers = #tpu.dot_dimension_numbers<[1], [0], [0], [1], [0, 0, 1, 1], [], []>} : vector<16x128xbf16>, vector<128x128xbf16>, vector<16x128xf32> -> vector<16x128xf32>
    %45 = arith.addf %40, %44 : vector<16x128xf32>
    %46 = vector.extract_strided_slice %4 {offsets = [128, 0], sizes = [16, 128], strides = [1, 1]} : vector<144x128xbf16> to vector<16x128xbf16>
    %c8 = arith.constant 8 : index
    %c0_30 = arith.constant 0 : index
    %c0_31 = arith.constant 0 : index
    %47 = vector.load %arg3[%c8, %c0_30, %c0_31] : memref<9x128x128xbf16, #tpu.memory_space<vmem>>, vector<1x128x128xbf16>
    %48 = vector.shape_cast %47 : vector<1x128x128xbf16> to vector<128x128xbf16>
    %cst_32 = arith.constant dense<0.000000e+00> : vector<16x128xf32>
    %49 = tpu.matmul %46, %48, %cst_32 {dimension_numbers = #tpu.dot_dimension_numbers<[1], [0], [0], [1], [0, 0, 1, 1], [], []>} : vector<16x128xbf16>, vector<128x128xbf16>, vector<16x128xf32> -> vector<16x128xf32>
    %50 = arith.addf %45, %49 : vector<16x128xf32>
    %c0_33 = arith.constant 0 : index
    %c0_34 = arith.constant 0 : index
    %51 = vector.load %arg4[%c0_33, %c0_34] : memref<1x128xf32, #tpu.memory_space<vmem>>, vector<1x128xf32>
    %52 = vector.broadcast %51 : vector<1x128xf32> to vector<16x128xf32>
    %53 = arith.addf %50, %52 : vector<16x128xf32>
    %cst_35 = arith.constant 0.000000e+00 : f32
    %54 = vector.broadcast %cst_35 : f32 to vector<16x128xf32>
    %55 = arith.cmpf oge, %53, %54 : vector<16x128xf32>
    %cst_36 = arith.constant 0.00999999977 : f32
    %56 = vector.broadcast %cst_36 : f32 to vector<16x128xf32>
    %57 = arith.mulf %53, %56 : vector<16x128xf32>
    %58 = arith.select %55, %53, %57 : vector<16x128xi1>, vector<16x128xf32>
    %59 = arith.truncf %58 : vector<16x128xf32> to vector<16x128xbf16>
    %c0_37 = arith.constant 0 : index
    %c0_38 = arith.constant 0 : index
    %60 = vector.load %arg5[%c0_37, %c0_38] : memref<72x16xbf16, #tpu.memory_space<vmem>>, vector<72x16xbf16>
    %cst_39 = arith.constant dense<0.000000e+00> : vector<72x128xf32>
    %61 = tpu.matmul %60, %59, %cst_39 {dimension_numbers = #tpu.dot_dimension_numbers<[1], [0], [0], [1], [0, 0, 1, 1], [], []>} : vector<72x16xbf16>, vector<16x128xbf16>, vector<72x128xf32> -> vector<72x128xf32>
    %62 = arith.truncf %61 : vector<72x128xf32> to vector<72x128xbf16>
    %cst_40 = arith.constant 0.000000e+00 : f32
    %63 = vector.broadcast %cst_40 : f32 to vector<8x128xf32>
    %64 = vector.extract_strided_slice %62 {offsets = [0, 0], sizes = [8, 128], strides = [1, 1]} : vector<72x128xbf16> to vector<8x128xbf16>
    %c0_41 = arith.constant 0 : index
    %c0_42 = arith.constant 0 : index
    %c0_43 = arith.constant 0 : index
    %65 = vector.load %arg6[%c0_41, %c0_42, %c0_43] : memref<9x128x128xbf16, #tpu.memory_space<vmem>>, vector<1x128x128xbf16>
    %66 = vector.shape_cast %65 : vector<1x128x128xbf16> to vector<128x128xbf16>
    %cst_44 = arith.constant dense<0.000000e+00> : vector<8x128xf32>
    %67 = tpu.matmul %64, %66, %cst_44 {dimension_numbers = #tpu.dot_dimension_numbers<[1], [0], [0], [1], [0, 0, 1, 1], [], []>} : vector<8x128xbf16>, vector<128x128xbf16>, vector<8x128xf32> -> vector<8x128xf32>
    %68 = arith.addf %63, %67 : vector<8x128xf32>
    %69 = vector.extract_strided_slice %62 {offsets = [8, 0], sizes = [8, 128], strides = [1, 1]} : vector<72x128xbf16> to vector<8x128xbf16>
    %c1_45 = arith.constant 1 : index
    %c0_46 = arith.constant 0 : index
    %c0_47 = arith.constant 0 : index
    %70 = vector.load %arg6[%c1_45, %c0_46, %c0_47] : memref<9x128x128xbf16, #tpu.memory_space<vmem>>, vector<1x128x128xbf16>
    %71 = vector.shape_cast %70 : vector<1x128x128xbf16> to vector<128x128xbf16>
    %cst_48 = arith.constant dense<0.000000e+00> : vector<8x128xf32>
    %72 = tpu.matmul %69, %71, %cst_48 {dimension_numbers = #tpu.dot_dimension_numbers<[1], [0], [0], [1], [0, 0, 1, 1], [], []>} : vector<8x128xbf16>, vector<128x128xbf16>, vector<8x128xf32> -> vector<8x128xf32>
    %73 = arith.addf %68, %72 : vector<8x128xf32>
    %74 = vector.extract_strided_slice %62 {offsets = [16, 0], sizes = [8, 128], strides = [1, 1]} : vector<72x128xbf16> to vector<8x128xbf16>
    %c2_49 = arith.constant 2 : index
    %c0_50 = arith.constant 0 : index
    %c0_51 = arith.constant 0 : index
    %75 = vector.load %arg6[%c2_49, %c0_50, %c0_51] : memref<9x128x128xbf16, #tpu.memory_space<vmem>>, vector<1x128x128xbf16>
    %76 = vector.shape_cast %75 : vector<1x128x128xbf16> to vector<128x128xbf16>
    %cst_52 = arith.constant dense<0.000000e+00> : vector<8x128xf32>
    %77 = tpu.matmul %74, %76, %cst_52 {dimension_numbers = #tpu.dot_dimension_numbers<[1], [0], [0], [1], [0, 0, 1, 1], [], []>} : vector<8x128xbf16>, vector<128x128xbf16>, vector<8x128xf32> -> vector<8x128xf32>
    %78 = arith.addf %73, %77 : vector<8x128xf32>
    %79 = vector.extract_strided_slice %62 {offsets = [24, 0], sizes = [8, 128], strides = [1, 1]} : vector<72x128xbf16> to vector<8x128xbf16>
    %c3_53 = arith.constant 3 : index
    %c0_54 = arith.constant 0 : index
    %c0_55 = arith.constant 0 : index
    %80 = vector.load %arg6[%c3_53, %c0_54, %c0_55] : memref<9x128x128xbf16, #tpu.memory_space<vmem>>, vector<1x128x128xbf16>
    %81 = vector.shape_cast %80 : vector<1x128x128xbf16> to vector<128x128xbf16>
    %cst_56 = arith.constant dense<0.000000e+00> : vector<8x128xf32>
    %82 = tpu.matmul %79, %81, %cst_56 {dimension_numbers = #tpu.dot_dimension_numbers<[1], [0], [0], [1], [0, 0, 1, 1], [], []>} : vector<8x128xbf16>, vector<128x128xbf16>, vector<8x128xf32> -> vector<8x128xf32>
    %83 = arith.addf %78, %82 : vector<8x128xf32>
    %84 = vector.extract_strided_slice %62 {offsets = [32, 0], sizes = [8, 128], strides = [1, 1]} : vector<72x128xbf16> to vector<8x128xbf16>
    %c4_57 = arith.constant 4 : index
    %c0_58 = arith.constant 0 : index
    %c0_59 = arith.constant 0 : index
    %85 = vector.load %arg6[%c4_57, %c0_58, %c0_59] : memref<9x128x128xbf16, #tpu.memory_space<vmem>>, vector<1x128x128xbf16>
    %86 = vector.shape_cast %85 : vector<1x128x128xbf16> to vector<128x128xbf16>
    %cst_60 = arith.constant dense<0.000000e+00> : vector<8x128xf32>
    %87 = tpu.matmul %84, %86, %cst_60 {dimension_numbers = #tpu.dot_dimension_numbers<[1], [0], [0], [1], [0, 0, 1, 1], [], []>} : vector<8x128xbf16>, vector<128x128xbf16>, vector<8x128xf32> -> vector<8x128xf32>
    %88 = arith.addf %83, %87 : vector<8x128xf32>
    %89 = vector.extract_strided_slice %62 {offsets = [40, 0], sizes = [8, 128], strides = [1, 1]} : vector<72x128xbf16> to vector<8x128xbf16>
    %c5_61 = arith.constant 5 : index
    %c0_62 = arith.constant 0 : index
    %c0_63 = arith.constant 0 : index
    %90 = vector.load %arg6[%c5_61, %c0_62, %c0_63] : memref<9x128x128xbf16, #tpu.memory_space<vmem>>, vector<1x128x128xbf16>
    %91 = vector.shape_cast %90 : vector<1x128x128xbf16> to vector<128x128xbf16>
    %cst_64 = arith.constant dense<0.000000e+00> : vector<8x128xf32>
    %92 = tpu.matmul %89, %91, %cst_64 {dimension_numbers = #tpu.dot_dimension_numbers<[1], [0], [0], [1], [0, 0, 1, 1], [], []>} : vector<8x128xbf16>, vector<128x128xbf16>, vector<8x128xf32> -> vector<8x128xf32>
    %93 = arith.addf %88, %92 : vector<8x128xf32>
    %94 = vector.extract_strided_slice %62 {offsets = [48, 0], sizes = [8, 128], strides = [1, 1]} : vector<72x128xbf16> to vector<8x128xbf16>
    %c6_65 = arith.constant 6 : index
    %c0_66 = arith.constant 0 : index
    %c0_67 = arith.constant 0 : index
    %95 = vector.load %arg6[%c6_65, %c0_66, %c0_67] : memref<9x128x128xbf16, #tpu.memory_space<vmem>>, vector<1x128x128xbf16>
    %96 = vector.shape_cast %95 : vector<1x128x128xbf16> to vector<128x128xbf16>
    %cst_68 = arith.constant dense<0.000000e+00> : vector<8x128xf32>
    %97 = tpu.matmul %94, %96, %cst_68 {dimension_numbers = #tpu.dot_dimension_numbers<[1], [0], [0], [1], [0, 0, 1, 1], [], []>} : vector<8x128xbf16>, vector<128x128xbf16>, vector<8x128xf32> -> vector<8x128xf32>
    %98 = arith.addf %93, %97 : vector<8x128xf32>
    %99 = vector.extract_strided_slice %62 {offsets = [56, 0], sizes = [8, 128], strides = [1, 1]} : vector<72x128xbf16> to vector<8x128xbf16>
    %c7_69 = arith.constant 7 : index
    %c0_70 = arith.constant 0 : index
    %c0_71 = arith.constant 0 : index
    %100 = vector.load %arg6[%c7_69, %c0_70, %c0_71] : memref<9x128x128xbf16, #tpu.memory_space<vmem>>, vector<1x128x128xbf16>
    %101 = vector.shape_cast %100 : vector<1x128x128xbf16> to vector<128x128xbf16>
    %cst_72 = arith.constant dense<0.000000e+00> : vector<8x128xf32>
    %102 = tpu.matmul %99, %101, %cst_72 {dimension_numbers = #tpu.dot_dimension_numbers<[1], [0], [0], [1], [0, 0, 1, 1], [], []>} : vector<8x128xbf16>, vector<128x128xbf16>, vector<8x128xf32> -> vector<8x128xf32>
    %103 = arith.addf %98, %102 : vector<8x128xf32>
    %104 = vector.extract_strided_slice %62 {offsets = [64, 0], sizes = [8, 128], strides = [1, 1]} : vector<72x128xbf16> to vector<8x128xbf16>
    %c8_73 = arith.constant 8 : index
    %c0_74 = arith.constant 0 : index
    %c0_75 = arith.constant 0 : index
    %105 = vector.load %arg6[%c8_73, %c0_74, %c0_75] : memref<9x128x128xbf16, #tpu.memory_space<vmem>>, vector<1x128x128xbf16>
    %106 = vector.shape_cast %105 : vector<1x128x128xbf16> to vector<128x128xbf16>
    %cst_76 = arith.constant dense<0.000000e+00> : vector<8x128xf32>
    %107 = tpu.matmul %104, %106, %cst_76 {dimension_numbers = #tpu.dot_dimension_numbers<[1], [0], [0], [1], [0, 0, 1, 1], [], []>} : vector<8x128xbf16>, vector<128x128xbf16>, vector<8x128xf32> -> vector<8x128xf32>
    %108 = arith.addf %103, %107 : vector<8x128xf32>
    %c0_77 = arith.constant 0 : index
    %c0_78 = arith.constant 0 : index
    %109 = vector.load %arg7[%c0_77, %c0_78] : memref<1x128xf32, #tpu.memory_space<vmem>>, vector<1x128xf32>
    %110 = vector.broadcast %109 : vector<1x128xf32> to vector<8x128xf32>
    %111 = arith.addf %108, %110 : vector<8x128xf32>
    %cst_79 = arith.constant 0.000000e+00 : f32
    %112 = vector.broadcast %cst_79 : f32 to vector<8x128xf32>
    %113 = arith.cmpf oge, %111, %112 : vector<8x128xf32>
    %cst_80 = arith.constant 0.00999999977 : f32
    %114 = vector.broadcast %cst_80 : f32 to vector<8x128xf32>
    %115 = arith.mulf %111, %114 : vector<8x128xf32>
    %116 = arith.select %113, %111, %115 : vector<8x128xi1>, vector<8x128xf32>
    %117 = arith.truncf %116 : vector<8x128xf32> to vector<8x128xbf16>
    %c0_81 = arith.constant 0 : index
    %c0_82 = arith.constant 0 : index
    %118 = vector.load %arg8[%c0_81, %c0_82] : memref<72x8xbf16, #tpu.memory_space<vmem>>, vector<72x8xbf16>
    %cst_83 = arith.constant dense<0.000000e+00> : vector<72x128xf32>
    %119 = tpu.matmul %118, %117, %cst_83 {dimension_numbers = #tpu.dot_dimension_numbers<[1], [0], [0], [1], [0, 0, 1, 1], [], []>} : vector<72x8xbf16>, vector<8x128xbf16>, vector<72x128xf32> -> vector<72x128xf32>
    %120 = arith.truncf %119 : vector<72x128xf32> to vector<72x128xbf16>
    %cst_84 = arith.constant 0.000000e+00 : f32
    %121 = vector.broadcast %cst_84 : f32 to vector<8x128xf32>
    %122 = vector.extract_strided_slice %120 {offsets = [0, 0], sizes = [8, 128], strides = [1, 1]} : vector<72x128xbf16> to vector<8x128xbf16>
    %c0_85 = arith.constant 0 : index
    %c0_86 = arith.constant 0 : index
    %c0_87 = arith.constant 0 : index
    %123 = vector.load %arg9[%c0_85, %c0_86, %c0_87] : memref<9x128x128xbf16, #tpu.memory_space<vmem>>, vector<1x128x128xbf16>
    %124 = vector.shape_cast %123 : vector<1x128x128xbf16> to vector<128x128xbf16>
    %cst_88 = arith.constant dense<0.000000e+00> : vector<8x128xf32>
    %125 = tpu.matmul %122, %124, %cst_88 {dimension_numbers = #tpu.dot_dimension_numbers<[1], [0], [0], [1], [0, 0, 1, 1], [], []>} : vector<8x128xbf16>, vector<128x128xbf16>, vector<8x128xf32> -> vector<8x128xf32>
    %126 = arith.addf %121, %125 : vector<8x128xf32>
    %127 = vector.extract_strided_slice %120 {offsets = [8, 0], sizes = [8, 128], strides = [1, 1]} : vector<72x128xbf16> to vector<8x128xbf16>
    %c1_89 = arith.constant 1 : index
    %c0_90 = arith.constant 0 : index
    %c0_91 = arith.constant 0 : index
    %128 = vector.load %arg9[%c1_89, %c0_90, %c0_91] : memref<9x128x128xbf16, #tpu.memory_space<vmem>>, vector<1x128x128xbf16>
    %129 = vector.shape_cast %128 : vector<1x128x128xbf16> to vector<128x128xbf16>
    %cst_92 = arith.constant dense<0.000000e+00> : vector<8x128xf32>
    %130 = tpu.matmul %127, %129, %cst_92 {dimension_numbers = #tpu.dot_dimension_numbers<[1], [0], [0], [1], [0, 0, 1, 1], [], []>} : vector<8x128xbf16>, vector<128x128xbf16>, vector<8x128xf32> -> vector<8x128xf32>
    %131 = arith.addf %126, %130 : vector<8x128xf32>
    %132 = vector.extract_strided_slice %120 {offsets = [16, 0], sizes = [8, 128], strides = [1, 1]} : vector<72x128xbf16> to vector<8x128xbf16>
    %c2_93 = arith.constant 2 : index
    %c0_94 = arith.constant 0 : index
    %c0_95 = arith.constant 0 : index
    %133 = vector.load %arg9[%c2_93, %c0_94, %c0_95] : memref<9x128x128xbf16, #tpu.memory_space<vmem>>, vector<1x128x128xbf16>
    %134 = vector.shape_cast %133 : vector<1x128x128xbf16> to vector<128x128xbf16>
    %cst_96 = arith.constant dense<0.000000e+00> : vector<8x128xf32>
    %135 = tpu.matmul %132, %134, %cst_96 {dimension_numbers = #tpu.dot_dimension_numbers<[1], [0], [0], [1], [0, 0, 1, 1], [], []>} : vector<8x128xbf16>, vector<128x128xbf16>, vector<8x128xf32> -> vector<8x128xf32>
    %136 = arith.addf %131, %135 : vector<8x128xf32>
    %137 = vector.extract_strided_slice %120 {offsets = [24, 0], sizes = [8, 128], strides = [1, 1]} : vector<72x128xbf16> to vector<8x128xbf16>
    %c3_97 = arith.constant 3 : index
    %c0_98 = arith.constant 0 : index
    %c0_99 = arith.constant 0 : index
    %138 = vector.load %arg9[%c3_97, %c0_98, %c0_99] : memref<9x128x128xbf16, #tpu.memory_space<vmem>>, vector<1x128x128xbf16>
    %139 = vector.shape_cast %138 : vector<1x128x128xbf16> to vector<128x128xbf16>
    %cst_100 = arith.constant dense<0.000000e+00> : vector<8x128xf32>
    %140 = tpu.matmul %137, %139, %cst_100 {dimension_numbers = #tpu.dot_dimension_numbers<[1], [0], [0], [1], [0, 0, 1, 1], [], []>} : vector<8x128xbf16>, vector<128x128xbf16>, vector<8x128xf32> -> vector<8x128xf32>
    %141 = arith.addf %136, %140 : vector<8x128xf32>
    %142 = vector.extract_strided_slice %120 {offsets = [32, 0], sizes = [8, 128], strides = [1, 1]} : vector<72x128xbf16> to vector<8x128xbf16>
    %c4_101 = arith.constant 4 : index
    %c0_102 = arith.constant 0 : index
    %c0_103 = arith.constant 0 : index
    %143 = vector.load %arg9[%c4_101, %c0_102, %c0_103] : memref<9x128x128xbf16, #tpu.memory_space<vmem>>, vector<1x128x128xbf16>
    %144 = vector.shape_cast %143 : vector<1x128x128xbf16> to vector<128x128xbf16>
    %cst_104 = arith.constant dense<0.000000e+00> : vector<8x128xf32>
    %145 = tpu.matmul %142, %144, %cst_104 {dimension_numbers = #tpu.dot_dimension_numbers<[1], [0], [0], [1], [0, 0, 1, 1], [], []>} : vector<8x128xbf16>, vector<128x128xbf16>, vector<8x128xf32> -> vector<8x128xf32>
    %146 = arith.addf %141, %145 : vector<8x128xf32>
    %147 = vector.extract_strided_slice %120 {offsets = [40, 0], sizes = [8, 128], strides = [1, 1]} : vector<72x128xbf16> to vector<8x128xbf16>
    %c5_105 = arith.constant 5 : index
    %c0_106 = arith.constant 0 : index
    %c0_107 = arith.constant 0 : index
    %148 = vector.load %arg9[%c5_105, %c0_106, %c0_107] : memref<9x128x128xbf16, #tpu.memory_space<vmem>>, vector<1x128x128xbf16>
    %149 = vector.shape_cast %148 : vector<1x128x128xbf16> to vector<128x128xbf16>
    %cst_108 = arith.constant dense<0.000000e+00> : vector<8x128xf32>
    %150 = tpu.matmul %147, %149, %cst_108 {dimension_numbers = #tpu.dot_dimension_numbers<[1], [0], [0], [1], [0, 0, 1, 1], [], []>} : vector<8x128xbf16>, vector<128x128xbf16>, vector<8x128xf32> -> vector<8x128xf32>
    %151 = arith.addf %146, %150 : vector<8x128xf32>
    %152 = vector.extract_strided_slice %120 {offsets = [48, 0], sizes = [8, 128], strides = [1, 1]} : vector<72x128xbf16> to vector<8x128xbf16>
    %c6_109 = arith.constant 6 : index
    %c0_110 = arith.constant 0 : index
    %c0_111 = arith.constant 0 : index
    %153 = vector.load %arg9[%c6_109, %c0_110, %c0_111] : memref<9x128x128xbf16, #tpu.memory_space<vmem>>, vector<1x128x128xbf16>
    %154 = vector.shape_cast %153 : vector<1x128x128xbf16> to vector<128x128xbf16>
    %cst_112 = arith.constant dense<0.000000e+00> : vector<8x128xf32>
    %155 = tpu.matmul %152, %154, %cst_112 {dimension_numbers = #tpu.dot_dimension_numbers<[1], [0], [0], [1], [0, 0, 1, 1], [], []>} : vector<8x128xbf16>, vector<128x128xbf16>, vector<8x128xf32> -> vector<8x128xf32>
    %156 = arith.addf %151, %155 : vector<8x128xf32>
    %157 = vector.extract_strided_slice %120 {offsets = [56, 0], sizes = [8, 128], strides = [1, 1]} : vector<72x128xbf16> to vector<8x128xbf16>
    %c7_113 = arith.constant 7 : index
    %c0_114 = arith.constant 0 : index
    %c0_115 = arith.constant 0 : index
    %158 = vector.load %arg9[%c7_113, %c0_114, %c0_115] : memref<9x128x128xbf16, #tpu.memory_space<vmem>>, vector<1x128x128xbf16>
    %159 = vector.shape_cast %158 : vector<1x128x128xbf16> to vector<128x128xbf16>
    %cst_116 = arith.constant dense<0.000000e+00> : vector<8x128xf32>
    %160 = tpu.matmul %157, %159, %cst_116 {dimension_numbers = #tpu.dot_dimension_numbers<[1], [0], [0], [1], [0, 0, 1, 1], [], []>} : vector<8x128xbf16>, vector<128x128xbf16>, vector<8x128xf32> -> vector<8x128xf32>
    %161 = arith.addf %156, %160 : vector<8x128xf32>
    %162 = vector.extract_strided_slice %120 {offsets = [64, 0], sizes = [8, 128], strides = [1, 1]} : vector<72x128xbf16> to vector<8x128xbf16>
    %c8_117 = arith.constant 8 : index
    %c0_118 = arith.constant 0 : index
    %c0_119 = arith.constant 0 : index
    %163 = vector.load %arg9[%c8_117, %c0_118, %c0_119] : memref<9x128x128xbf16, #tpu.memory_space<vmem>>, vector<1x128x128xbf16>
    %164 = vector.shape_cast %163 : vector<1x128x128xbf16> to vector<128x128xbf16>
    %cst_120 = arith.constant dense<0.000000e+00> : vector<8x128xf32>
    %165 = tpu.matmul %162, %164, %cst_120 {dimension_numbers = #tpu.dot_dimension_numbers<[1], [0], [0], [1], [0, 0, 1, 1], [], []>} : vector<8x128xbf16>, vector<128x128xbf16>, vector<8x128xf32> -> vector<8x128xf32>
    %166 = arith.addf %161, %165 : vector<8x128xf32>
    %c0_121 = arith.constant 0 : index
    %c0_122 = arith.constant 0 : index
    %167 = vector.load %arg10[%c0_121, %c0_122] : memref<1x128xf32, #tpu.memory_space<vmem>>, vector<1x128xf32>
    %168 = vector.broadcast %167 : vector<1x128xf32> to vector<8x128xf32>
    %169 = arith.addf %166, %168 : vector<8x128xf32>
    %cst_123 = arith.constant 0.000000e+00 : f32
    %170 = vector.broadcast %cst_123 : f32 to vector<8x128xf32>
    %171 = arith.cmpf oge, %169, %170 : vector<8x128xf32>
    %cst_124 = arith.constant 0.00999999977 : f32
    %172 = vector.broadcast %cst_124 : f32 to vector<8x128xf32>
    %173 = arith.mulf %169, %172 : vector<8x128xf32>
    %174 = arith.select %171, %169, %173 : vector<8x128xi1>, vector<8x128xf32>
    %175 = arith.truncf %174 : vector<8x128xf32> to vector<8x128xbf16>
    %176 = vector.extract_strided_slice %175 {offsets = [0, 0], sizes = [1, 128], strides = [1, 1]} : vector<8x128xbf16> to vector<1x128xbf16>
    %c0_125 = arith.constant 0 : index
    %c0_126 = arith.constant 0 : index
    %177 = vector.load %arg11[%c0_125, %c0_126] : memref<128x128xbf16, #tpu.memory_space<vmem>>, vector<128x128xbf16>
    %cst_127 = arith.constant dense<0.000000e+00> : vector<1x128xf32>
    %178 = tpu.matmul %176, %177, %cst_127 {dimension_numbers = #tpu.dot_dimension_numbers<[1], [0], [0], [1], [0, 0, 1, 1], [], []>} : vector<1x128xbf16>, vector<128x128xbf16>, vector<1x128xf32> -> vector<1x128xf32>
    %c0_128 = arith.constant 0 : index
    %c0_129 = arith.constant 0 : index
    %179 = vector.load %arg12[%c0_128, %c0_129] : memref<1x128xf32, #tpu.memory_space<vmem>>, vector<1x128xf32>
    %180 = arith.addf %178, %179 : vector<1x128xf32>
    %c0_130 = arith.constant 0 : index
    %c0_131 = arith.constant 0 : index
    %c0_132 = arith.constant 0 : index
    %181 = vector.load %arg13[%c0_130, %c0_131, %c0_132] : memref<1x1x128xf32, #tpu.memory_space<vmem>>, vector<1x1x128xf32>
    %182 = vector.shape_cast %181 : vector<1x1x128xf32> to vector<1x128xf32>
    %183 = vector.shape_cast %180 : vector<1x128xf32> to vector<1x1x128xf32>
    tpu.vector_store %arg13[%c0_130, %c0_131, %c0_132], %183 {strides = array<i32>} : memref<1x1x128xf32, #tpu.memory_space<vmem>>, vector<1x1x128xf32>,
    return
  }
  func.func @transform_0(%arg0: i32) -> (i32, i32, i32) {
    %c0_i32 = arith.constant 0 : i32
    %c0_i32_0 = arith.constant 0 : i32
    %c0_i32_1 = arith.constant 0 : i32
    return %arg0, %c0_i32, %c0_i32_0 : i32, i32, i32
  }
  func.func @transform_1(%arg0: i32) -> (i32, i32) {
    %c0_i32 = arith.constant 0 : i32
    %c0_i32_0 = arith.constant 0 : i32
    %c0_i32_1 = arith.constant 0 : i32
    return %c0_i32, %c0_i32_0 : i32, i32
  }
  func.func @transform_2(%arg0: i32) -> (i32, i32, i32) {
    %c0_i32 = arith.constant 0 : i32
    %c0_i32_0 = arith.constant 0 : i32
    %c0_i32_1 = arith.constant 0 : i32
    %c0_i32_2 = arith.constant 0 : i32
    return %c0_i32, %c0_i32_0, %c0_i32_1 : i32, i32, i32
  }
  func.func @transform_3(%arg0: i32) -> (i32, i32) {
    %c0_i32 = arith.constant 0 : i32
    %c0_i32_0 = arith.constant 0 : i32
    %c0_i32_1 = arith.constant 0 : i32
    return %c0_i32, %c0_i32_0 : i32, i32
  }
  func.func @transform_4(%arg0: i32) -> (i32, i32) {
    %c0_i32 = arith.constant 0 : i32
    %c0_i32_0 = arith.constant 0 : i32
    %c0_i32_1 = arith.constant 0 : i32
    return %c0_i32, %c0_i32_0 : i32, i32
  }
  func.func @transform_5(%arg0: i32) -> (i32, i32, i32) {
    %c0_i32 = arith.constant 0 : i32
    %c0_i32_0 = arith.constant 0 : i32
    %c0_i32_1 = arith.constant 0 : i32
    %c0_i32_2 = arith.constant 0 : i32
    return %c0_i32, %c0_i32_0, %c0_i32_1 : i32, i32, i32
  }
  func.func @transform_6(%arg0: i32) -> (i32, i32) {
    %c0_i32 = arith.constant 0 : i32
    %c0_i32_0 = arith.constant 0 : i32
    %c0_i32_1 = arith.constant 0 : i32
    return %c0_i32, %c0_i32_0 : i32, i32
  }
  func.func @transform_7(%arg0: i32) -> (i32, i32) {
    %c0_i32 = arith.constant 0 : i32
    %c0_i32_0 = arith.constant 0 : i32
    %c0_i32_1 = arith.constant 0 : i32
    return %c0_i32, %c0_i32_0 : i32, i32
  }
  func.func @transform_8(%arg0: i32) -> (i32, i32, i32) {
    %c0_i32 = arith.constant 0 : i32
    %c0_i32_0 = arith.constant 0 : i32
    %c0_i32_1 = arith.constant 0 : i32
    %c0_i32_2 = arith.constant 0 : i32
    return %c0_i32, %c0_i32_0, %c0_i32_1 : i32, i32, i32
  }
  func.func @transform_9(%arg0: i32) -> (i32, i32) {
    %c0_i32 = arith.constant 0 : i32
    %c0_i32_0 = arith.constant 0 : i32
    %c0_i32_1 = arith.constant 0 : i32
    return %c0_i32, %c0_i32_0 : i32, i32
  }
  func.func @transform_10(%arg0: i32) -> (i32, i32) {
    %c0_i32 = arith.constant 0 : i32
    %c0_i32_0 = arith.constant 0 : i32
    %c0_i32_1 = arith.constant 0 : i32
    return %c0_i32, %c0_i32_0 : i32, i32
  }
  func.func @transform_11(%arg0: i32) -> (i32, i32) {
    %c0_i32 = arith.constant 0 : i32
    %c0_i32_0 = arith.constant 0 : i32
    %c0_i32_1 = arith.constant 0 : i32
    return %c0_i32, %c0_i32_0 : i32, i32
  }
  func.func @transform_12(%arg0: i32) -> (i32, i32, i32) {
    %c0_i32 = arith.constant 0 : i32
    %c0_i32_0 = arith.constant 0 : i32
    %c0_i32_1 = arith.constant 0 : i32
    return %arg0, %c0_i32, %c0_i32_0 : i32, i32, i32
  }
}

</mosaic_0001>

<bundles_post_ra>
// kernel: gradual_style_block_forward.2
= control target key start
LH: loop header
LB: loop body
LE: loop exit
PB: predicated region body
PF: predicated region fallthrough
CT: control target
= control target key end

     0   :  { %s2394_s15 = smov 0   ;;  %s2396_s16 = smov 0   ;;  %s2749_s0 = inlined_call_operand.vmem [shape: bf16[2,72,384], index: 0, kind: input, shape index: {}]   ;;  %s2750_s1 = inlined_call_operand.vmem [shape: bf16[2,72,384], index: 1, kind: input, shape index: {}]   ;;  %s2751_s2 = inlined_call_operand.vmem [shape: bf16[3,384,128], index: 2, kind: input, shape index: {}]   ;;  %s2752_s3 = inlined_call_operand.vmem [shape: f32[1,128], index: 3, kind: input, shape index: {}]   ;;  %s2753_s4 = inlined_call_operand.vmem [shape: bf16[2,64,128], index: 4, kind: output, shape index: {}]  }
   0x1   :  { %s2398_s17 = smov 0  }
   0x2 LB: > { %s26_s18 = sadd.s32 1, %s2363_s16  ;;  %p1688_p0 = scmp.ge.s32.totalorder %s2367_s17, 1  ;;  %s2367_s17 = sphi %s2398_s17, %s14_s17   ;;  %s2363_s16 = sphi %s2396_s16, %s2755_s16   ;;  %s2359_s15 = sphi %s2394_s15, %s2754_s15  }
   0x3   : > { %p28_p1 = scmp.ge.s32.totalorder %s26_s18, 2  ;;  %p203_p2 = scmp.lt.s32.totalorder %s2367_s17, 3 }
   0x5   : > { %s2757_s18 = smov (%p28_p1, %s26_s18), 0  ;;  %p204_p3 = pnand %p1688_p0, %p203_p2 }
   0x6   : > { %v2233_v0 = vld [vmem:[%s2751_s2 + $0x100] sm:$0xff] (!%p204_p3)   ;;  %v2236_v3 = vld [vmem:[%s2751_s2 + $0x108] sm:$0xff] (!%p204_p3)   ;;  %v2239_v6 = vld [vmem:[%s2751_s2 + $0x110] sm:$0xff] (!%p204_p3)   ;;  %p244_p4 = scmp.lt.s32.totalorder (!%p204_p3), %s2359_s15, 1 }
   0x7   : > { %207 = sbr.rel (%p204_p3) target bundleno = 357 (0x165), region = 36  ;;  %v2234_v1 = vld [vmem:[%s2751_s2 + $0x140] sm:$0xff] (!%p204_p3)   ;;  %1940 = vmatprep.subr.bf16.mxu0 (!%p204_p3), %v2233_v0  ;;  %v2237_v4 = vld [vmem:[%s2751_s2 + $0x148] sm:$0xff] (!%p204_p3)   ;;  %v2240_v7 = vld [vmem:[%s2751_s2 + $0x150] sm:$0xff] (!%p204_p3)  }
   0x8   : > { %v2235_v2 = vld [vmem:[%s2751_s2 + $0xc0] sm:$0xff] (!%p204_p3)   ;;  %2096 = vmatprep.subr.bf16.mxu1 (!%p204_p3), %v2234_v1  ;;  %v2238_v5 = vld [vmem:[%s2751_s2 + $0xc8] sm:$0xff] (!%p204_p3)   ;;  %v2241_v8 = vld [vmem:[%s2751_s2 + $0xd0] sm:$0xff] (!%p204_p3)  }
   0x9   : > { %1941 = vmatpush3.bf16.msra.mxu0 (!%p204_p3), %v2235_v2  ;;  %2097 = vmatpush3.bf16.msra.mxu1 (!%p204_p3), %v2234_v1  ;;  %v2242_v9 = vld [vmem:[%s2751_s2 + $0x118] sm:$0xff] (!%p204_p3)   ;;  %v2245_v12 = vld [vmem:[%s2751_s2 + $0x120] sm:$0xff] (!%p204_p3)   ;;  %v2248_v15 = vld [vmem:[%s2751_s2 + $0x128] sm:$0xff] (!%p204_p3)  }
   0xa   : > { %1942 = vmatprep.subr.bf16.mxu0 (!%p204_p3), %v2236_v3  ;;  %2098 = vmatprep.subr.bf16.mxu1 (!%p204_p3), %v2237_v4  ;;  %v2243_v10 = vld [vmem:[%s2751_s2 + $0x158] sm:$0xff] (!%p204_p3)   ;;  %v2246_v13 = vld [vmem:[%s2751_s2 + $0x160] sm:$0xff] (!%p204_p3)   ;;  %v2249_v16 = vld [vmem:[%s2751_s2 + $0x168] sm:$0xff] (!%p204_p3)  }
   0xb   : > { %v2244_v11 = vld [vmem:[%s2751_s2 + $0xd8] sm:$0xff] (!%p204_p3)   ;;  %v2247_v14 = vld [vmem:[%s2751_s2 + $0xe0] sm:$0xff] (!%p204_p3)   ;;  %v2250_v17 = vld [vmem:[%s2751_s2 + $0xe8] sm:$0xff] (!%p204_p3)  }
   0xc   : > { %v2251_v18 = vld [vmem:[%s2751_s2 + $0x130] sm:$0xff] (!%p204_p3)   ;;  %v2254_v21 = vld [vmem:[%s2751_s2 + $0x138] sm:$0xff] (!%p204_p3)   ;;  %v2261_v26 = vld [vmem:[%s2751_s2 + $0x40] sm:$0xff] (!%p204_p3)  }
   0xd   : > { %1943 = vmatpush3.bf16.msra.mxu0 (!%p204_p3), %v2238_v5  ;;  %2099 = vmatpush3.bf16.msra.mxu1 (!%p204_p3), %v2237_v4  ;;  %v2252_v19 = vld [vmem:[%s2751_s2 + $0x170] sm:$0xff] (!%p204_p3)   ;;  %v2255_v22 = vld [vmem:[%s2751_s2 + $0x178] sm:$0xff] (!%p204_p3)   ;;  %v2262_v28 = vld [vmem:[%s2751_s2 + $0x80] sm:$0xff] (!%p204_p3)  }
   0xe   : > { %1944 = vmatprep.subr.bf16.mxu0 %v2239_v6  ;;  %2100 = vmatprep.subr.bf16.mxu1 %v2240_v7  ;;  %s2759_s15 = smov (!%p244_p4, %s2359_s15), 1  ;;  %v2253_v20 = vld [vmem:[%s2751_s2 + $0xf0] sm:$0xff]   ;;  %v2256_v25 = vld [vmem:[%s2751_s2 + $0xf8] sm:$0xff]   ;;  %v2264_v30 = vld [vmem:[%s2751_s2] sm:$0xff]  }
   0xf   : > { %s2208_s5 = smul.u32 108, %s2759_s15  ;;  %v2265_v31 = vld [vmem:[%s2751_s2 + $0x48] sm:$0xff]   ;;  %v2271_v35 = vld [vmem:[%s2751_s2 + $0x50] sm:$0xff]   ;;  %v2274_v39 = vld [vmem:[%s2751_s2 + $0x58] sm:$0xff]   ;;  %s1908_s23 = sshll.u32 %s2759_s15, 5 }
  0x10   : > { %v2266_v32 = vld [vmem:[%s2751_s2 + $0x88] sm:$0xff]   ;;  %v2272_v36 = vld [vmem:[%s2751_s2 + $0x90] sm:$0xff]   ;;  %v2275_v40 = vld [vmem:[%s2751_s2 + $0x98] sm:$0xff]   ;;  %s2725_s26 = scalar_lea.vmem %s2753_s4, %s1908_s23 }
  0x11   : > { %1945 = vmatpush3.bf16.msra.mxu0 %v2241_v8  ;;  %2101 = vmatpush3.bf16.msra.mxu1 %v2240_v7  ;;  %s2487_s20 = scalar_lea.vmem %s2750_s1, %s2208_s5  ;;  %v2267_v34 = vld [vmem:[%s2751_s2 + $0x8] sm:$0xff]   ;;  %v2273_v38 = vld [vmem:[%s2751_s2 + $0x10] sm:$0xff]   ;;  %v2276_v42 = vld [vmem:[%s2751_s2 + $0x18] sm:$0xff]   ;;  %s2574_s29 = scalar_lea.vmem %s2749_s0, %s2208_s5 }
  0x12   : > { %1946 = vmatprep.subr.bf16.mxu0 %v2242_v9  ;;  %2102 = vmatprep.subr.bf16.mxu1 %v2243_v10  ;;  %v2259_v23 = vld [vmem:[%s2487_s20 + $0x4] ss:$12 sps:$4 sm:$0xff]   ;;  %v2260_v24 = vld [vmem:[%s2487_s20 + $0x8] ss:$12 sps:$4 sm:$0xff]   ;;  %v2257_v27 = vld [vmem:[%s2487_s20] ss:$12 sps:$4 sm:$0xff]  }
  0x13   : > { %640 = vmatprep.mubr.bf16.mxu0 %v2259_v23  ;;  %2112 = vmatprep.mubr.bf16.mxu1 %v2260_v24  ;;  %v2263_v29 = vld [vmem:[%s2487_s20 + $0x20] ss:$12 sps:$4 sm:$0xff]   ;;  %v2268_v33 = vld [vmem:[%s2487_s20 + $0x1c] ss:$12 sps:$4 sm:$0xff]   ;;  %v2270_v37 = vld [vmem:[%s2487_s20 + $0x18] ss:$12 sps:$4 sm:$0xff]  }
  0x14   : > { %v2277_v41 = vld [vmem:[%s2487_s20 + $0x34] ss:$12 sps:$4 sm:$0xff]   ;;  %v2279_v44 = vld [vmem:[%s2487_s20 + $0x30] ss:$12 sps:$4 sm:$0xff]   ;;  %v2283_v47 = vld [vmem:[%s2751_s2 + $0x68] sm:$0xff]  }
  0x15   : > { %1947 = vmatpush3.bf16.msra.mxu0 %v2244_v11  ;;  %2103 = vmatpush3.bf16.msra.mxu1 %v2243_v10  ;;  %v2280_v43 = vld [vmem:[%s2751_s2 + $0x60] sm:$0xff]   ;;  %v2284_v48 = vld [vmem:[%s2751_s2 + $0xa8] sm:$0xff]   ;;  %v2290_v52 = vld [vmem:[%s2751_s2 + $0x70] sm:$0xff]  }
  0x16   : > { %1948 = vmatprep.subr.bf16.mxu0 %v2245_v12  ;;  %2104 = vmatprep.subr.bf16.mxu1 %v2246_v13  ;;  %v2281_v45 = vld [vmem:[%s2751_s2 + $0xa0] sm:$0xff]   ;;  %v2286_v49 = vld [vmem:[%s2487_s20 + $0x4c] ss:$12 sps:$4 sm:$0xff]   ;;  %v2291_v53 = vld [vmem:[%s2751_s2 + $0xb0] sm:$0xff]  }
  0x17   : > { %v2282_v46 = vld [vmem:[%s2751_s2 + $0x20] sm:$0xff]   ;;  %v2285_v50 = vld [vmem:[%s2751_s2 + $0x28] sm:$0xff]   ;;  %v2292_v54 = vld [vmem:[%s2487_s20 + $0x50] ss:$12 sps:$4 sm:$0xff]  }
  0x18   : > { %v2289_v51 = vld [vmem:[%s2487_s20 + $0x38] ss:$12 sps:$4 sm:$0xff]   ;;  %v2288_v55 = vld [vmem:[%s2487_s20 + $0x48] ss:$12 sps:$4 sm:$0xff]   ;;  %v2588_v60 = vld [vmem:[%s2574_s29 + $0xc] sm:$0xff] }
  0x19   : > { %1949 = vmatpush3.bf16.msra.mxu0 %v2247_v14  ;;  %2105 = vmatpush3.bf16.msra.mxu1 %v2246_v13  ;;  %v2293_v56 = vld [vmem:[%s2751_s2 + $0x30] sm:$0xff]   ;;  %v2294_v57 = vld [vmem:[%s2751_s2 + $0x78] sm:$0xff]   ;;  %v271_v59 = vld [vmem:[%s2574_s29] sm:$0xff] }
  0x1a   : > { %1950 = vmatprep.subr.bf16.mxu0 %v2248_v15  ;;  %2106 = vmatprep.subr.bf16.mxu1 %v2249_v16  ;;  %v2295_v58 = vld [vmem:[%s2751_s2 + $0xb8] sm:$0xff]   ;;  %v1778_v61 = vcombine.high %v271_v59, %v2588_v60  ;;  %v2299_v62 = vld [vmem:[%s2574_s29 + $0x8] ss:$12 sps:$4 sm:$0xff]   ;;  %v2300_v0 = vld [vmem:[%s2751_s2 + $0x1c0] sm:$0xff]   ;;  %v1777_v3 = vcombine.low %v271_v59, %v2588_v60 }
  0x1b   : > { %v2296_v63 = vld [vmem:[%s2751_s2 + $0x38] sm:$0xff]   ;;  %v2301_v1 = vld [vmem:[%s2751_s2 + $0x200] sm:$0xff]   ;;  %v2304_v5 = vld [vmem:[%s2751_s2 + $0x1c8] sm:$0xff]  }
  0x1c   : > { %v2302_v2 = vld [vmem:[%s2574_s29 + $0x20] ss:$12 sps:$4 sm:$0xff]   ;;  %v2613_v7 = vld [vmem:[%s2574_s29 + $0x18] sm:$0xff]  ;;  %v2616_v8 = vld [vmem:[%s2574_s29 + $0x24] sm:$0xff] }
  0x1d   : > { %1951 = vmatpush3.bf16.msra.mxu0 %v2250_v17  ;;  %2107 = vmatpush3.bf16.msra.mxu1 %v2249_v16  ;;  %v2303_v4 = vld [vmem:[%s2751_s2 + $0x180] sm:$0xff]   ;;  %v2305_v6 = vld [vmem:[%s2751_s2 + $0x208] sm:$0xff]   ;;  %v1781_v10 = vcombine.high %v2613_v7, %v2616_v8  ;;  %v2309_v11 = vld [vmem:[%s2751_s2 + $0x1d0] sm:$0xff]   ;;  %v1780_v14 = vcombine.low %v2613_v7, %v2616_v8 }
  0x1e   : > { %1952 = vmatprep.subr.bf16.mxu0 %v2251_v18  ;;  %2108 = vmatprep.subr.bf16.mxu1 %v2252_v19  ;;  %v2306_v9 = vld [vmem:[%s2751_s2 + $0x188] sm:$0xff]   ;;  %v2310_v12 = vld [vmem:[%s2751_s2 + $0x210] sm:$0xff]   ;;  %v2312_v15 = vld [vmem:[%s2751_s2 + $0x1d8] sm:$0xff]  }
  0x1f   : > { %v2311_v13 = vld [vmem:[%s2751_s2 + $0x190] sm:$0xff]   ;;  %v2313_v16 = vld [vmem:[%s2751_s2 + $0x218] sm:$0xff]   ;;  %v2319_v23 = vld [vmem:[%s2751_s2 + $0x1a0] sm:$0xff]  }
  0x20   : > { %v2641_v17 = vld [vmem:[%s2574_s29 + $0x30] sm:$0xff]  ;;  %v2644_v18 = vld [vmem:[%s2574_s29 + $0x3c] sm:$0xff] }
  0x21   : > { %1953 = vmatpush3.bf16.msra.mxu0 %v2253_v20  ;;  %2109 = vmatpush3.bf16.msra.mxu1 %v2252_v19  ;;  %v1784_v19 = vcombine.high %v2641_v17, %v2644_v18  ;;  %v2314_v20 = vld [vmem:[%s2751_s2 + $0x198] sm:$0xff]   ;;  %v1783_v24 = vcombine.low %v2641_v17, %v2644_v18 }
  0x22   : > { %1954 = vmatprep.subr.bf16.mxu0 %v2254_v21  ;;  %2110 = vmatprep.subr.bf16.mxu1 %v2255_v22  ;;  %v2317_v21 = vld [vmem:[%s2751_s2 + $0x1e0] sm:$0xff]  }
  0x25   : > { %1955 = vmatpush3.bf16.msra.mxu0 %v2256_v25  ;;  %2111 = vmatpush3.bf16.msra.mxu1 %v2255_v22  ;;  %v2318_v22 = vld [vmem:[%s2751_s2 + $0x220] sm:$0xff]   ;;  %v2320_v25 = vld [vmem:[%s2751_s2 + $0x1e8] sm:$0xff]  }
  0x26   : > { %1992 = vmatprep.subr.bf16.mxu0 %v2261_v26  ;;  %2120 = vmatprep.subr.bf16.mxu1 %v2262_v28  ;;  %v2321_v26 = vld [vmem:[%s2751_s2 + $0x228] sm:$0xff]  }
  0x28   : > { %641 = vmatmul.mubr.bf16.vlgmr.msra.gmra.mrb[0].mxu0 %v2257_v27  ;;  %2113 = vmatmul.mubr.bf16.vlgmr.msra.gmra.mrb[0].mxu1 %v2263_v29  ;;  %v283_v27 = vld [vmem:[%s2574_s29 + $0x48] sm:$0xff]  ;;  %v2324_v29 = vld [vmem:[%s2574_s29 + $0x38] ss:$12 sps:$4 sm:$0xff]  }
  0x29   : > { %1993 = vmatpush3.bf16.msra.mxu0 %v2264_v30  ;;  %2121 = vmatpush3.bf16.msra.mxu1 %v2262_v28  ;;  %v285_v28 = vld [vmem:[%s2574_s29 + $0x54] sm:$0xff]  ;;  %v2326_v30 = vld [vmem:[%s2574_s29 + $0x50] ss:$12 sps:$4 sm:$0xff]  }
  0x2a   : > { %1994 = vmatprep.subr.bf16.mxu0 %v2265_v31  ;;  %2122 = vmatprep.subr.bf16.mxu1 %v2266_v32  ;;  %v1787_v31 = vcombine.high %v283_v27, %v285_v28 }
  0x2b   : > { %648 = vmatprep.mubr.bf16.mxu0 %v2268_v33  ;;  %2116 = vmatprep.mubr.bf16.mxu1 %v2289_v51  ;;  %v2327_v33 = vld [vmem:[%s2751_s2 + $0x1f0] sm:$0xff]  }
  0x2d   : > { %1995 = vmatpush3.bf16.msra.mxu0 %v2267_v34  ;;  %2123 = vmatpush3.bf16.msra.mxu1 %v2266_v32  ;;  %v2322_v32 = vld [vmem:[%s2751_s2 + $0x1a8] sm:$0xff]   ;;  %v2328_v34 = vld [vmem:[%s2751_s2 + $0x230] sm:$0xff]  }
  0x2e   : > { %1996 = vmatprep.subr.bf16.mxu0 %v2271_v35  ;;  %2124 = vmatprep.subr.bf16.mxu1 %v2272_v36  ;;  %v2329_v35 = vld [vmem:[%s2751_s2 + $0x1b0] sm:$0xff]  }
  0x30   : > { %649 = vmatmul.mubr.bf16.gmra.mrb[4].mxu0 %v2270_v37  ;;  %2117 = vmatmul.mubr.bf16.gmra.mrb[4].mxu1 %v2292_v54  ;;  %v2330_v37 = vld [vmem:[%s2751_s2 + $0x1f8] sm:$0xff]  }
  0x31   : > { %1997 = vmatpush3.bf16.msra.mxu0 %v2273_v38  ;;  %2125 = vmatpush3.bf16.msra.mxu1 %v2272_v36  ;;  %v1786_v36 = vcombine.low %v283_v27, %v285_v28  ;;  %v2335_v38 = vld [vmem:[%s2574_s29 + $0x14] ss:$12 sps:$4 sm:$0xff]  }
  0x32   : > { %1998 = vmatprep.subr.bf16.mxu0 %v2274_v39  ;;  %2126 = vmatprep.subr.bf16.mxu1 %v2275_v40  ;;  %v2331_v39 = vld [vmem:[%s2751_s2 + $0x238] sm:$0xff]  }
  0x33   : > { %656 = vmatprep.mubr.bf16.mxu0 %v2277_v41  ;;  %2136 = vmatprep.mubr.bf16.mxu1 %v2299_v62  ;;  %v2332_v41 = vld [vmem:[%s2751_s2 + $0x1b8] sm:$0xff]  }
  0x35   : > { %1999 = vmatpush3.bf16.msra.mxu0 %v2276_v42  ;;  %2127 = vmatpush3.bf16.msra.mxu1 %v2275_v40  ;;  %v1862_v40 = vcombine.high %v2588_v60, %v2613_v7  ;;  %v1861_v42 = vcombine.low %v2588_v60, %v2613_v7 }
  0x36   : > { %2000 = vmatprep.subr.bf16.mxu0 %v2280_v43  ;;  %2128 = vmatprep.subr.bf16.mxu1 %v2281_v45  ;;  %v2336_v43 = vld [vmem:[%s2574_s29 + $0x2c] ss:$12 sps:$4 sm:$0xff]  }
  0x38   : > { %657 = vmatmul.mubr.bf16.gmra.mrb[8].mxu0 %v2279_v44  ;;  %v1865_v44 = vcombine.high %v2616_v8, %v2641_v17 }
  0x39   : > { %2001 = vmatpush3.bf16.msra.mxu0 %v2282_v46  ;;  %2129 = vmatpush3.bf16.msra.mxu1 %v2281_v45  ;;  %v2338_v45 = vld [vmem:[%s2574_s29 + $0x44] ss:$12 sps:$4 sm:$0xff]   ;;  %v1864_v46 = vcombine.low %v2616_v8, %v2641_v17 }
  0x3a   : > { %2002 = vmatprep.subr.bf16.mxu0 %v2283_v47  ;;  %2130 = vmatprep.subr.bf16.mxu1 %v2284_v48  ;;  %v2340_v47 = vld [vmem:[%s2574_s29 + $0x5c] ss:$12 sps:$4 sm:$0xff]  }
  0x3b   : > { %664 = vmatprep.mubr.bf16.mxu0 %v2286_v49  ;;  %v1090_v49 = vld [vmem:[%s2574_s29 + $0x60] sm:$0xff] }
  0x3c   : > { %v1871_v51 = vcombine.high %v285_v28, %v1090_v49 }
  0x3d   : > { %2003 = vmatpush3.bf16.msra.mxu0 %v2285_v50  ;;  %2131 = vmatpush3.bf16.msra.mxu1 %v2284_v48  ;;  %v1868_v48 = vcombine.high %v2644_v18, %v283_v27  ;;  %v1867_v50 = vcombine.low %v2644_v18, %v283_v27 }
  0x3e   : > { %2004 = vmatprep.subr.bf16.mxu0 %v2290_v52  ;;  %2132 = vmatprep.subr.bf16.mxu1 %v2291_v53  ;;  %v1870_v52 = vcombine.low %v285_v28, %v1090_v49 }
  0x40   : > { %665 = vmatmul.mubr.bf16.gmra.mrb[12].mxu0 %v2288_v55 }
  0x41   : > { %2005 = vmatpush3.bf16.msra.mxu0 %v2293_v56  ;;  %2133 = vmatpush3.bf16.msra.mxu1 %v2291_v53 }
  0x42   : > { %2006 = vmatprep.subr.bf16.mxu0 %v2294_v57  ;;  %2134 = vmatprep.subr.bf16.mxu1 %v2295_v58 }
  0x43   : > { %978 = vmatprep.mubr.bf16.mxu0 %v1778_v61 }
  0x45   : > { %2007 = vmatpush3.bf16.msra.mxu0 %v2296_v63  ;;  %2135 = vmatpush3.bf16.msra.mxu1 %v2295_v58 }
  0x46   : > { %2044 = vmatprep.subr.bf16.mxu0 %v2300_v0  ;;  %2144 = vmatprep.subr.bf16.mxu1 %v2301_v1 }
  0x48   : > { %979 = vmatmul.mubr.bf16.vlgmr.msra.gmra.mrb[16].mxu0 %v1777_v3  ;;  %2137 = vmatmul.mubr.bf16.vlgmr.msra.gmra.mrb[0].mxu1 %v2302_v2 }
  0x49   : > { %2045 = vmatpush3.bf16.msra.mxu0 %v2303_v4  ;;  %2145 = vmatpush3.bf16.msra.mxu1 %v2301_v1 }
  0x4a   : > { %2046 = vmatprep.subr.bf16.mxu0 %v2304_v5  ;;  %2146 = vmatprep.subr.bf16.mxu1 %v2305_v6 }
  0x4b   : > { %986 = vmatprep.mubr.bf16.mxu0 %v1781_v10  ;;  %2140 = vmatprep.mubr.bf16.mxu1 %v2324_v29 }
  0x4d   : > { %2047 = vmatpush3.bf16.msra.mxu0 %v2306_v9  ;;  %2147 = vmatpush3.bf16.msra.mxu1 %v2305_v6 }
  0x4e   : > { %2048 = vmatprep.subr.bf16.mxu0 %v2309_v11  ;;  %2148 = vmatprep.subr.bf16.mxu1 %v2310_v12 }
  0x50   : > { %987 = vmatmul.mubr.bf16.gmra.mrb[20].mxu0 %v1780_v14  ;;  %2141 = vmatmul.mubr.bf16.gmra.mrb[4].mxu1 %v2326_v30 }
  0x51   : > { %2049 = vmatpush3.bf16.msra.mxu0 %v2311_v13  ;;  %2149 = vmatpush3.bf16.msra.mxu1 %v2310_v12 }
  0x52   : > { %2050 = vmatprep.subr.bf16.mxu0 %v2312_v15  ;;  %2150 = vmatprep.subr.bf16.mxu1 %v2313_v16 }
  0x53   : > { %994 = vmatprep.mubr.bf16.mxu0 %v1784_v19  ;;  %2160 = vmatprep.mubr.bf16.mxu1 %v2335_v38 }
  0x55   : > { %2051 = vmatpush3.bf16.msra.mxu0 %v2314_v20  ;;  %2151 = vmatpush3.bf16.msra.mxu1 %v2313_v16 }
  0x56   : > { %2052 = vmatprep.subr.bf16.mxu0 %v2317_v21  ;;  %2152 = vmatprep.subr.bf16.mxu1 %v2318_v22 }
  0x58   : > { %995 = vmatmul.mubr.bf16.gmra.mrb[24].mxu0 %v1783_v24 }
  0x59   : > { %2053 = vmatpush3.bf16.msra.mxu0 %v2319_v23  ;;  %2153 = vmatpush3.bf16.msra.mxu1 %v2318_v22 }
  0x5a   : > { %2054 = vmatprep.subr.bf16.mxu0 %v2320_v25  ;;  %2154 = vmatprep.subr.bf16.mxu1 %v2321_v26 }
  0x5b   : > { %1002 = vmatprep.mubr.bf16.mxu0 %v1787_v31 }
  0x5d   : > { %2055 = vmatpush3.bf16.msra.mxu0 %v2322_v32  ;;  %2155 = vmatpush3.bf16.msra.mxu1 %v2321_v26 }
  0x5e   : > { %2056 = vmatprep.subr.bf16.mxu0 %v2327_v33  ;;  %2156 = vmatprep.subr.bf16.mxu1 %v2328_v34 }
  0x60   : > { %1003 = vmatmul.mubr.bf16.gmra.mrb[28].mxu0 %v1786_v36 }
  0x61   : > { %2057 = vmatpush3.bf16.msra.mxu0 %v2329_v35  ;;  %2157 = vmatpush3.bf16.msra.mxu1 %v2328_v34 }
  0x62   : > { %2058 = vmatprep.subr.bf16.mxu0 %v2330_v37  ;;  %2158 = vmatprep.subr.bf16.mxu1 %v2331_v39 }
  0x63   : > { %1381 = vmatprep.mubr.bf16.mxu0 %v1862_v40 }
  0x65   : > { %2059 = vmatpush3.bf16.msra.mxu0 %v2332_v41  ;;  %2159 = vmatpush3.bf16.msra.mxu1 %v2331_v39 }
  0x68   : > { %1382 = vmatmul.mubr.bf16.vlgmr.msra.gmra.mrb[32].mxu0 %v1861_v42  ;;  %2161 = vmatmul.mubr.bf16.vlgmr.msra.gmra.mrb[0].mxu1 %v2336_v43 }
  0x69   : > { %1389 = vmatprep.mubr.bf16.mxu0 %v1865_v44  ;;  %2164 = vmatprep.mubr.bf16.mxu1 %v2338_v45 }
  0x70   : > { %1390 = vmatmul.mubr.bf16.gmra.mrb[36].mxu0 %v1864_v46  ;;  %2165 = vmatmul.mubr.bf16.gmra.mrb[4].mxu1 %v2340_v47 }
  0x71   : > { %1397 = vmatprep.mubr.bf16.mxu0 %v1868_v48 }
  0x78   : > { %1398 = vmatmul.mubr.bf16.gmra.mrb[40].mxu0 %v1867_v50 }
  0x79   : > { %1405 = vmatprep.mubr.bf16.mxu0 %v1871_v51 }
  0x80   : > { %1406 = vmatmul.mubr.bf16.gmra.mrb[44].mxu0 %v1870_v52 }
  0xfb   : > { %v1956_v53 = vpop.f32.mrb[0].mxu0 }
  0xfc   : > { %v1957_v54 = vpop.f32.mrb[1].mxu0 }
  0xfd   : > { %v1958_v55 = vadd.f32 %v1957_v54, %v1956_v53  ;;  %v1959_v56 = vpop.f32.mrb[2].mxu0 }
  0xfe   : > { %v1960_v57 = vpop.f32.mrb[3].mxu0 }
  0xff   : > { %v1961_v58 = vadd.f32 %v1960_v57, %v1959_v56  ;;  %v2717_v56 = vld [vmem:[%s2752_s3] ss:$0 sm:$0xff] }
 0x103   : > { %v1962_v59 = vpop.f32.mrb[4].mxu0 }
 0x104   : > { %v1963_v60 = vpop.f32.mrb[5].mxu0 }
 0x105   : > { %v1964_v61 = vadd.f32 %v1963_v60, %v1962_v59  ;;  %v1965_v62 = vpop.f32.mrb[6].mxu0 }
 0x106   : > { %v1966_v63 = vpop.f32.mrb[7].mxu0 }
 0x107   : > { %v1967_v0 = vadd.f32 %v1966_v63, %v1965_v62 }
 0x10b   : > { %v1968_v1 = vpop.f32.mrb[8].mxu0 }
 0x10c   : > { %v1969_v2 = vpop.f32.mrb[9].mxu0 }
 0x10d   : > { %v1970_v3 = vadd.f32 %v1969_v2, %v1968_v1  ;;  %v1971_v4 = vpop.f32.mrb[10].mxu0 }
 0x10e   : > { %v1972_v5 = vpop.f32.mrb[11].mxu0 }
 0x10f   : > { %v1973_v6 = vadd.f32 %v1972_v5, %v1971_v4 }
 0x113   : > { %v1974_v7 = vpop.f32.mrb[12].mxu0 }
 0x114   : > { %v1975_v8 = vpop.f32.mrb[13].mxu0 }
 0x115   : > { %v1976_v9 = vadd.f32 %v1975_v8, %v1974_v7  ;;  %v1977_v10 = vpop.f32.mrb[14].mxu0 }
 0x116   : > { %v1978_v11 = vpop.f32.mrb[15].mxu0 }
 0x117   : > { %v1979_v12 = vadd.f32 %v1978_v11, %v1977_v10 }
 0x11b   : > { %v2008_v13 = vpop.f32.mrb[16].mxu0 }
 0x11c   : > { %v2009_v14 = vpop.f32.mrb[17].mxu0 }
 0x11d   : > { %v2010_v15 = vadd.f32 %v2009_v14, %v2008_v13  ;;  %v2011_v16 = vpop.f32.mrb[18].mxu0 }
 0x11e   : > { %v2012_v17 = vpop.f32.mrb[19].mxu0 }
 0x11f   : > { %v2171_v18 = vadd.f32 %v2010_v15, %v1958_v55  ;;  %v2013_v19 = vadd.f32 %v2012_v17, %v2011_v16 }
 0x121   : > { %v2177_v20 = vadd.f32 %v2013_v19, %v1961_v58 }
 0x123   : > { %v2014_v21 = vpop.f32.mrb[20].mxu0 }
 0x124   : > { %v2015_v22 = vpop.f32.mrb[21].mxu0 }
 0x125   : > { %v2016_v23 = vadd.f32 %v2015_v22, %v2014_v21  ;;  %v2017_v24 = vpop.f32.mrb[22].mxu0 }
 0x126   : > { %v2018_v25 = vpop.f32.mrb[23].mxu0 }
 0x127   : > { %v2168_v26 = vadd.f32 %v2016_v23, %v1964_v61  ;;  %v2019_v27 = vadd.f32 %v2018_v25, %v2017_v24 }
 0x129   : > { %v2174_v28 = vadd.f32 %v2019_v27, %v1967_v0 }
 0x12b   : > { %v2020_v29 = vpop.f32.mrb[24].mxu0 }
 0x12c   : > { %v2021_v30 = vpop.f32.mrb[25].mxu0 }
 0x12d   : > { %v2022_v31 = vadd.f32 %v2021_v30, %v2020_v29  ;;  %v2023_v32 = vpop.f32.mrb[26].mxu0 }
 0x12e   : > { %v2024_v33 = vpop.f32.mrb[27].mxu0 }
 0x12f   : > { %v2183_v34 = vadd.f32 %v2022_v31, %v1970_v3  ;;  %v2025_v35 = vadd.f32 %v2024_v33, %v2023_v32 }
 0x131   : > { %v2708_v36 = vadd.f32 %v2025_v35, %v1973_v6 }
 0x133   : > { %v2026_v37 = vpop.f32.mrb[28].mxu0 }
 0x134   : > { %v2027_v38 = vpop.f32.mrb[29].mxu0 }
 0x135   : > { %v2028_v39 = vadd.f32 %v2027_v38, %v2026_v37  ;;  %v2029_v40 = vpop.f32.mrb[30].mxu0 }
 0x136   : > { %v2030_v41 = vpop.f32.mrb[31].mxu0 }
 0x137   : > { %v2710_v42 = vadd.f32 %v2028_v39, %v1976_v9  ;;  %v2031_v43 = vadd.f32 %v2030_v41, %v2029_v40 }
 0x139   : > { %v2712_v44 = vadd.f32 %v2031_v43, %v1979_v12 }
 0x13b   : > { %v2060_v45 = vpop.f32.mrb[32].mxu0  ;;  %v2162_v46 = vpop.f32.mrb[0].mxu1 }
 0x13c   : > { %v2061_v47 = vpop.f32.mrb[33].mxu0  ;;  %v1448_v48 = vpop.f32.mrb[1].mxu1 }
 0x13d   : > { %v2062_v49 = vadd.f32 %v2061_v47, %v2060_v45  ;;  %v2063_v50 = vpop.f32.mrb[34].mxu0  ;;  %v2163_v51 = vpop.f32.mrb[2].mxu1 }
 0x13e   : > { %v2064_v52 = vpop.f32.mrb[35].mxu0  ;;  %v1451_v53 = vpop.f32.mrb[3].mxu1 }
 0x13f   : > { %v2172_v54 = vadd.f32 %v2171_v18, %v2062_v49  ;;  %v2065_v55 = vadd.f32 %v2064_v52, %v2063_v50 }
 0x141   : > { %v2173_v57 = vadd.f32 %v2172_v54, %v1448_v48  ;;  %v2178_v58 = vadd.f32 %v2177_v20, %v2065_v55 }
 0x143   : > { %v1493_v59 = vadd.f32 %v2173_v57, %v2717_v56  ;;  %v2179_v60 = vadd.f32 %v2178_v58, %v1451_v53  ;;  %v2066_v61 = vpop.f32.mrb[36].mxu0  ;;  %v2166_v62 = vpop.f32.mrb[4].mxu1 }
 0x144   : > { %v2067_v63 = vpop.f32.mrb[37].mxu0  ;;  %v1464_v0 = vpop.f32.mrb[5].mxu1 }
 0x145   : > { %v1509_v1 = vmul.f32 0.01, %v1493_v59  ;;  %v1494_v2 = vadd.f32 %v2179_v60, %v2717_v56  ;;  %v2068_v3 = vadd.f32 %v2067_v63, %v2066_v61  ;;  %v2069_v4 = vpop.f32.mrb[38].mxu0  ;;  %v2167_v5 = vpop.f32.mrb[6].mxu1  ;;  %vm1501_vm0 = vcmp.ge.f32.partialorder %v1493_v59, 0.0 }
 0x146   : > { %v2070_v6 = vpop.f32.mrb[39].mxu0  ;;  %v1467_v7 = vpop.f32.mrb[7].mxu1 }
 0x147   : > { %vm1502_vm1 = vcmp.ge.f32.partialorder %v1494_v2, 0.0  ;;  %v1510_v8 = vmul.f32 0.01, %v1494_v2  ;;  %v2169_v9 = vadd.f32 %v2168_v26, %v2068_v3  ;;  %v2071_v10 = vadd.f32 %v2070_v6, %v2069_v4 }
 0x148   : > { %v1517_v11 = vsel %vm1501_vm0, %v1493_v59, %v1509_v1 }
 0x149   : > { %v1518_v12 = vsel %vm1502_vm1, %v1494_v2, %v1510_v8  ;;  %v2170_v13 = vadd.f32 %v2169_v9, %v2162_v46  ;;  %v2175_v15 = vadd.f32 %v2174_v28, %v2071_v10 }
 0x14a   : > { %v1920_v14 = vpack.c.bf16 %v1518_v12, %v1517_v11 }
 0x14b   : > { %v1495_v16 = vadd.f32 %v2170_v13, %v2717_v56  ;;  %v2072_v17 = vpop.f32.mrb[40].mxu0  ;;  %v2176_v18 = vadd.f32 %v2175_v15, %v2163_v51 }
 0x14c   : > { %1921 = vst [vmem:[%s2725_s26] sm:$0xff] %v1920_v14   ;;  %v2073_v19 = vpop.f32.mrb[41].mxu0 }
 0x14d   : > { %v2074_v20 = vadd.f32 %v2073_v19, %v2072_v17  ;;  %v2075_v21 = vpop.f32.mrb[42].mxu0  ;;  %v1511_v22 = vmul.f32 0.01, %v1495_v16  ;;  %v1496_v23 = vadd.f32 %v2176_v18, %v2717_v56  ;;  %vm1503_vm2 = vcmp.ge.f32.partialorder %v1495_v16, 0.0 }
 0x14e   : > { %v2076_v24 = vpop.f32.mrb[43].mxu0 }
 0x14f   : > { %v2184_v25 = vadd.f32 %v2183_v34, %v2074_v20  ;;  %v2077_v26 = vadd.f32 %v2076_v24, %v2075_v21  ;;  %vm1504_vm3 = vcmp.ge.f32.partialorder %v1496_v23, 0.0  ;;  %v1512_v27 = vmul.f32 0.01, %v1496_v23 }
 0x150   : > { %v1519_v30 = vsel %vm1503_vm2, %v1495_v16, %v1511_v22 }
 0x151   : > { %v2185_v29 = vadd.f32 %v2184_v25, %v1464_v0  ;;  %v2190_v28 = vadd.f32 %v2708_v36, %v2077_v26  ;;  %v1520_v31 = vsel %vm1504_vm3, %v1496_v23, %v1512_v27 }
 0x152   : > { %v1925_v32 = vpack.c.bf16 %v1520_v31, %v1519_v30 }
 0x153   : > { %v1497_v33 = vadd.f32 %v2185_v29, %v2717_v56  ;;  %v2191_v35 = vadd.f32 %v2190_v28, %v1467_v7  ;;  %v2078_v37 = vpop.f32.mrb[44].mxu0 }
 0x154   : > { %v2079_v38 = vpop.f32.mrb[45].mxu0  ;;  %1937 = vst [vmem:[%s2725_s26 + $0x8] sm:$0xff] %v1925_v32  }
 0x155   : > { %v1513_v39 = vmul.f32 0.01, %v1497_v33  ;;  %v1498_v40 = vadd.f32 %v2191_v35, %v2717_v56  ;;  %v2080_v34 = vadd.f32 %v2079_v38, %v2078_v37  ;;  %v2081_v41 = vpop.f32.mrb[46].mxu0  ;;  %vm1505_vm4 = vcmp.ge.f32.partialorder %v1497_v33, 0.0 }
 0x156   : > { %v2082_v43 = vpop.f32.mrb[47].mxu0 }
 0x157   : > { %vm1506_vm5 = vcmp.ge.f32.partialorder %v1498_v40, 0.0  ;;  %v1514_v45 = vmul.f32 0.01, %v1498_v40  ;;  %v2181_v36 = vadd.f32 %v2710_v42, %v2080_v34  ;;  %v2083_v46 = vadd.f32 %v2082_v43, %v2081_v41 }
 0x158   : > { %v1521_v47 = vsel %vm1505_vm4, %v1497_v33, %v1513_v39 }
 0x159   : > { %v1522_v48 = vsel %vm1506_vm5, %v1498_v40, %v1514_v45  ;;  %v2182_v49 = vadd.f32 %v2181_v36, %v2166_v62  ;;  %v2187_v51 = vadd.f32 %v2712_v44, %v2083_v46 }
 0x15a   : > { %v1930_v50 = vpack.c.bf16 %v1522_v48, %v1521_v47 }
 0x15b   : > { %v1499_v52 = vadd.f32 %v2182_v49, %v2717_v56  ;;  %v2188_v53 = vadd.f32 %v2187_v51, %v2167_v5 }
 0x15c   : > { %1938 = vst [vmem:[%s2725_s26 + $0x10] sm:$0xff] %v1930_v50  }
 0x15d   : > { %v1515_v54 = vmul.f32 0.01, %v1499_v52  ;;  %v1500_v55 = vadd.f32 %v2188_v53, %v2717_v56  ;;  %vm1507_vm6 = vcmp.ge.f32.partialorder %v1499_v52, 0.0 }
 0x15f   : > { %vm1508_vm7 = vcmp.ge.f32.partialorder %v1500_v55, 0.0  ;;  %v1516_v57 = vmul.f32 0.01, %v1500_v55  ;;  %v1523_v58 = vsel %vm1507_vm6, %v1499_v52, %v1515_v54 }
 0x161   : > { %v1524_v42 = vsel %vm1508_vm7, %v1500_v55, %v1516_v57 }
 0x162   : > { %v1935_v59 = vpack.c.bf16 %v1524_v42, %v1523_v58 }
 0x164   : > { %1939 = vst [vmem:[%s2725_s26 + $0x18] sm:$0xff] %v1935_v59  }
 0x165 PF: > { %s14_s17 = sadd.s32 1, %s2367_s17   ;;  %s2754_s15 = smov %s2363_s16 }
 0x166   : > { %p11_p5 = scmp.ge.s32.totalorder %s14_s17, 4   ;;  %s2755_s16 = smov %s2757_s18 }
 0x168   :  { %13 = sbr.rel (!%p11_p5) target bundleno = 2 (0x2), region = 77 }

// kernel: gradual_style_block_forward.3
= control target key start
LH: loop header
LB: loop body
LE: loop exit
PB: predicated region body
PF: predicated region fallthrough
CT: control target
= control target key end

     0   :  { %s7280_s0 = inlined_call_operand.vmem [shape: bf16[2,64,128], index: 0, kind: input, shape index: {}]   ;;  %s7281_s1 = inlined_call_operand.vmem [shape: bf16[144,64], index: 1, kind: input, shape index: {}]   ;;  %s7282_s2 = inlined_call_operand.vmem [shape: bf16[9,128,128], index: 2, kind: input, shape index: {}]   ;;  %s7283_s3 = inlined_call_operand.vmem [shape: f32[1,128], index: 3, kind: input, shape index: {}]   ;;  %s7284_s4 = inlined_call_operand.vmem [shape: bf16[72,16], index: 4, kind: input, shape index: {}]   ;;  %s7285_s5 = inlined_call_operand.vmem [shape: bf16[9,128,128], index: 5, kind: input, shape index: {}]   ;;  %s7286_s6 = inlined_call_operand.vmem [shape: f32[1,128], index: 6, kind: input, shape index: {}]   ;;  %s7287_s7 = inlined_call_operand.vmem [shape: bf16[72,8], index: 7, kind: input, shape index: {}]   ;;  %s7288_s8 = inlined_call_operand.vmem [shape: bf16[9,128,128], index: 8, kind: input, shape index: {}]   ;;  %s7289_s9 = inlined_call_operand.vmem [shape: f32[1,128], index: 9, kind: input, shape index: {}]   ;;  %s7290_s10 = inlined_call_operand.vmem [shape: bf16[128,128], index: 10, kind: input, shape index: {}]   ;;  %s7291_s11 = inlined_call_operand.vmem [shape: f32[1,128], index: 11, kind: input, shape index: {}]   ;;  %s7292_s12 = inlined_call_operand.hbm [shape: f32[2,1,128], index: 12, kind: output, shape index: {}]  }
   0x1   :  { %7293 = sst [smem:[#allocation5_spill]] %s7280_s0 }
   0x2   :  { %17 = vsyncpa [#allocation3], 0 }
   0x3   :  { %19 = vsyncpa [#allocation3 + $0x1], 0  ;;  %s6018_s21 = smov 0   ;;  %s6020_s22 = smov 0  }
   0x4   :  { %s6022_s23 = smov 0   ;;  %s6024_s24 = smov 0  }
   0x5 LB: > { %s6039_s25 = sadd.s32 4294967295, %s5948_s24   ;;  %s4010_s26 = sadd.s32 4294967294, %s5948_s24   ;;  %s5948_s24 = sphi %s6024_s24, %s7300_s24   ;;  %s5944_s23 = sphi %s6022_s23, %s7299_s23   ;;  %s5940_s22 = sphi %s6020_s22, %s7298_s22   ;;  %s5936_s21 = sphi %s6018_s21, %s7297_s21  }
   0x6   : > { %s6043_s27 = sadd.s32 1, %s5948_s24   ;;  %s289_s28 = sadd.s32 1, %s5944_s23 }
   0x7   : > { %s286_s29 = ssub.s32 %s5948_s24, %s6043_s27  ;;  %p299_p0 = scmp.ne.s32.totalorder %s5944_s23, %s5940_s22 }
   0x8   : > { %p287_p1 = scmp.eq.s32.totalorder %s286_s29, 0  ;;  %p300_p2 = scmp.eq.s32.totalorder %s6039_s25, 1 }
   0x9   : > { %p305_p3 = scmp.ne.s32.totalorder %s5940_s22, %s5936_s21  ;;  %p306_p4 = scmp.eq.s32.totalorder %s4010_s26, 1 }
   0xa   : > { %s6054_s30 = scalar_select %p287_p1, %s5944_s23, %s289_s28  }
   0xb   : > { %p6056_p5 = por %p300_p2, %p299_p0  ;;  %p6060_p6 = por %p306_p4, %p305_p3 }
   0xc   : > { %p4013_p7 = scmp.ge.s32.totalorder %s5948_s24, 1  ;;  %p365_p8 = scmp.lt.s32.totalorder %s5948_s24, 3 }
   0xe   : > { %p366_p9 = pnand %p4013_p7, %p365_p8 }
   0xf   : > { %p406_p10 = scmp.lt.s32.totalorder (!%p366_p9), %s6039_s25, 1  ;;  %v5950_v0 = vmov (!%p366_p9), 0.0   ;;  %vm5951_vm0 = vmmov (!%p366_p9), 0   ;;  %s7296_s0 = sld [smem:[#allocation5_spill]] (!%p366_p9)  ;;  %v5653_v4 = vld [vmem:[%s7282_s2 + $0x40] sm:$0xff] (!%p366_p9)   ;;  %v5654_v6 = vld [vmem:[%s7282_s2 + $0x48] sm:$0xff] (!%p366_p9)  }
  0x10   : > { %369 = sbr.rel (%p366_p9) target bundleno = 1989 (0x7c5), region = 68  ;;  %4950 = vmatprep.subr.bf16.mxu0 (!%p366_p9), %v5950_v0  ;;  %4958 = vmatprep.mubr.msk.bf16.mxu0 (!%p366_p9), %vm5951_vm0, %v5950_v0  ;;  %v5643_v7 = vld [vmem:[%s7281_s1] sm:$0xff] (!%p366_p9)   ;;  %vm507_vm1 = vcmask (!%p366_p9), 523264   ;;  %v5655_v9 = vld [vmem:[%s7282_s2 + $0x50] sm:$0xff] (!%p366_p9)   ;;  %v5656_v10 = vld [vmem:[%s7282_s2 + $0x88] sm:$0xff] (!%p366_p9)   ;;  %vm1664_vm4 = vcmask (!%p366_p9), 130048  }
  0x11   : > { %4994 = vmatprep.subr.bf16.mxu1 (!%p366_p9), %v5950_v0  ;;  %5010 = vmatprep.mubr.msk.bf16.mxu1 (!%p366_p9), %vm5951_vm0, %v5950_v0  ;;  %v5652_v8 = vld [vmem:[%s7282_s2 + $0x80] sm:$0xff] (!%p366_p9)   ;;  %v5657_v11 = vld [vmem:[%s7282_s2 + $0x58] sm:$0xff] (!%p366_p9)   ;;  %v5644_v12 = vld [vmem:[%s7281_s1 + $0x8] sm:$0xff] (!%p366_p9)   ;;  %vm2780_vm6 = vcmask (!%p366_p9), 1043456   ;;  %vm2764_vm7 = vcmask (!%p366_p9), 64512   ;;  %s404_s17 = sand.u32 (!%p366_p9), 1, %s5940_s22  }
  0x12   : > { %4995 = vmatpush3.bf16.msra.mxu1 (!%p366_p9), %v5653_v4  ;;  %v5659_v13 = vld [vmem:[%s7282_s2 + $0x90] sm:$0xff] (!%p366_p9)   ;;  %v5658_v14 = vld [vmem:[%s7282_s2 + $0x60] sm:$0xff] (!%p366_p9)   ;;  %v5646_v16 = vld [vmem:[%s7281_s1 + $0x18] sm:$0xff] (!%p366_p9)   ;;  %s4669_s20 = sshll.u32 (!%p366_p9), %s6039_s25, 4  ;;  %s405_s26 = scalar_lea.vmem (!%p366_p9), [#allocation2], %s404_s17 }
  0x13   : > { %4996 = vmatprep.subr.bf16.mxu1 (!%p366_p9), %v5950_v0  ;;  %v5645_v15 = vld [vmem:[%s7281_s1 + $0x10] sm:$0xff] (!%p366_p9)   ;;  %v5647_v17 = vld [vmem:[%s7281_s1 + $0x20] sm:$0xff] (!%p366_p9)   ;;  %v5648_v18 = vld [vmem:[%s7281_s1 + $0x28] sm:$0xff] (!%p366_p9)   ;;  %s3955_s28 = sshll.u32 (!%p366_p9), %s405_s26, 4  ;;  %s3943_s18 = scalar_lea.sflag (!%p366_p9), [#allocation3], %s404_s17  ;;  %s7240_s28 = int_to_ptr.vmem [resolvable:$true] %s3955_s28 }
  0x14   : > { %v5649_v19 = vld [vmem:[%s7281_s1 + $0x30] sm:$0xff] (!%p366_p9)   ;;  %v5650_v20 = vld [vmem:[%s7281_s1 + $0x38] sm:$0xff] (!%p366_p9)   ;;  %v5651_v21 = vld [vmem:[%s7281_s1 + $0x40] sm:$0xff] (!%p366_p9)  }
  0x15   : > { %v5660_v22 = vld [vmem:[%s7282_s2 + $0x68] sm:$0xff] (!%p366_p9)   ;;  %v5661_v23 = vld [vmem:[%s7282_s2 + $0x70] sm:$0xff] (!%p366_p9)   ;;  %v5662_v24 = vld [vmem:[%s7282_s2 + $0x98] sm:$0xff] (!%p366_p9)  }
  0x16   : > { %4997 = vmatpush3.bf16.msra.mxu1 (!%p366_p9), %v5654_v6  ;;  %v5663_v25 = vld [vmem:[%s7282_s2 + $0x78] sm:$0xff] (!%p366_p9)   ;;  %v5665_v26 = vld [vmem:[%s7282_s2 + $0xa0] sm:$0xff] (!%p366_p9)   ;;  %v5669_v27 = vld [vmem:[%s7282_s2 + $0xa8] sm:$0xff] (!%p366_p9)  }
  0x17   : > { %s407_s15 = scalar_select %p406_p10, %s6039_s25, 1  ;;  %4998 = vmatprep.subr.bf16.mxu1 %v5950_v0  ;;  %v5672_v28 = vld [vmem:[%s7282_s2 + $0xb0] sm:$0xff]   ;;  %v5674_v29 = vld [vmem:[%s7282_s2 + $0xb8] sm:$0xff]   ;;  %v5664_v38 = vld [vmem:[%s7282_s2] sm:$0xff]  }
  0x18   : > { %v5666_v41 = vld [vmem:[%s7282_s2 + $0x8] sm:$0xff]   ;;  %v5667_v44 = vld [vmem:[%s7282_s2 + $0x10] sm:$0xff]   ;;  %v5676_v46 = vld [vmem:[%s7282_s2 + $0x100] sm:$0xff]   ;;  %s5886_s25 = scalar_lea.vmem %s7240_s28, 16 }
  0x19   : > { %s4672_s16 = sshll.u32 %s407_s15, 5  ;;  %v5668_v49 = vld [vmem:[%s7282_s2 + $0x18] sm:$0xff]   ;;  %v5678_v50 = vld [vmem:[%s7282_s2 + $0x108] sm:$0xff]   ;;  %v5670_v53 = vld [vmem:[%s7282_s2 + $0x20] sm:$0xff]   ;;  %p5887_p11 = scmp.ne.s32.totalorder %s7240_s28, %s5886_s25 }
  0x1a   : > { %s410_s19 = scalar_lea.vmem %s7296_s0, %s4672_s16  ;;  %4999 = vmatpush3.bf16.msra.mxu1 %v5655_v9  ;;  %v5680_v54 = vld [vmem:[%s7282_s2 + $0x110] sm:$0xff]   ;;  %v5671_v58 = vld [vmem:[%s7282_s2 + $0x28] sm:$0xff]   ;;  %v5682_v59 = vld [vmem:[%s7282_s2 + $0x118] sm:$0xff]   ;;  %s7238_s16 = scalar_lea.hbm %s7292_s12, %s4669_s20 }
  0x1b   : > { %v5639_v1 = vld [vmem:[%s410_s19] sm:$0xff]   ;;  %v5640_v2 = vld [vmem:[%s410_s19 + $0x8] sm:$0xff]   ;;  %v5641_v3 = vld [vmem:[%s410_s19 + $0x10] sm:$0xff]   ;;  %5000 = vmatprep.subr.bf16.mxu1 %v5950_v0  ;;  %p5888_p12 = pnand %p5887_p11, %p6056_p5 }
  0x1c   : > { %4951 = vmatpush3.bf16.msra.mxu0 %v5639_v1  ;;  %v5642_v5 = vld [vmem:[%s410_s19 + $0x18] sm:$0xff]   ;;  %v5673_v62 = vld [vmem:[%s7282_s2 + $0x30] sm:$0xff]   ;;  %v5684_v63 = vld [vmem:[%s7282_s2 + $0x120] sm:$0xff]   ;;  %s5952_s19 = smov [#allocation2]  }
  0x1d   : > { %4952 = vmatprep.subr.bf16.mxu0 %v5950_v0  ;;  %v5675_v4 = vld [vmem:[%s7282_s2 + $0x38] sm:$0xff]   ;;  %v5688_v9 = vld [vmem:[%s7282_s2 + $0x130] sm:$0xff]   ;;  %p5889_p13 = pneg %p5888_p12  ;;  %s5890_s0 = sshll.u32 %s5952_s19, 4  ;;  %s5891_s0 = int_to_ptr.vmem [resolvable:$false] %s5890_s0 }
  0x1e   : > { %5001 = vmatpush3.bf16.msra.mxu1 %v5657_v11  ;;  %s5892_s29 = scalar_lea.vmem %s5891_s0, 32  ;;  %p5893_p0 = scmp.lt.s32.totalorder %s7240_s28, %s5891_s0 }
  0x1f   : > { %5002 = vmatprep.subr.bf16.mxu1 %v5950_v0  ;;  %p5894_p1 = scmp.lt.s32.totalorder %s5892_s29, %s5886_s25 }
  0x20   : > { %4953 = vmatpush3.bf16.msra.mxu0 %v5640_v2 }
  0x21   : > { %4954 = vmatprep.subr.bf16.mxu0 %v5950_v0  ;;  %p5895_p2 = por %p5894_p1, %p5893_p0 }
  0x22   : > { %5003 = vmatpush3.bf16.msra.mxu1 %v5658_v14  ;;  %v5690_v14 = vld [vmem:[%s7282_s2 + $0x138] sm:$0xff]  }
  0x23   : > { %5004 = vmatprep.subr.bf16.mxu1 %v5950_v0  ;;  %p5896_p3 = pnand %p5895_p2, %p5889_p13 }
  0x24   : > { %4955 = vmatpush3.bf16.msra.mxu0 %v5641_v3 }
  0x25   : > { %4956 = vmatprep.subr.bf16.mxu0 %v5950_v0 }
  0x26   : > { %5005 = vmatpush3.bf16.msra.mxu1 %v5660_v22  ;;  %v5683_v22 = vld [vmem:[%s7282_s2 + $0xd8] sm:$0xff]  }
  0x27   : > { %5006 = vmatprep.subr.bf16.mxu1 %v5950_v0 }
  0x28   : > { %4957 = vmatpush3.bf16.msra.mxu0 %v5642_v5  ;;  %v5686_v5 = vld [vmem:[%s7282_s2 + $0x128] sm:$0xff]  }
  0x29   : > { %5034 = vmatprep.subr.bf16.mxu0 %v5950_v0 }
  0x2a   : > { %5007 = vmatpush3.bf16.msra.mxu1 %v5661_v23  ;;  %v5694_v23 = vld [vmem:[%s7282_s2 + $0x188] sm:$0xff]  }
  0x2b   : > { %4959 = vmatmul.mubr.msk.bf16.vlgmr.msra.gmra.mrb[0].mxu0 %vm507_vm1, %v5643_v7  ;;  %5008 = vmatprep.subr.bf16.mxu1 %v5950_v0 }
  0x2c   : > { %4962 = vmatprep.mubr.msk.bf16.mxu0 %vm5951_vm0, %v5950_v0  ;;  %5035 = vmatpush3.bf16.msra.mxu0 %v5652_v8  ;;  %v5677_v8 = vld [vmem:[%s7282_s2 + $0xc0] sm:$0xff]  }
  0x2d   : > { %5036 = vmatprep.subr.bf16.mxu0 %v5950_v0 }
  0x2e   : > { %5009 = vmatpush3.bf16.msra.mxu1 %v5663_v25 }
  0x2f   : > { %5014 = vmatprep.subr.bf16.mxu1 %v5950_v0 }
  0x30   : > { %5037 = vmatpush3.bf16.msra.mxu0 %v5656_v10 }
  0x31   : > { %5038 = vmatprep.subr.bf16.mxu0 %v5950_v0 }
  0x33   : > { %4963 = vmatmul.mubr.msk.bf16.gmra.mrb[4].mxu0 %vm507_vm1, %v5644_v12 }
  0x34   : > { %4966 = vmatprep.mubr.msk.bf16.mxu0 %vm5951_vm0, %v5950_v0  ;;  %5039 = vmatpush3.bf16.msra.mxu0 %v5659_v13  ;;  %v5679_v13 = vld [vmem:[%s7282_s2 + $0xc8] sm:$0xff]  }
  0x35   : > { %5040 = vmatprep.subr.bf16.mxu0 %v5950_v0 }
  0x38   : > { %5041 = vmatpush3.bf16.msra.mxu0 %v5662_v24 }
  0x39   : > { %5042 = vmatprep.subr.bf16.mxu0 %v5950_v0 }
  0x3b   : > { %4967 = vmatmul.mubr.msk.bf16.gmra.mrb[8].mxu0 %vm507_vm1, %v5645_v15 }
  0x3c   : > { %4970 = vmatprep.mubr.msk.bf16.mxu0 %vm5951_vm0, %v5950_v0  ;;  %5043 = vmatpush3.bf16.msra.mxu0 %v5665_v26  ;;  %v5685_v26 = vld [vmem:[%s7282_s2 + $0xe0] sm:$0xff]  }
  0x3d   : > { %5044 = vmatprep.subr.bf16.mxu0 %v5950_v0 }
  0x40   : > { %5045 = vmatpush3.bf16.msra.mxu0 %v5669_v27  ;;  %v5696_v27 = vld [vmem:[%s7282_s2 + $0x190] sm:$0xff]  }
  0x41   : > { %5046 = vmatprep.subr.bf16.mxu0 %v5950_v0 }
  0x43   : > { %4971 = vmatmul.mubr.msk.bf16.gmra.mrb[12].mxu0 %vm507_vm1, %v5646_v16 }
  0x44   : > { %4974 = vmatprep.mubr.msk.bf16.mxu0 %vm5951_vm0, %v5950_v0  ;;  %5047 = vmatpush3.bf16.msra.mxu0 %v5672_v28 }
  0x45   : > { %5048 = vmatprep.subr.bf16.mxu0 %v5950_v0 }
  0x48   : > { %5049 = vmatpush3.bf16.msra.mxu0 %v5674_v29 }
  0x49   : > { %5074 = vmatprep.subr.bf16.mxu0 %v5950_v0 }
  0x4b   : > { %4975 = vmatmul.mubr.msk.bf16.gmra.mrb[16].mxu0 %vm507_vm1, %v5647_v17  ;;  %v5681_v17 = vld [vmem:[%s7282_s2 + $0xd0] sm:$0xff]  }
  0x4c   : > { %4978 = vmatprep.mubr.msk.bf16.mxu0 %vm5951_vm0, %v5950_v0 }
  0x53   : > { %4979 = vmatmul.mubr.msk.bf16.gmra.mrb[20].mxu0 %vm507_vm1, %v5648_v18  ;;  %v5692_v18 = vld [vmem:[%s7282_s2 + $0x180] sm:$0xff]  }
  0x54   : > { %4982 = vmatprep.mubr.msk.bf16.mxu0 %vm5951_vm0, %v5950_v0 }
  0x5b   : > { %4983 = vmatmul.mubr.msk.bf16.gmra.mrb[24].mxu0 %vm507_vm1, %v5649_v19 }
  0x5c   : > { %4986 = vmatprep.mubr.msk.bf16.mxu0 %vm5951_vm0, %v5950_v0 }
  0x63   : > { %4987 = vmatmul.mubr.msk.bf16.gmra.mrb[28].mxu0 %vm507_vm1, %v5650_v20 }
  0x64   : > { %4990 = vmatprep.mubr.msk.bf16.mxu0 %vm5951_vm0, %v5950_v0 }
  0x6b   : > { %4991 = vmatmul.mubr.msk.bf16.gmra.mrb[32].mxu0 %vm507_vm1, %v5651_v21 }
  0x6c   : > { %5050 = vmatprep.mubr.msk.bf16.mxu0 %vm5951_vm0, %v5950_v0 }
  0xfe   : > { %v6199_v30 = vpop.f32.mrb[0].mxu0 }
  0xff   : > { %v4960_v31 = vpop.f32.mrb[1].mxu0 }
 0x100   : > { %v6201_v32 = vpop.f32.mrb[2].mxu0  ;;  %v5687_v31 = vld [vmem:[%s7282_s2 + $0xe8] sm:$0xff]  }
 0x101   : > { %v640_v33 = vpack.c.bf16 %v6201_v32, %v6199_v30  ;;  %v4961_v34 = vpop.f32.mrb[3].mxu0  ;;  %v5698_v32 = vld [vmem:[%s7282_s2 + $0x198] sm:$0xff]  }
 0x106   : > { %v577_v35 = vpop.f32.mrb[4].mxu0 }
 0x107   : > { %v4964_v36 = vpop.f32.mrb[5].mxu0 }
 0x108   : > { %v580_v37 = vpop.f32.mrb[6].mxu0  ;;  %v5700_v36 = vld [vmem:[%s7282_s2 + $0x1a0] sm:$0xff]  }
 0x109   : > { %v641_v39 = vpack.c.bf16 %v580_v37, %v577_v35  ;;  %v4965_v40 = vpop.f32.mrb[7].mxu0  ;;  %v5689_v35 = vld [vmem:[%s7282_s2 + $0xf0] sm:$0xff]  }
 0x10a   : > { %v5691_v40 = vld [vmem:[%s7282_s2 + $0xf8] sm:$0xff]  }
 0x10b   : > { %5011 = vmatmul.mubr.bf16.vlgmr.msra.gmra.mrb[0].mxu1 %v641_v39 }
 0x10c   : > { %5015 = vmatpush3.bf16.msra.mxu1 %v5664_v38  ;;  %5030 = vmatprep.mubr.msk.bf16.mxu1 %vm5951_vm0, %v5950_v0 }
 0x10d   : > { %5016 = vmatprep.subr.bf16.mxu1 %v5950_v0 }
 0x10e   : > { %v585_v42 = vpop.f32.mrb[8].mxu0 }
 0x10f   : > { %v4968_v43 = vpop.f32.mrb[9].mxu0 }
 0x110   : > { %5017 = vmatpush3.bf16.msra.mxu1 %v5666_v41  ;;  %v588_v45 = vpop.f32.mrb[10].mxu0  ;;  %v5702_v41 = vld [vmem:[%s7282_s2 + $0x1a8] sm:$0xff]   ;;  %v5704_v43 = vld [vmem:[%s7282_s2 + $0x1b0] sm:$0xff]  }
 0x111   : > { %5018 = vmatprep.subr.bf16.mxu1 %v5950_v0  ;;  %v642_v47 = vpack.c.bf16 %v588_v45, %v585_v42  ;;  %v4969_v48 = vpop.f32.mrb[11].mxu0  ;;  %v5693_v42 = vld [vmem:[%s7282_s2 + $0x140] sm:$0xff]   ;;  %v5706_v45 = vld [vmem:[%s7282_s2 + $0x1b8] sm:$0xff]  }
 0x112   : > { %v5699_v48 = vld [vmem:[%s7282_s2 + $0x158] sm:$0xff]  }
 0x113   : > { %5051 = vmatmul.mubr.bf16.vlgmr.msra.gmra.mrb[36].mxu0 %v642_v47  ;;  %v5708_v47 = vld [vmem:[%s7282_s2 + $0x200] sm:$0xff]  }
 0x114   : > { %5019 = vmatpush3.bf16.msra.mxu1 %v5667_v44  ;;  %5075 = vmatpush3.bf16.msra.mxu0 %v5676_v46  ;;  %v5695_v44 = vld [vmem:[%s7282_s2 + $0x148] sm:$0xff]   ;;  %v5697_v46 = vld [vmem:[%s7282_s2 + $0x150] sm:$0xff]  }
 0x115   : > { %5020 = vmatprep.subr.bf16.mxu1 %v5950_v0  ;;  %5076 = vmatprep.subr.bf16.mxu0 %v5950_v0 }
 0x116   : > { %v6229_v51 = vpop.f32.mrb[12].mxu0  ;;  %5090 = vmatprep.mubr.msk.bf16.mxu0 %vm5951_vm0, %v5950_v0 }
 0x117   : > { %v4972_v52 = vpop.f32.mrb[13].mxu0 }
 0x118   : > { %5021 = vmatpush3.bf16.msra.mxu1 %v5668_v49  ;;  %5077 = vmatpush3.bf16.msra.mxu0 %v5678_v50  ;;  %v6239_v55 = vpop.f32.mrb[14].mxu0  ;;  %v5710_v49 = vld [vmem:[%s7282_s2 + $0x208] sm:$0xff]   ;;  %v5701_v50 = vld [vmem:[%s7282_s2 + $0x160] sm:$0xff]  }
 0x119   : > { %5022 = vmatprep.subr.bf16.mxu1 %v5950_v0  ;;  %5078 = vmatprep.subr.bf16.mxu0 %v5950_v0  ;;  %v643_v56 = vpack.c.bf16 %v6239_v55, %v6229_v51  ;;  %v4973_v57 = vpop.f32.mrb[15].mxu0  ;;  %v5712_v51 = vld [vmem:[%s7282_s2 + $0x210] sm:$0xff]   ;;  %v5703_v52 = vld [vmem:[%s7282_s2 + $0x168] sm:$0xff]   ;;  %v5716_v55 = vld [vmem:[%s7282_s2 + $0x220] sm:$0xff]  }
 0x11a   : > { %v5718_v57 = vld [vmem:[%s7282_s2 + $0x228] sm:$0xff]  }
 0x11c   : > { %5023 = vmatpush3.bf16.msra.mxu1 %v5670_v53  ;;  %5079 = vmatpush3.bf16.msra.mxu0 %v5680_v54  ;;  %v5714_v53 = vld [vmem:[%s7282_s2 + $0x218] sm:$0xff]   ;;  %v5705_v54 = vld [vmem:[%s7282_s2 + $0x170] sm:$0xff]  }
 0x11d   : > { %5024 = vmatprep.subr.bf16.mxu1 %v5950_v0  ;;  %5080 = vmatprep.subr.bf16.mxu0 %v5950_v0 }
 0x11e   : > { %v601_v60 = vpop.f32.mrb[16].mxu0 }
 0x11f   : > { %v4976_v61 = vpop.f32.mrb[17].mxu0 }
 0x120   : > { %5025 = vmatpush3.bf16.msra.mxu1 %v5671_v58  ;;  %5081 = vmatpush3.bf16.msra.mxu0 %v5682_v59  ;;  %v604_v1 = vpop.f32.mrb[18].mxu0  ;;  %v5709_v58 = vld [vmem:[%s7282_s2 + $0x1c0] sm:$0xff]   ;;  %v5720_v59 = vld [vmem:[%s7282_s2 + $0x230] sm:$0xff]   ;;  %v5722_v61 = vld [vmem:[%s7282_s2 + $0x238] sm:$0xff]  }
 0x121   : > { %5026 = vmatprep.subr.bf16.mxu1 %v5950_v0  ;;  %5082 = vmatprep.subr.bf16.mxu0 %v5950_v0  ;;  %v644_v2 = vpack.c.bf16 %v604_v1, %v601_v60  ;;  %v4977_v3 = vpop.f32.mrb[19].mxu0  ;;  %v5711_v60 = vld [vmem:[%s7282_s2 + $0x1c8] sm:$0xff]   ;;  %v5717_v1 = vld [vmem:[%s7282_s2 + $0x1e0] sm:$0xff]  }
 0x122   : > { %v5721_v3 = vld [vmem:[%s7282_s2 + $0x1f0] sm:$0xff]  }
 0x124   : > { %5027 = vmatpush3.bf16.msra.mxu1 %v5673_v62  ;;  %5083 = vmatpush3.bf16.msra.mxu0 %v5684_v63  ;;  %v5713_v62 = vld [vmem:[%s7282_s2 + $0x1d0] sm:$0xff]   ;;  %v5715_v63 = vld [vmem:[%s7282_s2 + $0x1d8] sm:$0xff]  }
 0x125   : > { %5028 = vmatprep.subr.bf16.mxu1 %v5950_v0  ;;  %5084 = vmatprep.subr.bf16.mxu0 %v5950_v0 }
 0x126   : > { %v6269_v6 = vpop.f32.mrb[20].mxu0 }
 0x127   : > { %v4980_v7 = vpop.f32.mrb[21].mxu0 }
 0x128   : > { %5029 = vmatpush3.bf16.msra.mxu1 %v5675_v4  ;;  %5085 = vmatpush3.bf16.msra.mxu0 %v5686_v5  ;;  %v6277_v10 = vpop.f32.mrb[22].mxu0  ;;  %v5723_v4 = vld [vmem:[%s7282_s2 + $0x1f8] sm:$0xff]  }
 0x129   : > { %5054 = vmatprep.subr.bf16.mxu1 %v5950_v0  ;;  %5086 = vmatprep.subr.bf16.mxu0 %v5950_v0  ;;  %v645_v11 = vpack.c.bf16 %v6277_v10, %v6269_v6  ;;  %v4981_v12 = vpop.f32.mrb[23].mxu0 }
 0x12b   : > { %5031 = vmatmul.mubr.bf16.vlgmr.msra.gmra.mrb[4].mxu1 %v640_v33 }
 0x12c   : > { %5055 = vmatpush3.bf16.msra.mxu1 %v5677_v8  ;;  %5087 = vmatpush3.bf16.msra.mxu0 %v5688_v9 }
 0x12d   : > { %5056 = vmatprep.subr.bf16.mxu1 %v5950_v0  ;;  %5088 = vmatprep.subr.bf16.mxu0 %v5950_v0 }
 0x12e   : > { %5070 = vmatprep.mubr.msk.bf16.mxu1 %vm5951_vm0, %v5950_v0  ;;  %v6296_v15 = vpop.f32.mrb[24].mxu0 }
 0x12f   : > { %v4984_v16 = vpop.f32.mrb[25].mxu0 }
 0x130   : > { %5057 = vmatpush3.bf16.msra.mxu1 %v5679_v13  ;;  %5089 = vmatpush3.bf16.msra.mxu0 %v5690_v14  ;;  %v6304_v19 = vpop.f32.mrb[26].mxu0 }
 0x131   : > { %5058 = vmatprep.subr.bf16.mxu1 %v5950_v0  ;;  %5114 = vmatprep.subr.bf16.mxu0 %v5950_v0  ;;  %v646_v20 = vpack.c.bf16 %v6304_v19, %v6296_v15  ;;  %v4985_v21 = vpop.f32.mrb[27].mxu0 }
 0x133   : > { %5091 = vmatmul.mubr.bf16.vlgmr.msra.gmra.mrb[40].mxu0 %v644_v2  ;;  %v5719_v2 = vld [vmem:[%s7282_s2 + $0x1e8] sm:$0xff]  }
 0x134   : > { %5059 = vmatpush3.bf16.msra.mxu1 %v5681_v17  ;;  %5115 = vmatpush3.bf16.msra.mxu0 %v5692_v18 }
 0x135   : > { %5060 = vmatprep.subr.bf16.mxu1 %v5950_v0  ;;  %5116 = vmatprep.subr.bf16.mxu0 %v5950_v0 }
 0x136   : > { %5130 = vmatprep.mubr.msk.bf16.mxu0 %vm5951_vm0, %v5950_v0  ;;  %v6320_v24 = vpop.f32.mrb[28].mxu0 }
 0x137   : > { %v4988_v25 = vpop.f32.mrb[29].mxu0 }
 0x138   : > { %5061 = vmatpush3.bf16.msra.mxu1 %v5683_v22  ;;  %5117 = vmatpush3.bf16.msra.mxu0 %v5694_v23  ;;  %v6328_v28 = vpop.f32.mrb[30].mxu0  ;;  %v5730_v25 = vld [vmem:[%s7285_s5] sm:$0xff]  }
 0x139   : > { %5062 = vmatprep.subr.bf16.mxu1 %v5950_v0  ;;  %5118 = vmatprep.subr.bf16.mxu0 %v5950_v0  ;;  %v647_v29 = vpack.c.bf16 %v6328_v28, %v6320_v24  ;;  %v4989_v30 = vpop.f32.mrb[31].mxu0  ;;  %v5735_v28 = vld [vmem:[%s7285_s5 + $0x18] sm:$0xff]  }
 0x13c   : > { %5063 = vmatpush3.bf16.msra.mxu1 %v5685_v26  ;;  %5119 = vmatpush3.bf16.msra.mxu0 %v5696_v27  ;;  %v5732_v26 = vld [vmem:[%s7285_s5 + $0x8] sm:$0xff]   ;;  %v5733_v27 = vld [vmem:[%s7285_s5 + $0x10] sm:$0xff]  }
 0x13d   : > { %5064 = vmatprep.subr.bf16.mxu1 %v5950_v0  ;;  %5120 = vmatprep.subr.bf16.mxu0 %v5950_v0 }
 0x13e   : > { %v6342_v33 = vpop.f32.mrb[32].mxu0 }
 0x13f   : > { %v4992_v34 = vpop.f32.mrb[33].mxu0 }
 0x140   : > { %5065 = vmatpush3.bf16.msra.mxu1 %v5687_v31  ;;  %5121 = vmatpush3.bf16.msra.mxu0 %v5698_v32  ;;  %v6350_v37 = vpop.f32.mrb[34].mxu0 }
 0x141   : > { %5066 = vmatprep.subr.bf16.mxu1 %v5950_v0  ;;  %5122 = vmatprep.subr.bf16.mxu0 %v5950_v0  ;;  %v648_v38 = vpack.c.bf16 %v6350_v37, %v6342_v33  ;;  %v4993_v39 = vpop.f32.mrb[35].mxu0  ;;  %v5739_v37 = vld [vmem:[%s7285_s5 + $0x28] sm:$0xff]  }
 0x142   : > { %v5741_v39 = vld [vmem:[%s7285_s5 + $0x30] sm:$0xff]  }
 0x144   : > { %5067 = vmatpush3.bf16.msra.mxu1 %v5689_v35  ;;  %5123 = vmatpush3.bf16.msra.mxu0 %v5700_v36 }
 0x145   : > { %5068 = vmatprep.subr.bf16.mxu1 %v5950_v0  ;;  %5124 = vmatprep.subr.bf16.mxu0 %v5950_v0 }
 0x148   : > { %5069 = vmatpush3.bf16.msra.mxu1 %v5691_v40  ;;  %5125 = vmatpush3.bf16.msra.mxu0 %v5702_v41 }
 0x149   : > { %5094 = vmatprep.subr.bf16.mxu1 %v5950_v0  ;;  %5126 = vmatprep.subr.bf16.mxu0 %v5950_v0 }
 0x14b   : > { %5071 = vmatmul.mubr.bf16.vlgmr.msra.gmra.mrb[8].mxu1 %v643_v56  ;;  %v5707_v56 = vld [vmem:[%s7282_s2 + $0x178] sm:$0xff]  }
 0x14c   : > { %5095 = vmatpush3.bf16.msra.mxu1 %v5693_v42  ;;  %5127 = vmatpush3.bf16.msra.mxu0 %v5704_v43 }
 0x14d   : > { %5096 = vmatprep.subr.bf16.mxu1 %v5950_v0  ;;  %5128 = vmatprep.subr.bf16.mxu0 %v5950_v0 }
 0x14e   : > { %5110 = vmatprep.mubr.msk.bf16.mxu1 %vm5951_vm0, %v5950_v0 }
 0x150   : > { %5097 = vmatpush3.bf16.msra.mxu1 %v5695_v44  ;;  %5129 = vmatpush3.bf16.msra.mxu0 %v5706_v45 }
 0x151   : > { %5098 = vmatprep.subr.bf16.mxu1 %v5950_v0  ;;  %5154 = vmatprep.subr.bf16.mxu0 %v5950_v0 }
 0x153   : > { %5131 = vmatmul.mubr.bf16.vlgmr.msra.gmra.mrb[44].mxu0 %v646_v20 }
 0x154   : > { %5099 = vmatpush3.bf16.msra.mxu1 %v5697_v46  ;;  %5155 = vmatpush3.bf16.msra.mxu0 %v5708_v47 }
 0x155   : > { %5100 = vmatprep.subr.bf16.mxu1 %v5950_v0  ;;  %5156 = vmatprep.subr.bf16.mxu0 %v5950_v0 }
 0x156   : > { %5170 = vmatprep.mubr.msk.bf16.mxu0 %vm5951_vm0, %v5950_v0 }
 0x158   : > { %5101 = vmatpush3.bf16.msra.mxu1 %v5699_v48  ;;  %5157 = vmatpush3.bf16.msra.mxu0 %v5710_v49 }
 0x159   : > { %5102 = vmatprep.subr.bf16.mxu1 %v5950_v0  ;;  %5158 = vmatprep.subr.bf16.mxu0 %v5950_v0 }
 0x15c   : > { %5103 = vmatpush3.bf16.msra.mxu1 %v5701_v50  ;;  %5159 = vmatpush3.bf16.msra.mxu0 %v5712_v51 }
 0x15d   : > { %5104 = vmatprep.subr.bf16.mxu1 %v5950_v0  ;;  %5160 = vmatprep.subr.bf16.mxu0 %v5950_v0 }
 0x160   : > { %5105 = vmatpush3.bf16.msra.mxu1 %v5703_v52  ;;  %5161 = vmatpush3.bf16.msra.mxu0 %v5714_v53 }
 0x161   : > { %5106 = vmatprep.subr.bf16.mxu1 %v5950_v0  ;;  %5162 = vmatprep.subr.bf16.mxu0 %v5950_v0 }
 0x164   : > { %5107 = vmatpush3.bf16.msra.mxu1 %v5705_v54  ;;  %5163 = vmatpush3.bf16.msra.mxu0 %v5716_v55 }
 0x165   : > { %5108 = vmatprep.subr.bf16.mxu1 %v5950_v0  ;;  %5164 = vmatprep.subr.bf16.mxu0 %v5950_v0 }
 0x168   : > { %5109 = vmatpush3.bf16.msra.mxu1 %v5707_v56  ;;  %5165 = vmatpush3.bf16.msra.mxu0 %v5718_v57 }
 0x169   : > { %5134 = vmatprep.subr.bf16.mxu1 %v5950_v0  ;;  %5166 = vmatprep.subr.bf16.mxu0 %v5950_v0 }
 0x16b   : > { %5111 = vmatmul.mubr.bf16.vlgmr.msra.gmra.mrb[12].mxu1 %v645_v11 }
 0x16c   : > { %5135 = vmatpush3.bf16.msra.mxu1 %v5709_v58  ;;  %5167 = vmatpush3.bf16.msra.mxu0 %v5720_v59  ;;  %v4238_v59 = vld [vmem:[%s7283_s3] ss:$0 sm:$0xff] }
 0x16d   : > { %5136 = vmatprep.subr.bf16.mxu1 %v5950_v0  ;;  %5168 = vmatprep.subr.bf16.mxu0 %v5950_v0 }
 0x16e   : > { %5150 = vmatprep.mubr.msk.bf16.mxu1 %vm5951_vm0, %v5950_v0 }
 0x170   : > { %5137 = vmatpush3.bf16.msra.mxu1 %v5711_v60  ;;  %5169 = vmatpush3.bf16.msra.mxu0 %v5722_v61 }
 0x171   : > { %5138 = vmatprep.subr.bf16.mxu1 %v5950_v0  ;;  %5216 = vmatprep.subr.bf16.mxu0 %v5950_v0 }
 0x173   : > { %5171 = vmatmul.mubr.bf16.vlgmr.msra.gmra.mrb[48].mxu0 %v648_v38 }
 0x174   : > { %5139 = vmatpush3.bf16.msra.mxu1 %v5713_v62  ;;  %5232 = vmatprep.mubr.msk.bf16.mxu0 %vm5951_vm0, %v5950_v0 }
 0x175   : > { %5140 = vmatprep.subr.bf16.mxu1 %v5950_v0  ;;  %5217 = vmatpush3.bf16.msra.mxu0 %v5730_v25 }
 0x176   : > { %5218 = vmatprep.subr.bf16.mxu0 %v5950_v0 }
 0x178   : > { %5141 = vmatpush3.bf16.msra.mxu1 %v5715_v63 }
 0x179   : > { %5142 = vmatprep.subr.bf16.mxu1 %v5950_v0  ;;  %5219 = vmatpush3.bf16.msra.mxu0 %v5732_v26  ;;  %v5745_v26 = vld [vmem:[%s7285_s5 + $0xc0] sm:$0xff]  }
 0x17a   : > { %5220 = vmatprep.subr.bf16.mxu0 %v5950_v0 }
 0x17c   : > { %5143 = vmatpush3.bf16.msra.mxu1 %v5717_v1 }
 0x17d   : > { %5144 = vmatprep.subr.bf16.mxu1 %v5950_v0  ;;  %5221 = vmatpush3.bf16.msra.mxu0 %v5733_v27 }
 0x17e   : > { %5222 = vmatprep.subr.bf16.mxu0 %v5950_v0 }
 0x180   : > { %5145 = vmatpush3.bf16.msra.mxu1 %v5719_v2 }
 0x181   : > { %5146 = vmatprep.subr.bf16.mxu1 %v5950_v0  ;;  %5223 = vmatpush3.bf16.msra.mxu0 %v5735_v28 }
 0x182   : > { %5224 = vmatprep.subr.bf16.mxu0 %v5950_v0 }
 0x184   : > { %5147 = vmatpush3.bf16.msra.mxu1 %v5721_v3 }
 0x185   : > { %5148 = vmatprep.subr.bf16.mxu1 %v5950_v0 }
 0x188   : > { %5149 = vmatpush3.bf16.msra.mxu1 %v5723_v4 }
 0x189   : > { %5174 = vmatprep.subr.bf16.mxu1 %v5950_v0 }
 0x18b   : > { %5151 = vmatmul.mubr.bf16.vlgmr.msra.gmra.mrb[16].mxu1 %v647_v29  ;;  %v5737_v29 = vld [vmem:[%s7285_s5 + $0x20] sm:$0xff]  }
 0x18c   : > { %5176 = vmatprep.mubr.msk.bf16.mxu1 %vm5951_vm0, %v5950_v0  ;;  %5225 = vmatpush3.bf16.msra.mxu0 %v5737_v29  ;;  %v5746_v29 = vld [vmem:[%s7285_s5 + $0x80] sm:$0xff]  }
 0x18d   : > { %5226 = vmatprep.subr.bf16.mxu0 %v5950_v0 }
 0x190   : > { %5227 = vmatpush3.bf16.msra.mxu0 %v5739_v37 }
 0x191   : > { %5228 = vmatprep.subr.bf16.mxu0 %v5950_v0 }
 0x194   : > { %5229 = vmatpush3.bf16.msra.mxu0 %v5741_v39  ;;  %v5750_v39 = vld [vmem:[%s7285_s5 + $0x90] sm:$0xff]  }
 0x195   : > { %5230 = vmatprep.subr.bf16.mxu0 %v5950_v0 }
 0x1de   : > { %v764_v5 = vpop.f32.mrb[0].mxu1 }
 0x1df   : > { %v5012_v6 = vpop.f32.mrb[1].mxu1 }
 0x1e0   : > { %v767_v7 = vpop.f32.mrb[2].mxu1 }
 0x1e1   : > { %v5013_v8 = vpop.f32.mrb[3].mxu1 }
 0x1e6   : > { %v959_v9 = vpop.f32.mrb[36].mxu0 }
 0x1e7   : > { %v5052_v10 = vpop.f32.mrb[37].mxu0 }
 0x1e8   : > { %v962_v11 = vpop.f32.mrb[38].mxu0  ;;  %v5729_v10 = vld [vmem:[%s7285_s5 + $0x40] sm:$0xff]  }
 0x1e9   : > { %v5053_v12 = vpop.f32.mrb[39].mxu0 }
 0x1ea   : > { %v5725_v12 = vld [vmem:[%s7284_s4 + $0x8] sm:$0xff]  }
 0x1fe   : > { %v853_v13 = vpop.f32.mrb[4].mxu1 }
 0x1ff   : > { %v854_v14 = vadd.f32 %v853_v13, %v764_v5  ;;  %v5032_v15 = vpop.f32.mrb[5].mxu1  ;;  %v5734_v13 = vld [vmem:[%s7285_s5 + $0x50] sm:$0xff]  }
 0x200   : > { %v856_v16 = vpop.f32.mrb[6].mxu1  ;;  %v5726_v15 = vld [vmem:[%s7284_s4 + $0x10] sm:$0xff]  }
 0x201   : > { %v857_v17 = vadd.f32 %v856_v16, %v767_v7  ;;  %v5033_v18 = vpop.f32.mrb[7].mxu1  ;;  %v966_v19 = vadd.f32 %v959_v9, %v854_v14  ;;  %v5724_v9 = vld [vmem:[%s7284_s4] sm:$0xff]   ;;  %v5736_v14 = vld [vmem:[%s7285_s5 + $0x58] sm:$0xff]  }
 0x202   : > { %v5738_v16 = vld [vmem:[%s7285_s5 + $0x60] sm:$0xff]   ;;  %v5727_v18 = vld [vmem:[%s7284_s4 + $0x18] sm:$0xff]  }
 0x203   : > { %v967_v20 = vadd.f32 %v962_v11, %v857_v17  ;;  %v5731_v11 = vld [vmem:[%s7285_s5 + $0x48] sm:$0xff]  }
 0x204   : > { %v5740_v17 = vld [vmem:[%s7285_s5 + $0x68] sm:$0xff]  }
 0x206   : > { %v1175_v21 = vpop.f32.mrb[40].mxu0 }
 0x207   : > { %v5092_v22 = vpop.f32.mrb[41].mxu0 }
 0x208   : > { %v1178_v23 = vpop.f32.mrb[42].mxu0  ;;  %v5744_v22 = vld [vmem:[%s7285_s5 + $0x78] sm:$0xff]  }
 0x209   : > { %v5093_v24 = vpop.f32.mrb[43].mxu0 }
 0x21e   : > { %v1067_v30 = vpop.f32.mrb[8].mxu1 }
 0x21f   : > { %v1074_v31 = vadd.f32 %v1067_v30, %v966_v19  ;;  %v5072_v32 = vpop.f32.mrb[9].mxu1  ;;  %v5742_v19 = vld [vmem:[%s7285_s5 + $0x70] sm:$0xff]  }
 0x220   : > { %v1070_v33 = vpop.f32.mrb[10].mxu1  ;;  %v5748_v32 = vld [vmem:[%s7285_s5 + $0x88] sm:$0xff]  }
 0x221   : > { %v1075_v34 = vadd.f32 %v1070_v33, %v967_v20  ;;  %v5073_v35 = vpop.f32.mrb[11].mxu1  ;;  %v1182_v36 = vadd.f32 %v1175_v21, %v1074_v31  ;;  %v5728_v20 = vld [vmem:[%s7284_s4 + $0x20] ss:$0 sps:$4 sm:$0xff]   ;;  %v5743_v21 = vld [vmem:[%s7285_s5 + $0x38] sm:$0xff]   ;;  %v5747_v31 = vld [vmem:[%s7285_s5 + $0xc8] sm:$0xff]  }
 0x222   : > { %5231 = vmatpush3.bf16.msra.mxu0 %v5743_v21  ;;  %v5749_v35 = vld [vmem:[%s7285_s5 + $0xd0] sm:$0xff]   ;;  %v5779_v21 = vld [vmem:[%s7285_s5 + $0x1c8] sm:$0xff]  }
 0x223   : > { %v1183_v38 = vadd.f32 %v1178_v23, %v1075_v34  ;;  %5256 = vmatprep.subr.bf16.mxu0 %v5950_v0 }
 0x226   : > { %v1391_v40 = vpop.f32.mrb[44].mxu0 }
 0x227   : > { %v5132_v41 = vpop.f32.mrb[45].mxu0 }
 0x228   : > { %v1394_v42 = vpop.f32.mrb[46].mxu0  ;;  %v5752_v41 = vld [vmem:[%s7285_s5 + $0x98] sm:$0xff]  }
 0x229   : > { %v5133_v43 = vpop.f32.mrb[47].mxu0 }
 0x23e   : > { %v1283_v44 = vpop.f32.mrb[12].mxu1 }
 0x23f   : > { %v1290_v45 = vadd.f32 %v1283_v44, %v1182_v36  ;;  %v5112_v46 = vpop.f32.mrb[13].mxu1  ;;  %v5753_v44 = vld [vmem:[%s7285_s5 + $0xe0] sm:$0xff]  }
 0x240   : > { %v1286_v47 = vpop.f32.mrb[14].mxu1 }
 0x241   : > { %v1291_v48 = vadd.f32 %v1286_v47, %v1183_v38  ;;  %v5113_v49 = vpop.f32.mrb[15].mxu1  ;;  %v1398_v50 = vadd.f32 %v1391_v40, %v1290_v45  ;;  %v5751_v40 = vld [vmem:[%s7285_s5 + $0xd8] sm:$0xff]  }
 0x242   : > { %v5755_v49 = vld [vmem:[%s7285_s5 + $0xe8] sm:$0xff]  }
 0x243   : > { %v1399_v51 = vadd.f32 %v1394_v42, %v1291_v48  ;;  %v5754_v48 = vld [vmem:[%s7285_s5 + $0xa0] sm:$0xff]  }
 0x246   : > { %v1607_v52 = vpop.f32.mrb[48].mxu0 }
 0x247   : > { %v5172_v53 = vpop.f32.mrb[49].mxu0 }
 0x248   : > { %v1610_v54 = vpop.f32.mrb[50].mxu0  ;;  %v5757_v53 = vld [vmem:[%s7285_s5 + $0xf0] sm:$0xff]  }
 0x249   : > { %v5173_v55 = vpop.f32.mrb[51].mxu0 }
 0x25e   : > { %v1499_v56 = vpop.f32.mrb[16].mxu1 }
 0x25f   : > { %v1506_v57 = vadd.f32 %v1499_v56, %v1398_v50  ;;  %v5152_v58 = vpop.f32.mrb[17].mxu1  ;;  %v5756_v50 = vld [vmem:[%s7285_s5 + $0xa8] sm:$0xff]  }
 0x260   : > { %v1502_v60 = vpop.f32.mrb[18].mxu1  ;;  %v5759_v58 = vld [vmem:[%s7285_s5 + $0xf8] sm:$0xff]  }
 0x261   : > { %v1614_v61 = vadd.f32 %v1607_v52, %v1506_v57  ;;  %v1507_v62 = vadd.f32 %v1502_v60, %v1399_v51  ;;  %v5153_v63 = vpop.f32.mrb[19].mxu1  ;;  %v5758_v57 = vld [vmem:[%s7285_s5 + $0xb0] sm:$0xff]  }
 0x262   : > { %v5761_v63 = vld [vmem:[%s7285_s5 + $0x140] sm:$0xff]  }
 0x263   : > { %v1623_v1 = vadd.f32 %v4238_v59, %v1614_v61  ;;  %v1615_v2 = vadd.f32 %v1610_v54, %v1507_v62 }
 0x265   : > { %v1627_v3 = vmul.f32 0.01, %v1623_v1  ;;  %v1624_v4 = vadd.f32 %v4238_v59, %v1615_v2  ;;  %vm1625_vm2 = vcmp.ge.f32.partialorder %v1623_v1, 0.0  ;;  %v5760_v59 = vld [vmem:[%s7285_s5 + $0xb8] sm:$0xff]  }
 0x267   : > { %vm1626_vm3 = vcmp.ge.f32.partialorder %v1624_v4, 0.0  ;;  %v1628_v5 = vmul.f32 0.01, %v1624_v4  ;;  %v1629_v6 = vsel %vm1625_vm2, %v1623_v1, %v1627_v3  ;;  %v5762_v3 = vld [vmem:[%s7285_s5 + $0x100] sm:$0xff]  }
 0x269   : > { %v1630_v7 = vsel %vm1626_vm3, %v1624_v4, %v1628_v5  ;;  %v5763_v4 = vld [vmem:[%s7285_s5 + $0x148] sm:$0xff]  }
 0x26a   : > { %v1631_v8 = vpack.c.bf16 %v1630_v7, %v1629_v6  ;;  %v5764_v5 = vld [vmem:[%s7285_s5 + $0x108] sm:$0xff]   ;;  %v5765_v6 = vld [vmem:[%s7285_s5 + $0x150] sm:$0xff]  }
 0x26b   : > { %v5766_v7 = vld [vmem:[%s7285_s5 + $0x110] sm:$0xff]  }
 0x26c   : > { %5175 = vmatpush3.bf16.msra.mxu1 %v1631_v8  ;;  %v5767_v8 = vld [vmem:[%s7285_s5 + $0x158] sm:$0xff]  }
 0x26d   : > { %5196 = vmatprep.subr.bf16.mxu1 %v5950_v0 }
 0x26f   : > { %5177 = vmatmul.mubr.msk.bf16.vlgmr.msra.gmra.mrb[20].mxu1 %vm1664_vm4, %v5724_v9  ;;  %v5768_v9 = vld [vmem:[%s7285_s5 + $0x118] sm:$0xff]  }
 0x270   : > { %5180 = vmatprep.mubr.msk.bf16.mxu1 %vm5951_vm0, %v5950_v0  ;;  %5197 = vmatpush3.bf16.msra.mxu1 %v5729_v10  ;;  %v5769_v10 = vld [vmem:[%s7285_s5 + $0x160] sm:$0xff]  }
 0x271   : > { %5198 = vmatprep.subr.bf16.mxu1 %v5950_v0 }
 0x274   : > { %5199 = vmatpush3.bf16.msra.mxu1 %v5731_v11  ;;  %v5770_v11 = vld [vmem:[%s7285_s5 + $0x120] sm:$0xff]  }
 0x275   : > { %5200 = vmatprep.subr.bf16.mxu1 %v5950_v0 }
 0x277   : > { %5181 = vmatmul.mubr.msk.bf16.gmra.mrb[24].mxu1 %vm1664_vm4, %v5725_v12  ;;  %v5771_v12 = vld [vmem:[%s7285_s5 + $0x168] sm:$0xff]  }
 0x278   : > { %5184 = vmatprep.mubr.msk.bf16.mxu1 %vm5951_vm0, %v5950_v0  ;;  %5201 = vmatpush3.bf16.msra.mxu1 %v5734_v13  ;;  %v5772_v13 = vld [vmem:[%s7285_s5 + $0x128] sm:$0xff]  }
 0x279   : > { %5202 = vmatprep.subr.bf16.mxu1 %v5950_v0 }
 0x27c   : > { %5203 = vmatpush3.bf16.msra.mxu1 %v5736_v14  ;;  %v5773_v14 = vld [vmem:[%s7285_s5 + $0x170] sm:$0xff]  }
 0x27d   : > { %5204 = vmatprep.subr.bf16.mxu1 %v5950_v0 }
 0x27f   : > { %5185 = vmatmul.mubr.msk.bf16.gmra.mrb[28].mxu1 %vm1664_vm4, %v5726_v15  ;;  %v5774_v15 = vld [vmem:[%s7285_s5 + $0x130] sm:$0xff]  }
 0x280   : > { %5188 = vmatprep.mubr.msk.bf16.mxu1 %vm5951_vm0, %v5950_v0  ;;  %5205 = vmatpush3.bf16.msra.mxu1 %v5738_v16  ;;  %v5775_v16 = vld [vmem:[%s7285_s5 + $0x178] sm:$0xff]  }
 0x281   : > { %5206 = vmatprep.subr.bf16.mxu1 %v5950_v0 }
 0x284   : > { %5207 = vmatpush3.bf16.msra.mxu1 %v5740_v17  ;;  %v5776_v17 = vld [vmem:[%s7285_s5 + $0x138] sm:$0xff]  }
 0x285   : > { %5208 = vmatprep.subr.bf16.mxu1 %v5950_v0 }
 0x287   : > { %5189 = vmatmul.mubr.msk.bf16.gmra.mrb[32].mxu1 %vm1664_vm4, %v5727_v18 }
 0x288   : > { %5192 = vmatprep.mubr.msk.bf16.mxu1 %vm5951_vm0, %v5950_v0  ;;  %5209 = vmatpush3.bf16.msra.mxu1 %v5742_v19  ;;  %v5777_v19 = vld [vmem:[%s7285_s5 + $0x1c0] sm:$0xff]  }
 0x289   : > { %5210 = vmatprep.subr.bf16.mxu1 %v5950_v0 }
 0x28c   : > { %5211 = vmatpush3.bf16.msra.mxu1 %v5744_v22  ;;  %v5780_v22 = vld [vmem:[%s7285_s5 + $0x188] sm:$0xff]  }
 0x28d   : > { %5236 = vmatprep.subr.bf16.mxu1 %v5950_v0 }
 0x28f   : > { %5193 = vmatmul.mubr.msk.bf16.gmra.mrb[36].mxu1 %vm1664_vm4, %v5728_v20  ;;  %v5778_v20 = vld [vmem:[%s7285_s5 + $0x180] sm:$0xff]  }
 0x290   : > { %5212 = vmatprep.mubr.msk.bf16.mxu1 %vm5951_vm0, %v5950_v0 }
 0x342   : > { %v1714_v23 = vpop.f32.mrb[20].mxu1 }
 0x343   : > { %v5178_v24 = vpop.f32.mrb[21].mxu1 }
 0x344   : > { %v1717_v25 = vpop.f32.mrb[22].mxu1  ;;  %v5782_v24 = vld [vmem:[%s7285_s5 + $0x190] sm:$0xff]  }
 0x345   : > { %v1752_v27 = vpack.c.bf16 %v1717_v25, %v1714_v23  ;;  %v5179_v28 = vpop.f32.mrb[23].mxu1  ;;  %v5781_v23 = vld [vmem:[%s7285_s5 + $0x1d0] sm:$0xff]   ;;  %v5783_v25 = vld [vmem:[%s7285_s5 + $0x1d8] sm:$0xff]  }
 0x346   : > { %v5786_v28 = vld [vmem:[%s7285_s5 + $0x1a0] sm:$0xff]  }
 0x347   : > { %v1791_v30 = vrot.slane %v1752_v27, 4  ;;  %5233 = vmatmul.mubr.bf16.vlgmr.msra.gmra.mrb[52].mxu0 %v1752_v27  ;;  %v5785_v27 = vld [vmem:[%s7285_s5 + $0x1e0] sm:$0xff]  }
 0x348   : > { %5257 = vmatpush3.bf16.msra.mxu0 %v5745_v26  ;;  %5272 = vmatprep.mubr.msk.bf16.mxu0 %vm5951_vm0, %v5950_v0  ;;  %v5784_v26 = vld [vmem:[%s7285_s5 + $0x198] sm:$0xff]  }
 0x349   : > { %5213 = vmatmul.mubr.bf16.vlgmr.msra.gmra.mrb[40].mxu1 %v1791_v30  ;;  %5258 = vmatprep.subr.bf16.mxu0 %v5950_v0  ;;  %v5788_v30 = vld [vmem:[%s7285_s5 + $0x1a8] sm:$0xff]  }
 0x34a   : > { %5237 = vmatpush3.bf16.msra.mxu1 %v5746_v29  ;;  %v1722_v33 = vpop.f32.mrb[24].mxu1  ;;  %5252 = vmatprep.mubr.msk.bf16.mxu1 %vm5951_vm0, %v5950_v0  ;;  %v5787_v29 = vld [vmem:[%s7285_s5 + $0x1e8] sm:$0xff]  }
 0x34b   : > { %5238 = vmatprep.subr.bf16.mxu1 %v5950_v0  ;;  %v5182_v34 = vpop.f32.mrb[25].mxu1 }
 0x34c   : > { %5259 = vmatpush3.bf16.msra.mxu0 %v5747_v31  ;;  %v1725_v36 = vpop.f32.mrb[26].mxu1  ;;  %v5789_v31 = vld [vmem:[%s7285_s5 + $0x1f0] sm:$0xff]   ;;  %v5792_v34 = vld [vmem:[%s7285_s5 + $0x1b8] sm:$0xff]  }
 0x34d   : > { %5260 = vmatprep.subr.bf16.mxu0 %v5950_v0  ;;  %v1753_v37 = vpack.c.bf16 %v1725_v36, %v1722_v33  ;;  %v5183_v38 = vpop.f32.mrb[27].mxu1  ;;  %v5791_v33 = vld [vmem:[%s7285_s5 + $0x1f8] sm:$0xff]   ;;  %v5793_v36 = vld [vmem:[%s7285_s5 + $0x200] sm:$0xff]  }
 0x34e   : > { %5239 = vmatpush3.bf16.msra.mxu1 %v5748_v32  ;;  %v5790_v32 = vld [vmem:[%s7285_s5 + $0x1b0] sm:$0xff]  }
 0x34f   : > { %5240 = vmatprep.subr.bf16.mxu1 %v5950_v0  ;;  %v2093_v61 = vrot.slane %v1753_v37, 4  ;;  %v5795_v38 = vld [vmem:[%s7285_s5 + $0x210] sm:$0xff]  }
 0x350   : > { %5261 = vmatpush3.bf16.msra.mxu0 %v5749_v35 }
 0x351   : > { %5262 = vmatprep.subr.bf16.mxu0 %v5950_v0 }
 0x352   : > { %5241 = vmatpush3.bf16.msra.mxu1 %v5750_v39  ;;  %v1730_v42 = vpop.f32.mrb[28].mxu1  ;;  %v5796_v39 = vld [vmem:[%s7285_s5 + $0x218] sm:$0xff]  }
 0x353   : > { %5242 = vmatprep.subr.bf16.mxu1 %v5950_v0  ;;  %v5186_v43 = vpop.f32.mrb[29].mxu1 }
 0x354   : > { %5263 = vmatpush3.bf16.msra.mxu0 %v5751_v40  ;;  %v1733_v45 = vpop.f32.mrb[30].mxu1  ;;  %v5797_v40 = vld [vmem:[%s7285_s5 + $0x220] sm:$0xff]   ;;  %v5800_v43 = vld [vmem:[%s7285_s5 + $0x238] sm:$0xff]  }
 0x355   : > { %5264 = vmatprep.subr.bf16.mxu0 %v5950_v0  ;;  %v6631_v46 = vpack.c.bf16 %v1733_v45, %v1730_v42  ;;  %v5187_v47 = vpop.f32.mrb[31].mxu1  ;;  %v5799_v42 = vld [vmem:[%s7285_s5 + $0x230] sm:$0xff]  }
 0x356   : > { %5243 = vmatpush3.bf16.msra.mxu1 %v5752_v41  ;;  %v5798_v41 = vld [vmem:[%s7285_s5 + $0x228] sm:$0xff]  }
 0x357   : > { %5244 = vmatprep.subr.bf16.mxu1 %v5950_v0  ;;  %v2308_v18 = vrot.slane %v6631_v46, 4 }
 0x358   : > { %5265 = vmatpush3.bf16.msra.mxu0 %v5753_v44 }
 0x359   : > { %5266 = vmatprep.subr.bf16.mxu0 %v5950_v0 }
 0x35a   : > { %5245 = vmatpush3.bf16.msra.mxu1 %v5754_v48  ;;  %v1738_v51 = vpop.f32.mrb[32].mxu1 }
 0x35b   : > { %5246 = vmatprep.subr.bf16.mxu1 %v5950_v0  ;;  %v5190_v52 = vpop.f32.mrb[33].mxu1 }
 0x35c   : > { %5267 = vmatpush3.bf16.msra.mxu0 %v5755_v49  ;;  %v1741_v54 = vpop.f32.mrb[34].mxu1 }
 0x35d   : > { %5268 = vmatprep.subr.bf16.mxu0 %v5950_v0  ;;  %v6649_v55 = vpack.c.bf16 %v1741_v54, %v1738_v51  ;;  %v5191_v56 = vpop.f32.mrb[35].mxu1 }
 0x35e   : > { %5247 = vmatpush3.bf16.msra.mxu1 %v5756_v50 }
 0x35f   : > { %5248 = vmatprep.subr.bf16.mxu1 %v5950_v0  ;;  %v2523_v35 = vrot.slane %v6649_v55, 4 }
 0x360   : > { %5269 = vmatpush3.bf16.msra.mxu0 %v5757_v53 }
 0x361   : > { %5270 = vmatprep.subr.bf16.mxu0 %v5950_v0 }
 0x362   : > { %5249 = vmatpush3.bf16.msra.mxu1 %v5758_v57  ;;  %v6662_v60 = vpop.f32.mrb[36].mxu1 }
 0x363   : > { %5250 = vmatprep.subr.bf16.mxu1 %v5950_v0  ;;  %v5194_v62 = vpop.f32.mrb[37].mxu1  ;;  %v1756_v44 = vpack.c.bf16 %v6662_v60, %v6662_v60 }
 0x364   : > { %5271 = vmatpush3.bf16.msra.mxu0 %v5759_v58  ;;  %v1749_v1 = vpop.f32.mrb[38].mxu1 }
 0x365   : > { %5296 = vmatprep.subr.bf16.mxu0 %v5950_v0  ;;  %v5195_v2 = vpop.f32.mrb[39].mxu1  ;;  %v5807_v1 = vld [vmem:[%s7288_s8] sm:$0xff]  }
 0x366   : > { %5251 = vmatpush3.bf16.msra.mxu1 %v5760_v59  ;;  %v5809_v2 = vld [vmem:[%s7288_s8 + $0x8] sm:$0xff]  }
 0x367   : > { %5273 = vmatmul.mubr.bf16.vlgmr.msra.gmra.mrb[56].mxu0 %v2093_v61  ;;  %5276 = vmatprep.subr.bf16.mxu1 %v5950_v0 }
 0x368   : > { %5297 = vmatpush3.bf16.msra.mxu0 %v5761_v63  ;;  %5312 = vmatprep.mubr.msk.bf16.mxu0 %vm5951_vm0, %v5950_v0 }
 0x369   : > { %5253 = vmatmul.mubr.bf16.vlgmr.msra.gmra.mrb[44].mxu1 %v1753_v37  ;;  %5298 = vmatprep.subr.bf16.mxu0 %v5950_v0  ;;  %v5794_v37 = vld [vmem:[%s7285_s5 + $0x208] sm:$0xff]  }
 0x36a   : > { %5277 = vmatpush3.bf16.msra.mxu1 %v5762_v3  ;;  %5292 = vmatprep.mubr.msk.bf16.mxu1 %vm5951_vm0, %v5950_v0  ;;  %v5811_v3 = vld [vmem:[%s7288_s8 + $0x10] sm:$0xff]  }
 0x36b   : > { %5278 = vmatprep.subr.bf16.mxu1 %v5950_v0 }
 0x36c   : > { %5299 = vmatpush3.bf16.msra.mxu0 %v5763_v4  ;;  %v5812_v4 = vld [vmem:[%s7288_s8 + $0x18] sm:$0xff]  }
 0x36d   : > { %5300 = vmatprep.subr.bf16.mxu0 %v5950_v0 }
 0x36e   : > { %5279 = vmatpush3.bf16.msra.mxu1 %v5764_v5  ;;  %v5814_v5 = vld [vmem:[%s7288_s8 + $0x20] sm:$0xff]  }
 0x36f   : > { %5280 = vmatprep.subr.bf16.mxu1 %v5950_v0 }
 0x370   : > { %5301 = vmatpush3.bf16.msra.mxu0 %v5765_v6 }
 0x371   : > { %5302 = vmatprep.subr.bf16.mxu0 %v5950_v0 }
 0x372   : > { %5281 = vmatpush3.bf16.msra.mxu1 %v5766_v7 }
 0x373   : > { %5282 = vmatprep.subr.bf16.mxu1 %v5950_v0 }
 0x374   : > { %5303 = vmatpush3.bf16.msra.mxu0 %v5767_v8 }
 0x375   : > { %5304 = vmatprep.subr.bf16.mxu0 %v5950_v0 }
 0x376   : > { %5283 = vmatpush3.bf16.msra.mxu1 %v5768_v9 }
 0x377   : > { %5284 = vmatprep.subr.bf16.mxu1 %v5950_v0 }
 0x378   : > { %5305 = vmatpush3.bf16.msra.mxu0 %v5769_v10  ;;  %v5816_v10 = vld [vmem:[%s7288_s8 + $0x28] sm:$0xff]  }
 0x379   : > { %5306 = vmatprep.subr.bf16.mxu0 %v5950_v0 }
 0x37a   : > { %5285 = vmatpush3.bf16.msra.mxu1 %v5770_v11 }
 0x37b   : > { %5286 = vmatprep.subr.bf16.mxu1 %v5950_v0 }
 0x37c   : > { %5307 = vmatpush3.bf16.msra.mxu0 %v5771_v12 }
 0x37d   : > { %5308 = vmatprep.subr.bf16.mxu0 %v5950_v0 }
 0x37e   : > { %5287 = vmatpush3.bf16.msra.mxu1 %v5772_v13 }
 0x37f   : > { %5288 = vmatprep.subr.bf16.mxu1 %v5950_v0 }
 0x380   : > { %5309 = vmatpush3.bf16.msra.mxu0 %v5773_v14 }
 0x381   : > { %5310 = vmatprep.subr.bf16.mxu0 %v5950_v0 }
 0x382   : > { %5289 = vmatpush3.bf16.msra.mxu1 %v5774_v15 }
 0x383   : > { %5290 = vmatprep.subr.bf16.mxu1 %v5950_v0 }
 0x384   : > { %5311 = vmatpush3.bf16.msra.mxu0 %v5775_v16 }
 0x385   : > { %5336 = vmatprep.subr.bf16.mxu0 %v5950_v0 }
 0x386   : > { %5291 = vmatpush3.bf16.msra.mxu1 %v5776_v17  ;;  %v5818_v17 = vld [vmem:[%s7288_s8 + $0x30] sm:$0xff]  }
 0x387   : > { %5313 = vmatmul.mubr.bf16.vlgmr.msra.gmra.mrb[60].mxu0 %v2308_v18  ;;  %5316 = vmatprep.subr.bf16.mxu1 %v5950_v0 }
 0x388   : > { %5337 = vmatpush3.bf16.msra.mxu0 %v5777_v19  ;;  %5352 = vmatprep.mubr.msk.bf16.mxu0 %vm5951_vm0, %v5950_v0 }
 0x389   : > { %5293 = vmatmul.mubr.bf16.vlgmr.msra.gmra.mrb[48].mxu1 %v6631_v46  ;;  %5338 = vmatprep.subr.bf16.mxu0 %v5950_v0 }
 0x38a   : > { %5317 = vmatpush3.bf16.msra.mxu1 %v5778_v20  ;;  %5332 = vmatprep.mubr.msk.bf16.mxu1 %vm5951_vm0, %v5950_v0 }
 0x38b   : > { %5318 = vmatprep.subr.bf16.mxu1 %v5950_v0 }
 0x38c   : > { %5339 = vmatpush3.bf16.msra.mxu0 %v5779_v21 }
 0x38d   : > { %5340 = vmatprep.subr.bf16.mxu0 %v5950_v0 }
 0x38e   : > { %5319 = vmatpush3.bf16.msra.mxu1 %v5780_v22 }
 0x38f   : > { %5320 = vmatprep.subr.bf16.mxu1 %v5950_v0 }
 0x390   : > { %5341 = vmatpush3.bf16.msra.mxu0 %v5781_v23 }
 0x391   : > { %5342 = vmatprep.subr.bf16.mxu0 %v5950_v0 }
 0x392   : > { %5321 = vmatpush3.bf16.msra.mxu1 %v5782_v24 }
 0x393   : > { %5322 = vmatprep.subr.bf16.mxu1 %v5950_v0 }
 0x394   : > { %5343 = vmatpush3.bf16.msra.mxu0 %v5783_v25 }
 0x395   : > { %5344 = vmatprep.subr.bf16.mxu0 %v5950_v0 }
 0x396   : > { %5323 = vmatpush3.bf16.msra.mxu1 %v5784_v26 }
 0x397   : > { %5324 = vmatprep.subr.bf16.mxu1 %v5950_v0 }
 0x398   : > { %5345 = vmatpush3.bf16.msra.mxu0 %v5785_v27 }
 0x399   : > { %5346 = vmatprep.subr.bf16.mxu0 %v5950_v0 }
 0x39a   : > { %5325 = vmatpush3.bf16.msra.mxu1 %v5786_v28 }
 0x39b   : > { %5326 = vmatprep.subr.bf16.mxu1 %v5950_v0 }
 0x39c   : > { %5347 = vmatpush3.bf16.msra.mxu0 %v5787_v29  ;;  %v4449_v29 = vld [vmem:[%s7286_s6] ss:$0 sm:$0xff] }
 0x39d   : > { %5348 = vmatprep.subr.bf16.mxu0 %v5950_v0 }
 0x39e   : > { %5327 = vmatpush3.bf16.msra.mxu1 %v5788_v30 }
 0x39f   : > { %5328 = vmatprep.subr.bf16.mxu1 %v5950_v0 }
 0x3a0   : > { %5349 = vmatpush3.bf16.msra.mxu0 %v5789_v31 }
 0x3a1   : > { %5350 = vmatprep.subr.bf16.mxu0 %v5950_v0 }
 0x3a2   : > { %5329 = vmatpush3.bf16.msra.mxu1 %v5790_v32 }
 0x3a3   : > { %5330 = vmatprep.subr.bf16.mxu1 %v5950_v0 }
 0x3a4   : > { %5351 = vmatpush3.bf16.msra.mxu0 %v5791_v33 }
 0x3a5   : > { %5376 = vmatprep.subr.bf16.mxu0 %v5950_v0 }
 0x3a6   : > { %5331 = vmatpush3.bf16.msra.mxu1 %v5792_v34 }
 0x3a7   : > { %5353 = vmatmul.mubr.bf16.vlgmr.msra.gmra.mrb[64].mxu0 %v2523_v35  ;;  %5356 = vmatprep.subr.bf16.mxu1 %v5950_v0 }
 0x3a8   : > { %5378 = vmatprep.mubr.msk.bf16.mxu0 %vm5951_vm0, %v5950_v0 }
 0x3a9   : > { %5333 = vmatmul.mubr.bf16.vlgmr.msra.gmra.mrb[52].mxu1 %v6649_v55 }
 0x3aa   : > { %5357 = vmatpush3.bf16.msra.mxu1 %v5793_v36  ;;  %5372 = vmatprep.mubr.msk.bf16.mxu1 %vm5951_vm0, %v5950_v0 }
 0x3ab   : > { %5358 = vmatprep.subr.bf16.mxu1 %v5950_v0 }
 0x3ae   : > { %5359 = vmatpush3.bf16.msra.mxu1 %v5794_v37 }
 0x3af   : > { %5360 = vmatprep.subr.bf16.mxu1 %v5950_v0 }
 0x3b2   : > { %5361 = vmatpush3.bf16.msra.mxu1 %v5795_v38 }
 0x3b3   : > { %5362 = vmatprep.subr.bf16.mxu1 %v5950_v0 }
 0x3b6   : > { %5363 = vmatpush3.bf16.msra.mxu1 %v5796_v39  ;;  %v5801_v39 = vld [vmem:[%s7287_s7] sm:$0xff]  }
 0x3b7   : > { %5364 = vmatprep.subr.bf16.mxu1 %v5950_v0 }
 0x3ba   : > { %5365 = vmatpush3.bf16.msra.mxu1 %v5797_v40  ;;  %v5806_v40 = vld [vmem:[%s7288_s8 + $0x40] sm:$0xff]  }
 0x3bb   : > { %5366 = vmatprep.subr.bf16.mxu1 %v5950_v0 }
 0x3be   : > { %5367 = vmatpush3.bf16.msra.mxu1 %v5798_v41  ;;  %v5808_v41 = vld [vmem:[%s7288_s8 + $0x48] sm:$0xff]  }
 0x3bf   : > { %5368 = vmatprep.subr.bf16.mxu1 %v5950_v0 }
 0x3c2   : > { %5369 = vmatpush3.bf16.msra.mxu1 %v5799_v42  ;;  %v5802_v42 = vld [vmem:[%s7287_s7 + $0x8] sm:$0xff]  }
 0x3c3   : > { %5370 = vmatprep.subr.bf16.mxu1 %v5950_v0 }
 0x3c6   : > { %5371 = vmatpush3.bf16.msra.mxu1 %v5800_v43  ;;  %v5810_v43 = vld [vmem:[%s7288_s8 + $0x50] sm:$0xff]  }
 0x3c7   : > { %5418 = vmatprep.subr.bf16.mxu1 %v5950_v0 }
 0x3c9   : > { %5373 = vmatmul.mubr.bf16.vlgmr.msra.gmra.mrb[56].mxu1 %v1756_v44  ;;  %v5813_v44 = vld [vmem:[%s7288_s8 + $0x58] sm:$0xff]  }
 0x3ca   : > { %5434 = vmatprep.mubr.msk.bf16.mxu1 %vm5951_vm0, %v5950_v0  ;;  %5419 = vmatpush3.bf16.msra.mxu1 %v5807_v1 }
 0x3cb   : > { %5420 = vmatprep.subr.bf16.mxu1 %v5950_v0 }
 0x3ce   : > { %5421 = vmatpush3.bf16.msra.mxu1 %v5809_v2  ;;  %v5827_v2 = vld [vmem:[%s7288_s8 + $0xd0] sm:$0xff]  }
 0x3cf   : > { %5422 = vmatprep.subr.bf16.mxu1 %v5950_v0 }
 0x3d2   : > { %5423 = vmatpush3.bf16.msra.mxu1 %v5811_v3 }
 0x3d3   : > { %5424 = vmatprep.subr.bf16.mxu1 %v5950_v0 }
 0x3d6   : > { %5425 = vmatpush3.bf16.msra.mxu1 %v5812_v4 }
 0x3d7   : > { %5426 = vmatprep.subr.bf16.mxu1 %v5950_v0 }
 0x3da   : > { %5427 = vmatpush3.bf16.msra.mxu1 %v5814_v5 }
 0x3db   : > { %5428 = vmatprep.subr.bf16.mxu1 %v5950_v0 }
 0x3de   : > { %5429 = vmatpush3.bf16.msra.mxu1 %v5816_v10 }
 0x3df   : > { %5430 = vmatprep.subr.bf16.mxu1 %v5950_v0 }
 0x3e2   : > { %5431 = vmatpush3.bf16.msra.mxu1 %v5818_v17  ;;  %v5832_v17 = vld [vmem:[%s7288_s8 + $0xa8] sm:$0xff]  }
 0x3e3   : > { %5432 = vmatprep.subr.bf16.mxu1 %v5950_v0 }
 0x41a   : > { %v1963_v45 = vpop.f32.mrb[52].mxu0 }
 0x41b   : > { %v5234_v46 = vpop.f32.mrb[53].mxu0 }
 0x41c   : > { %v1875_v47 = vpop.f32.mrb[40].mxu1  ;;  %v1966_v48 = vpop.f32.mrb[54].mxu0  ;;  %v5815_v46 = vld [vmem:[%s7288_s8 + $0x60] sm:$0xff]  }
 0x41d   : > { %v1964_v49 = vadd.f32 %v1963_v45, %v1875_v47  ;;  %v5214_v50 = vpop.f32.mrb[41].mxu1  ;;  %v5235_v51 = vpop.f32.mrb[55].mxu0  ;;  %v5803_v45 = vld [vmem:[%s7287_s7 + $0x10] sm:$0xff]   ;;  %v5817_v47 = vld [vmem:[%s7288_s8 + $0x68] sm:$0xff]   ;;  %v5804_v48 = vld [vmem:[%s7287_s7 + $0x18] sm:$0xff]  }
 0x41e   : > { %v1878_v52 = vpop.f32.mrb[42].mxu1  ;;  %v5805_v50 = vld [vmem:[%s7287_s7 + $0x20] ss:$0 sps:$4 sm:$0xff]   ;;  %v5820_v51 = vld [vmem:[%s7288_s8 + $0x38] sm:$0xff]  }
 0x41f   : > { %v5215_v53 = vpop.f32.mrb[43].mxu1  ;;  %5433 = vmatpush3.bf16.msra.mxu1 %v5820_v51  ;;  %v5821_v52 = vld [vmem:[%s7288_s8 + $0x78] sm:$0xff]   ;;  %v5857_v51 = vld [vmem:[%s7288_s8 + $0x1c8] sm:$0xff]  }
 0x420   : > { %5458 = vmatprep.subr.bf16.mxu1 %v5950_v0 }
 0x43a   : > { %v2177_v54 = vpop.f32.mrb[56].mxu0 }
 0x43b   : > { %v5274_v55 = vpop.f32.mrb[57].mxu0 }
 0x43c   : > { %v2068_v56 = vpop.f32.mrb[44].mxu1  ;;  %v2180_v57 = vpop.f32.mrb[58].mxu0 }
 0x43d   : > { %v2074_v58 = vadd.f32 %v2068_v56, %v1964_v49  ;;  %v5254_v59 = vpop.f32.mrb[45].mxu1  ;;  %v5275_v60 = vpop.f32.mrb[59].mxu0  ;;  %v5819_v49 = vld [vmem:[%s7288_s8 + $0x70] sm:$0xff]   ;;  %v5823_v56 = vld [vmem:[%s7288_s8 + $0xc0] sm:$0xff]  }
 0x43e   : > { %v2071_v61 = vpop.f32.mrb[46].mxu1  ;;  %v5822_v59 = vld [vmem:[%s7288_s8 + $0x80] sm:$0xff]  }
 0x43f   : > { %v5255_v62 = vpop.f32.mrb[47].mxu1  ;;  %v2183_v63 = vadd.f32 %v2177_v54, %v2074_v58  ;;  %v5825_v61 = vld [vmem:[%s7288_s8 + $0xc8] sm:$0xff]  }
 0x440   : > { %v5824_v62 = vld [vmem:[%s7288_s8 + $0x88] sm:$0xff]  }
 0x45a   : > { %v2392_v6 = vpop.f32.mrb[60].mxu0 }
 0x45b   : > { %v5314_v7 = vpop.f32.mrb[61].mxu0 }
 0x45c   : > { %v2283_v8 = vpop.f32.mrb[48].mxu1  ;;  %v2395_v9 = vpop.f32.mrb[62].mxu0  ;;  %v5829_v7 = vld [vmem:[%s7288_s8 + $0xd8] sm:$0xff]  }
 0x45d   : > { %v2289_v11 = vadd.f32 %v2283_v8, %v2183_v63  ;;  %v5294_v12 = vpop.f32.mrb[49].mxu1  ;;  %v5315_v13 = vpop.f32.mrb[63].mxu0  ;;  %v5828_v8 = vld [vmem:[%s7288_s8 + $0x98] sm:$0xff]  }
 0x45e   : > { %v2286_v14 = vpop.f32.mrb[50].mxu1 }
 0x45f   : > { %v5295_v15 = vpop.f32.mrb[51].mxu1  ;;  %v2398_v16 = vadd.f32 %v2392_v6, %v2289_v11  ;;  %v5826_v6 = vld [vmem:[%s7288_s8 + $0x90] sm:$0xff]   ;;  %v5831_v11 = vld [vmem:[%s7288_s8 + $0xe0] sm:$0xff]  }
 0x460   : > { %v5830_v15 = vld [vmem:[%s7288_s8 + $0xa0] sm:$0xff]  }
 0x47a   : > { %v2607_v18 = vpop.f32.mrb[64].mxu0 }
 0x47b   : > { %v5354_v19 = vpop.f32.mrb[65].mxu0 }
 0x47c   : > { %v2498_v20 = vpop.f32.mrb[52].mxu1  ;;  %v2610_v21 = vpop.f32.mrb[66].mxu0 }
 0x47d   : > { %v2504_v22 = vadd.f32 %v2498_v20, %v2398_v16  ;;  %v5334_v23 = vpop.f32.mrb[53].mxu1  ;;  %v5355_v24 = vpop.f32.mrb[67].mxu0  ;;  %v5833_v16 = vld [vmem:[%s7288_s8 + $0xe8] sm:$0xff]   ;;  %v5835_v20 = vld [vmem:[%s7288_s8 + $0xf0] sm:$0xff]  }
 0x47e   : > { %v2501_v25 = vpop.f32.mrb[54].mxu1  ;;  %v5834_v24 = vld [vmem:[%s7288_s8 + $0xb0] sm:$0xff]  }
 0x47f   : > { %v5335_v26 = vpop.f32.mrb[55].mxu1  ;;  %v2613_v27 = vadd.f32 %v2607_v18, %v2504_v22  ;;  %v5837_v25 = vld [vmem:[%s7288_s8 + $0xf8] sm:$0xff]  }
 0x480   : > { %v5836_v26 = vld [vmem:[%s7288_s8 + $0xb8] sm:$0xff]  }
 0x49c   : > { %v2713_v28 = vpop.f32.mrb[56].mxu1 }
 0x49d   : > { %v2719_v30 = vadd.f32 %v2713_v28, %v2613_v27  ;;  %v5374_v31 = vpop.f32.mrb[57].mxu1 }
 0x49e   : > { %v2716_v32 = vpop.f32.mrb[58].mxu1 }
 0x49f   : > { %v2727_v33 = vadd.f32 %v4449_v29, %v2719_v30  ;;  %v5375_v34 = vpop.f32.mrb[59].mxu1  ;;  %v5839_v30 = vld [vmem:[%s7288_s8 + $0x140] sm:$0xff]  }
 0x4a0   : > { %v5841_v34 = vld [vmem:[%s7288_s8 + $0x148] sm:$0xff]  }
 0x4a1   : > { %vm2728_vm5 = vcmp.ge.f32.partialorder %v2727_v33, 0.0  ;;  %v2729_v35 = vmul.f32 0.01, %v2727_v33 }
 0x4a3   : > { %v2730_v36 = vsel %vm2728_vm5, %v2727_v33, %v2729_v35  ;;  %v5838_v33 = vld [vmem:[%s7288_s8 + $0x100] sm:$0xff]   ;;  %v5840_v35 = vld [vmem:[%s7288_s8 + $0x108] sm:$0xff]  }
 0x4a4   : > { %v2731_v37 = vpack.c.bf16 %v2730_v36, %v2730_v36  ;;  %v5843_v36 = vld [vmem:[%s7288_s8 + $0x150] sm:$0xff]  }
 0x4a6   : > { %v2782_v38 = vsel %vm2780_vm6, %v2731_v37, 0  ;;  %v5842_v37 = vld [vmem:[%s7288_s8 + $0x110] sm:$0xff]  }
 0x4a7   : > { %5377 = vmatpush3.bf16.msra.mxu0 %v2782_v38  ;;  %v5845_v38 = vld [vmem:[%s7288_s8 + $0x158] sm:$0xff]  }
 0x4a8   : > { %5398 = vmatprep.subr.bf16.mxu0 %v5950_v0 }
 0x4aa   : > { %5379 = vmatmul.mubr.msk.bf16.vlgmr.msra.gmra.mrb[68].mxu0 %vm2764_vm7, %v5801_v39  ;;  %v5844_v39 = vld [vmem:[%s7288_s8 + $0x118] sm:$0xff]  }
 0x4ab   : > { %5382 = vmatprep.mubr.msk.bf16.mxu0 %vm5951_vm0, %v5950_v0  ;;  %5399 = vmatpush3.bf16.msra.mxu0 %v5806_v40  ;;  %v5847_v40 = vld [vmem:[%s7288_s8 + $0x160] sm:$0xff]  }
 0x4ac   : > { %5400 = vmatprep.subr.bf16.mxu0 %v5950_v0 }
 0x4af   : > { %5401 = vmatpush3.bf16.msra.mxu0 %v5808_v41  ;;  %v5846_v41 = vld [vmem:[%s7288_s8 + $0x120] sm:$0xff]  }
 0x4b0   : > { %5402 = vmatprep.subr.bf16.mxu0 %v5950_v0 }
 0x4b2   : > { %5383 = vmatmul.mubr.msk.bf16.gmra.mrb[72].mxu0 %vm2764_vm7, %v5802_v42  ;;  %v5849_v42 = vld [vmem:[%s7288_s8 + $0x168] sm:$0xff]  }
 0x4b3   : > { %5386 = vmatprep.mubr.msk.bf16.mxu0 %vm5951_vm0, %v5950_v0  ;;  %5403 = vmatpush3.bf16.msra.mxu0 %v5810_v43  ;;  %v5848_v43 = vld [vmem:[%s7288_s8 + $0x128] sm:$0xff]  }
 0x4b4   : > { %5404 = vmatprep.subr.bf16.mxu0 %v5950_v0 }
 0x4b7   : > { %5405 = vmatpush3.bf16.msra.mxu0 %v5813_v44  ;;  %v5851_v44 = vld [vmem:[%s7288_s8 + $0x170] sm:$0xff]  }
 0x4b8   : > { %5406 = vmatprep.subr.bf16.mxu0 %v5950_v0 }
 0x4ba   : > { %5387 = vmatmul.mubr.msk.bf16.gmra.mrb[76].mxu0 %vm2764_vm7, %v5803_v45  ;;  %v5850_v45 = vld [vmem:[%s7288_s8 + $0x130] sm:$0xff]  }
 0x4bb   : > { %5390 = vmatprep.mubr.msk.bf16.mxu0 %vm5951_vm0, %v5950_v0  ;;  %5407 = vmatpush3.bf16.msra.mxu0 %v5815_v46  ;;  %v5853_v46 = vld [vmem:[%s7288_s8 + $0x178] sm:$0xff]  }
 0x4bc   : > { %5408 = vmatprep.subr.bf16.mxu0 %v5950_v0 }
 0x4bf   : > { %5409 = vmatpush3.bf16.msra.mxu0 %v5817_v47  ;;  %v5852_v47 = vld [vmem:[%s7288_s8 + $0x138] sm:$0xff]  }
 0x4c0   : > { %5410 = vmatprep.subr.bf16.mxu0 %v5950_v0 }
 0x4c2   : > { %5391 = vmatmul.mubr.msk.bf16.gmra.mrb[80].mxu0 %vm2764_vm7, %v5804_v48 }
 0x4c3   : > { %5394 = vmatprep.mubr.msk.bf16.mxu0 %vm5951_vm0, %v5950_v0  ;;  %5411 = vmatpush3.bf16.msra.mxu0 %v5819_v49  ;;  %v5855_v49 = vld [vmem:[%s7288_s8 + $0x1c0] sm:$0xff]  }
 0x4c4   : > { %5412 = vmatprep.subr.bf16.mxu0 %v5950_v0 }
 0x4c7   : > { %5413 = vmatpush3.bf16.msra.mxu0 %v5821_v52  ;;  %v5856_v52 = vld [vmem:[%s7288_s8 + $0x188] sm:$0xff]  }
 0x4c8   : > { %5438 = vmatprep.subr.bf16.mxu0 %v5950_v0 }
 0x4ca   : > { %5395 = vmatmul.mubr.msk.bf16.gmra.mrb[84].mxu0 %vm2764_vm7, %v5805_v50  ;;  %v5854_v50 = vld [vmem:[%s7288_s8 + $0x180] sm:$0xff]  }
 0x4cb   : > { %5414 = vmatprep.mubr.msk.bf16.mxu0 %vm5951_vm0, %v5950_v0 }
 0x57d   : > { %v2818_v53 = vpop.f32.mrb[68].mxu0 }
 0x57e   : > { %v5380_v54 = vpop.f32.mrb[69].mxu0 }
 0x57f   : > { %v2821_v55 = vpop.f32.mrb[70].mxu0  ;;  %v5858_v54 = vld [vmem:[%s7288_s8 + $0x190] sm:$0xff]  }
 0x580   : > { %v2856_v57 = vpack.c.bf16 %v2821_v55, %v2818_v53  ;;  %v5381_v58 = vpop.f32.mrb[71].mxu0  ;;  %v5859_v53 = vld [vmem:[%s7288_s8 + $0x1d0] sm:$0xff]   ;;  %v5861_v55 = vld [vmem:[%s7288_s8 + $0x1d8] sm:$0xff]  }
 0x581   : > { %v5862_v58 = vld [vmem:[%s7288_s8 + $0x1a0] sm:$0xff]  }
 0x582   : > { %v2895_v60 = vrot.slane %v2856_v57, 4  ;;  %5435 = vmatmul.mubr.bf16.vlgmr.msra.gmra.mrb[60].mxu1 %v2856_v57  ;;  %v5863_v57 = vld [vmem:[%s7288_s8 + $0x1e0] sm:$0xff]  }
 0x583   : > { %5459 = vmatpush3.bf16.msra.mxu1 %v5823_v56  ;;  %5474 = vmatprep.mubr.msk.bf16.mxu1 %vm5951_vm0, %v5950_v0  ;;  %v5860_v56 = vld [vmem:[%s7288_s8 + $0x198] sm:$0xff]  }
 0x584   : > { %5415 = vmatmul.mubr.bf16.vlgmr.msra.gmra.mrb[88].mxu0 %v2895_v60  ;;  %5460 = vmatprep.subr.bf16.mxu1 %v5950_v0  ;;  %v5864_v60 = vld [vmem:[%s7288_s8 + $0x1a8] sm:$0xff]  }
 0x585   : > { %5439 = vmatpush3.bf16.msra.mxu0 %v5822_v59  ;;  %v2826_v63 = vpop.f32.mrb[72].mxu0  ;;  %5454 = vmatprep.mubr.msk.bf16.mxu0 %vm5951_vm0, %v5950_v0  ;;  %v5865_v59 = vld [vmem:[%s7288_s8 + $0x1e8] sm:$0xff]  }
 0x586   : > { %5440 = vmatprep.subr.bf16.mxu0 %v5950_v0  ;;  %v5384_v1 = vpop.f32.mrb[73].mxu0 }
 0x587   : > { %5461 = vmatpush3.bf16.msra.mxu1 %v5825_v61  ;;  %v2829_v3 = vpop.f32.mrb[74].mxu0  ;;  %v5867_v61 = vld [vmem:[%s7288_s8 + $0x1f0] sm:$0xff]   ;;  %v5868_v1 = vld [vmem:[%s7288_s8 + $0x1b8] sm:$0xff]  }
 0x588   : > { %5462 = vmatprep.subr.bf16.mxu1 %v5950_v0  ;;  %v2857_v4 = vpack.c.bf16 %v2829_v3, %v2826_v63  ;;  %v5385_v5 = vpop.f32.mrb[75].mxu0  ;;  %v5869_v63 = vld [vmem:[%s7288_s8 + $0x1f8] sm:$0xff]   ;;  %v5870_v3 = vld [vmem:[%s7288_s8 + $0x200] sm:$0xff]  }
 0x589   : > { %5441 = vmatpush3.bf16.msra.mxu0 %v5824_v62  ;;  %v5866_v62 = vld [vmem:[%s7288_s8 + $0x1b0] sm:$0xff]  }
 0x58a   : > { %5442 = vmatprep.subr.bf16.mxu0 %v5950_v0  ;;  %v3197_v28 = vrot.slane %v2857_v4, 4  ;;  %v5872_v5 = vld [vmem:[%s7288_s8 + $0x210] sm:$0xff]  }
 0x58b   : > { %5463 = vmatpush3.bf16.msra.mxu1 %v5827_v2 }
 0x58c   : > { %5464 = vmatprep.subr.bf16.mxu1 %v5950_v0 }
 0x58d   : > { %5443 = vmatpush3.bf16.msra.mxu0 %v5826_v6  ;;  %v2834_v9 = vpop.f32.mrb[76].mxu0  ;;  %v5873_v6 = vld [vmem:[%s7288_s8 + $0x218] sm:$0xff]  }
 0x58e   : > { %5444 = vmatprep.subr.bf16.mxu0 %v5950_v0  ;;  %v5388_v10 = vpop.f32.mrb[77].mxu0 }
 0x58f   : > { %5465 = vmatpush3.bf16.msra.mxu1 %v5829_v7  ;;  %v2837_v12 = vpop.f32.mrb[78].mxu0  ;;  %v5874_v7 = vld [vmem:[%s7288_s8 + $0x220] sm:$0xff]   ;;  %v5877_v10 = vld [vmem:[%s7288_s8 + $0x238] sm:$0xff]  }
 0x590   : > { %5466 = vmatprep.subr.bf16.mxu1 %v5950_v0  ;;  %v6983_v13 = vpack.c.bf16 %v2837_v12, %v2834_v9  ;;  %v5389_v14 = vpop.f32.mrb[79].mxu0  ;;  %v5876_v9 = vld [vmem:[%s7288_s8 + $0x230] sm:$0xff]   ;;  %v5878_v12 = vld [vmem:[%s7290_s10] sm:$0xff]  }
 0x591   : > { %5445 = vmatpush3.bf16.msra.mxu0 %v5828_v8  ;;  %v5875_v8 = vld [vmem:[%s7288_s8 + $0x228] sm:$0xff]   ;;  %v5880_v14 = vld [vmem:[%s7290_s10 + $0x10] sm:$0xff]  }
 0x592   : > { %5446 = vmatprep.subr.bf16.mxu0 %v5950_v0  ;;  %v3412_v48 = vrot.slane %v6983_v13, 4 }
 0x593   : > { %5467 = vmatpush3.bf16.msra.mxu1 %v5831_v11 }
 0x594   : > { %5468 = vmatprep.subr.bf16.mxu1 %v5950_v0 }
 0x595   : > { %5447 = vmatpush3.bf16.msra.mxu0 %v5830_v15  ;;  %v2842_v18 = vpop.f32.mrb[80].mxu0  ;;  %v5881_v15 = vld [vmem:[%s7290_s10 + $0x18] sm:$0xff]  }
 0x596   : > { %5448 = vmatprep.subr.bf16.mxu0 %v5950_v0  ;;  %v5392_v19 = vpop.f32.mrb[81].mxu0 }
 0x597   : > { %5469 = vmatpush3.bf16.msra.mxu1 %v5833_v16  ;;  %v2845_v21 = vpop.f32.mrb[82].mxu0  ;;  %v5882_v16 = vld [vmem:[%s7290_s10 + $0x20] sm:$0xff]  }
 0x598   : > { %5470 = vmatprep.subr.bf16.mxu1 %v5950_v0  ;;  %v7001_v22 = vpack.c.bf16 %v2845_v21, %v2842_v18  ;;  %v5393_v23 = vpop.f32.mrb[83].mxu0 }
 0x599   : > { %5449 = vmatpush3.bf16.msra.mxu0 %v5832_v17  ;;  %v5883_v17 = vld [vmem:[%s7290_s10 + $0x28] sm:$0xff]  }
 0x59a   : > { %5450 = vmatprep.subr.bf16.mxu0 %v5950_v0  ;;  %v3627_v2 = vrot.slane %v7001_v22, 4 }
 0x59b   : > { %5471 = vmatpush3.bf16.msra.mxu1 %v5835_v20 }
 0x59c   : > { %5472 = vmatprep.subr.bf16.mxu1 %v5950_v0 }
 0x59d   : > { %5451 = vmatpush3.bf16.msra.mxu0 %v5834_v24  ;;  %v7014_v27 = vpop.f32.mrb[84].mxu0 }
 0x59e   : > { %5452 = vmatprep.subr.bf16.mxu0 %v5950_v0  ;;  %v5396_v29 = vpop.f32.mrb[85].mxu0  ;;  %v2860_v11 = vpack.c.bf16 %v7014_v27, %v7014_v27 }
 0x59f   : > { %5473 = vmatpush3.bf16.msra.mxu1 %v5837_v25  ;;  %v2853_v31 = vpop.f32.mrb[86].mxu0  ;;  %v5884_v25 = vld [vmem:[%s7290_s10 + $0x30] sm:$0xff]  }
 0x5a0   : > { %5498 = vmatprep.subr.bf16.mxu1 %v5950_v0  ;;  %v5397_v32 = vpop.f32.mrb[87].mxu0 }
 0x5a1   : > { %5453 = vmatpush3.bf16.msra.mxu0 %v5836_v26 }
 0x5a2   : > { %5478 = vmatprep.subr.bf16.mxu0 %v5950_v0  ;;  %5475 = vmatmul.mubr.bf16.vlgmr.msra.gmra.mrb[64].mxu1 %v3197_v28  ;;  %v5885_v28 = vld [vmem:[%s7290_s10 + $0x38] sm:$0xff]  }
 0x5a3   : > { %5499 = vmatpush3.bf16.msra.mxu1 %v5839_v30  ;;  %5514 = vmatprep.mubr.msk.bf16.mxu1 %vm5951_vm0, %v5950_v0 }
 0x5a4   : > { %5455 = vmatmul.mubr.bf16.vlgmr.msra.gmra.mrb[92].mxu0 %v2857_v4  ;;  %5500 = vmatprep.subr.bf16.mxu1 %v5950_v0  ;;  %v5871_v4 = vld [vmem:[%s7288_s8 + $0x208] sm:$0xff]  }
 0x5a5   : > { %5479 = vmatpush3.bf16.msra.mxu0 %v5838_v33  ;;  %5494 = vmatprep.mubr.msk.bf16.mxu0 %vm5951_vm0, %v5950_v0 }
 0x5a6   : > { %5480 = vmatprep.subr.bf16.mxu0 %v5950_v0 }
 0x5a7   : > { %5501 = vmatpush3.bf16.msra.mxu1 %v5841_v34 }
 0x5a8   : > { %5502 = vmatprep.subr.bf16.mxu1 %v5950_v0 }
 0x5a9   : > { %5481 = vmatpush3.bf16.msra.mxu0 %v5840_v35 }
 0x5aa   : > { %5482 = vmatprep.subr.bf16.mxu0 %v5950_v0 }
 0x5ab   : > { %5503 = vmatpush3.bf16.msra.mxu1 %v5843_v36 }
 0x5ac   : > { %5504 = vmatprep.subr.bf16.mxu1 %v5950_v0 }
 0x5ad   : > { %5483 = vmatpush3.bf16.msra.mxu0 %v5842_v37 }
 0x5ae   : > { %5484 = vmatprep.subr.bf16.mxu0 %v5950_v0 }
 0x5af   : > { %5505 = vmatpush3.bf16.msra.mxu1 %v5845_v38 }
 0x5b0   : > { %5506 = vmatprep.subr.bf16.mxu1 %v5950_v0 }
 0x5b1   : > { %5485 = vmatpush3.bf16.msra.mxu0 %v5844_v39 }
 0x5b2   : > { %5486 = vmatprep.subr.bf16.mxu0 %v5950_v0 }
 0x5b3   : > { %5507 = vmatpush3.bf16.msra.mxu1 %v5847_v40 }
 0x5b4   : > { %5508 = vmatprep.subr.bf16.mxu1 %v5950_v0 }
 0x5b5   : > { %5487 = vmatpush3.bf16.msra.mxu0 %v5846_v41 }
 0x5b6   : > { %5488 = vmatprep.subr.bf16.mxu0 %v5950_v0 }
 0x5b7   : > { %5509 = vmatpush3.bf16.msra.mxu1 %v5849_v42 }
 0x5b8   : > { %5510 = vmatprep.subr.bf16.mxu1 %v5950_v0 }
 0x5b9   : > { %5489 = vmatpush3.bf16.msra.mxu0 %v5848_v43 }
 0x5ba   : > { %5490 = vmatprep.subr.bf16.mxu0 %v5950_v0 }
 0x5bb   : > { %5511 = vmatpush3.bf16.msra.mxu1 %v5851_v44 }
 0x5bc   : > { %5512 = vmatprep.subr.bf16.mxu1 %v5950_v0 }
 0x5bd   : > { %5491 = vmatpush3.bf16.msra.mxu0 %v5850_v45 }
 0x5be   : > { %5492 = vmatprep.subr.bf16.mxu0 %v5950_v0 }
 0x5bf   : > { %5513 = vmatpush3.bf16.msra.mxu1 %v5853_v46 }
 0x5c0   : > { %5538 = vmatprep.subr.bf16.mxu1 %v5950_v0 }
 0x5c1   : > { %5493 = vmatpush3.bf16.msra.mxu0 %v5852_v47 }
 0x5c2   : > { %5518 = vmatprep.subr.bf16.mxu0 %v5950_v0  ;;  %5515 = vmatmul.mubr.bf16.vlgmr.msra.gmra.mrb[68].mxu1 %v3412_v48 }
 0x5c3   : > { %5539 = vmatpush3.bf16.msra.mxu1 %v5855_v49  ;;  %5554 = vmatprep.mubr.msk.bf16.mxu1 %vm5951_vm0, %v5950_v0 }
 0x5c4   : > { %5495 = vmatmul.mubr.bf16.vlgmr.msra.gmra.mrb[96].mxu0 %v6983_v13  ;;  %5540 = vmatprep.subr.bf16.mxu1 %v5950_v0  ;;  %v5879_v13 = vld [vmem:[%s7290_s10 + $0x8] sm:$0xff]  }
 0x5c5   : > { %5519 = vmatpush3.bf16.msra.mxu0 %v5854_v50  ;;  %5534 = vmatprep.mubr.msk.bf16.mxu0 %vm5951_vm0, %v5950_v0 }
 0x5c6   : > { %5520 = vmatprep.subr.bf16.mxu0 %v5950_v0 }
 0x5c7   : > { %5541 = vmatpush3.bf16.msra.mxu1 %v5857_v51 }
 0x5c8   : > { %5542 = vmatprep.subr.bf16.mxu1 %v5950_v0 }
 0x5c9   : > { %5521 = vmatpush3.bf16.msra.mxu0 %v5856_v52 }
 0x5ca   : > { %5522 = vmatprep.subr.bf16.mxu0 %v5950_v0 }
 0x5cb   : > { %5543 = vmatpush3.bf16.msra.mxu1 %v5859_v53 }
 0x5cc   : > { %5544 = vmatprep.subr.bf16.mxu1 %v5950_v0 }
 0x5cd   : > { %5523 = vmatpush3.bf16.msra.mxu0 %v5858_v54 }
 0x5ce   : > { %5524 = vmatprep.subr.bf16.mxu0 %v5950_v0 }
 0x5cf   : > { %5545 = vmatpush3.bf16.msra.mxu1 %v5861_v55 }
 0x5d0   : > { %5546 = vmatprep.subr.bf16.mxu1 %v5950_v0 }
 0x5d1   : > { %5525 = vmatpush3.bf16.msra.mxu0 %v5860_v56 }
 0x5d2   : > { %5526 = vmatprep.subr.bf16.mxu0 %v5950_v0 }
 0x5d3   : > { %5547 = vmatpush3.bf16.msra.mxu1 %v5863_v57 }
 0x5d4   : > { %5548 = vmatprep.subr.bf16.mxu1 %v5950_v0 }
 0x5d5   : > { %5527 = vmatpush3.bf16.msra.mxu0 %v5862_v58 }
 0x5d6   : > { %5528 = vmatprep.subr.bf16.mxu0 %v5950_v0 }
 0x5d7   : > { %5549 = vmatpush3.bf16.msra.mxu1 %v5865_v59  ;;  %v4660_v59 = vld [vmem:[%s7289_s9] ss:$0 sm:$0xff] }
 0x5d8   : > { %5550 = vmatprep.subr.bf16.mxu1 %v5950_v0 }
 0x5d9   : > { %5529 = vmatpush3.bf16.msra.mxu0 %v5864_v60 }
 0x5da   : > { %5530 = vmatprep.subr.bf16.mxu0 %v5950_v0 }
 0x5db   : > { %5551 = vmatpush3.bf16.msra.mxu1 %v5867_v61 }
 0x5dc   : > { %5552 = vmatprep.subr.bf16.mxu1 %v5950_v0 }
 0x5dd   : > { %5531 = vmatpush3.bf16.msra.mxu0 %v5866_v62 }
 0x5de   : > { %5532 = vmatprep.subr.bf16.mxu0 %v5950_v0 }
 0x5df   : > { %5553 = vmatpush3.bf16.msra.mxu1 %v5869_v63 }
 0x5e0   : > { %5578 = vmatprep.subr.bf16.mxu1 %v5950_v0 }
 0x5e1   : > { %5533 = vmatpush3.bf16.msra.mxu0 %v5868_v1 }
 0x5e2   : > { %5558 = vmatprep.subr.bf16.mxu0 %v5950_v0  ;;  %5555 = vmatmul.mubr.bf16.vlgmr.msra.gmra.mrb[72].mxu1 %v3627_v2 }
 0x5e3   : > { %5594 = vmatprep.mubr.msk.bf16.mxu1 %vm5951_vm0, %v5950_v0  ;;  %5579 = vmatpush3.bf16.msra.mxu1 %v5878_v12 }
 0x5e4   : > { %5535 = vmatmul.mubr.bf16.vlgmr.msra.gmra.mrb[100].mxu0 %v7001_v22  ;;  %5580 = vmatprep.subr.bf16.mxu1 %v5950_v0 }
 0x5e5   : > { %5559 = vmatpush3.bf16.msra.mxu0 %v5870_v3  ;;  %5574 = vmatprep.mubr.msk.bf16.mxu0 %vm5951_vm0, %v5950_v0 }
 0x5e6   : > { %5560 = vmatprep.subr.bf16.mxu0 %v5950_v0 }
 0x5e7   : > { %5581 = vmatpush3.bf16.msra.mxu1 %v5879_v13 }
 0x5e8   : > { %5582 = vmatprep.subr.bf16.mxu1 %v5950_v0 }
 0x5e9   : > { %5561 = vmatpush3.bf16.msra.mxu0 %v5871_v4 }
 0x5ea   : > { %5562 = vmatprep.subr.bf16.mxu0 %v5950_v0 }
 0x5eb   : > { %5583 = vmatpush3.bf16.msra.mxu1 %v5880_v14 }
 0x5ec   : > { %5584 = vmatprep.subr.bf16.mxu1 %v5950_v0 }
 0x5ed   : > { %5563 = vmatpush3.bf16.msra.mxu0 %v5872_v5  ;;  %v3852_v5 = vld [vmem:[%s7291_s11] sm:$0x1] }
 0x5ee   : > { %5564 = vmatprep.subr.bf16.mxu0 %v5950_v0 }
 0x5ef   : > { %5585 = vmatpush3.bf16.msra.mxu1 %v5881_v15 }
 0x5f0   : > { %5586 = vmatprep.subr.bf16.mxu1 %v5950_v0 }
 0x5f1   : > { %5565 = vmatpush3.bf16.msra.mxu0 %v5873_v6 }
 0x5f2   : > { %5566 = vmatprep.subr.bf16.mxu0 %v5950_v0 }
 0x5f3   : > { %5587 = vmatpush3.bf16.msra.mxu1 %v5882_v16 }
 0x5f4   : > { %5588 = vmatprep.subr.bf16.mxu1 %v5950_v0 }
 0x5f5   : > { %5567 = vmatpush3.bf16.msra.mxu0 %v5874_v7 }
 0x5f6   : > { %5568 = vmatprep.subr.bf16.mxu0 %v5950_v0 }
 0x5f7   : > { %5589 = vmatpush3.bf16.msra.mxu1 %v5883_v17 }
 0x5f8   : > { %5590 = vmatprep.subr.bf16.mxu1 %v5950_v0 }
 0x5f9   : > { %5569 = vmatpush3.bf16.msra.mxu0 %v5875_v8 }
 0x5fa   : > { %5570 = vmatprep.subr.bf16.mxu0 %v5950_v0 }
 0x5fb   : > { %5591 = vmatpush3.bf16.msra.mxu1 %v5884_v25 }
 0x5fc   : > { %5592 = vmatprep.subr.bf16.mxu1 %v5950_v0 }
 0x5fd   : > { %5571 = vmatpush3.bf16.msra.mxu0 %v5876_v9 }
 0x5fe   : > { %5572 = vmatprep.subr.bf16.mxu0 %v5950_v0 }
 0x5ff   : > { %5593 = vmatpush3.bf16.msra.mxu1 %v5885_v28 }
 0x601   : > { %5573 = vmatpush3.bf16.msra.mxu0 %v5877_v10 }
 0x604   : > { %5575 = vmatmul.mubr.bf16.vlgmr.msra.gmra.mrb[104].mxu0 %v2860_v11 }
 0x655   : > { %v3067_v18 = vpop.f32.mrb[60].mxu1 }
 0x656   : > { %v5436_v19 = vpop.f32.mrb[61].mxu1 }
 0x657   : > { %v2979_v20 = vpop.f32.mrb[88].mxu0  ;;  %v3070_v21 = vpop.f32.mrb[62].mxu1 }
 0x658   : > { %v3068_v22 = vadd.f32 %v3067_v18, %v2979_v20  ;;  %v5416_v23 = vpop.f32.mrb[89].mxu0  ;;  %v5437_v24 = vpop.f32.mrb[63].mxu1 }
 0x659   : > { %v2982_v26 = vpop.f32.mrb[90].mxu0 }
 0x65a   : > { %v5417_v27 = vpop.f32.mrb[91].mxu0 }
 0x675   : > { %v3281_v29 = vpop.f32.mrb[64].mxu1 }
 0x676   : > { %v5476_v30 = vpop.f32.mrb[65].mxu1 }
 0x677   : > { %v3172_v31 = vpop.f32.mrb[92].mxu0  ;;  %v3284_v32 = vpop.f32.mrb[66].mxu1 }
 0x678   : > { %v3178_v33 = vadd.f32 %v3172_v31, %v3068_v22  ;;  %v5456_v34 = vpop.f32.mrb[93].mxu0  ;;  %v5477_v35 = vpop.f32.mrb[67].mxu1 }
 0x679   : > { %v3175_v36 = vpop.f32.mrb[94].mxu0 }
 0x67a   : > { %v3287_v37 = vadd.f32 %v3281_v29, %v3178_v33  ;;  %v5457_v38 = vpop.f32.mrb[95].mxu0 }
 0x695   : > { %v3496_v39 = vpop.f32.mrb[68].mxu1 }
 0x696   : > { %v5516_v40 = vpop.f32.mrb[69].mxu1 }
 0x697   : > { %v3387_v41 = vpop.f32.mrb[96].mxu0  ;;  %v3499_v42 = vpop.f32.mrb[70].mxu1 }
 0x698   : > { %v3393_v0 = vadd.f32 %v3387_v41, %v3287_v37  ;;  %v5496_v43 = vpop.f32.mrb[97].mxu0  ;;  %v5517_v44 = vpop.f32.mrb[71].mxu1 }
 0x699   : > { %v3390_v45 = vpop.f32.mrb[98].mxu0 }
 0x69a   : > { %v3502_v46 = vadd.f32 %v3496_v39, %v3393_v0  ;;  %v5497_v47 = vpop.f32.mrb[99].mxu0 }
 0x6b5   : > { %v3711_v48 = vpop.f32.mrb[72].mxu1 }
 0x6b6   : > { %v5556_v49 = vpop.f32.mrb[73].mxu1 }
 0x6b7   : > { %v3602_v50 = vpop.f32.mrb[100].mxu0  ;;  %v3714_v51 = vpop.f32.mrb[74].mxu1 }
 0x6b8   : > { %v3608_v52 = vadd.f32 %v3602_v50, %v3502_v46  ;;  %v5536_v53 = vpop.f32.mrb[101].mxu0  ;;  %v5557_v54 = vpop.f32.mrb[75].mxu1 }
 0x6b9   : > { %v3605_v55 = vpop.f32.mrb[102].mxu0 }
 0x6ba   : > { %v3717_v56 = vadd.f32 %v3711_v48, %v3608_v52  ;;  %v5537_v57 = vpop.f32.mrb[103].mxu0 }
 0x6d7   : > { %v3817_v58 = vpop.f32.mrb[104].mxu0 }
 0x6d8   : > { %v3823_v60 = vadd.f32 %v3817_v58, %v3717_v56  ;;  %v5576_v61 = vpop.f32.mrb[105].mxu0 }
 0x6d9   : > { %v3820_v62 = vpop.f32.mrb[106].mxu0 }
 0x6da   : > { %v3831_v63 = vadd.f32 %v4660_v59, %v3823_v60  ;;  %v5577_v1 = vpop.f32.mrb[107].mxu0 }
 0x6dc   : > { %vm3832_vm8 = vcmp.ge.f32.partialorder %v3831_v63, 0.0  ;;  %v3833_v2 = vmul.f32 0.01, %v3831_v63 }
 0x6de   : > { %v3834_v3 = vsel %vm3832_vm8, %v3831_v63, %v3833_v2 }
 0x6df   : > { %v3835_v4 = vpack.c.bf16 %v3834_v3, %v3834_v3 }
 0x6e1   : > { %5595 = vmatmul.mubr.bf16.vlgmr.msra.gmra.mrb[76].mxu1 %v3835_v4 }
 0x7b4   : > { %v3935_v6 = vpop.f32.mrb[76].mxu1 }
 0x7b5   : > { %v3936_v7 = vadd.f32 %v3935_v6, %v3852_v5  ;;  %v5596_v8 = vpop.f32.mrb[77].mxu1 }
 0x7b6   : > { %v3938_v9 = vpop.f32.mrb[78].mxu1 }
 0x7b7   : > { %3941 = vst [vmem:[%s405_s26] sm:$0x1] %v3936_v7  ;;  %v5597_v10 = vpop.f32.mrb[79].mxu1 }
 0x7b8   : > { %5899 = shalt.err (!%p5896_p3)
}
 0x7b9   : > { %s5900_s17 = scalar_lea.hbm %s7238_s16, 16  ;;  %s5904_s15 = scalar_lea.hbm %s7292_s12, 32 }
 0x7ba   : > { %p5901_p4 = scmp.ne.s32.totalorder %s7238_s16, %s5900_s17  ;;  %p5905_p9 = scmp.lt.u32.totalorder %s7238_s16, %s7292_s12 }
 0x7bb   : > { %p5906_p10 = scmp.lt.u32.totalorder %s5904_s15, %s5900_s17  ;;  %p5908_p12 = scmp.lt.u32.totalorder %s5900_s17, %s7238_s16 }
 0x7bc   : > { %p5902_p7 = pnand %p5901_p4, %p6056_p5 }
 0x7bd   : > { %p5907_p11 = por %p5906_p10, %p5905_p9 }
 0x7be   : > { %p5903_p8 = pneg %p5902_p7 }
 0x7bf   : > { %p5909_p13 = por %p5908_p12, %p5907_p11 }
 0x7c1   : > { %p5910_p0 = pnand %p5909_p13, %p5903_p8 }
 0x7c3   : > { %5913 = shalt.err (!%p5910_p0)
}
 0x7c4   : > { %5598 = dma.vmem_to_hbm [thread:$0]  (%p6056_p5), %s7240_s28, 16, %s7238_s16, %s3943_s18  }
 0x7c5 PF: > { %p5604_p1 = scmp.ge.s32.totalorder %s5948_s24, 2  ;;  %s3967_s25 = sand.u32 1, %s5936_s21  }
 0x7c6   : > { %s3968_s29 = scalar_lea.sflag [#allocation3], %s3967_s25 }
 0x7c7   : > { %p5601_p2 = pnand %p5604_p1, %p6060_p6 }
 0x7c9   : > { %5931 = dma.done.wait (!%p5601_p2), %s3968_s29, 16  }
 0x7ca   : > { %5933 = vsyncadd (!%p5601_p2), %s3968_s29, 4294967280  ;;  %p22_p3 = scmp.ge.s32.totalorder %s6043_s27, 4   ;;  %s7297_s21 = smov %s5940_s22 }
 0x7cb   : > { %s7298_s22 = smov %s5944_s23  ;;  %s7299_s23 = smov %s6054_s30 }
 0x7cc   : > { %s7300_s24 = smov %s6043_s27  ;;  %24 = sbr.rel (!%p22_p3) target bundleno = 5 (0x5), region = 127 }
 0x7d3   :  { %3972 = vsyncpa [#allocation3], 1 }
 0x7d4   :  { %3974 = vsyncpa [#allocation3 + $0x1], 1 }

</bundles_post_ra>
